<compile_context>
chip_gen: v7x
topology: tpu7x:2x2x1
jax: 0.10.0
libtpu: 0.0.40
codegen_flags: <defaults>
</compile_context>

<pallas_src>
import functools
import re

import jax
import jax.numpy as jnp
from jax.experimental import pallas as pl
from jax.experimental.pallas import tpu as pltpu


OUT_LANES = 128  # lane-dense output slab width


# ----------------------- activation helpers (exp/log/tanh only) --------------
def _elu(v):
    return jnp.where(v > 0, v, jnp.exp(jnp.minimum(v, 0.0)) - 1.0)


def _softplus(v):
    return jnp.maximum(v, 0.0) + jnp.log(1.0 + jnp.exp(-jnp.abs(v)))


def _sigmoid(v):
    return 0.5 * (jnp.tanh(0.5 * v) + 1.0)


# ----------------------- generation-aware configuration ----------------------
def _tpu_generation(default=6):
    """Best-effort TPU generation from device_kind; used only for perf knobs."""
    try:
        kind = jax.devices()[0].device_kind
    except Exception:
        return default
    m = re.search(r"(\d+)", kind)
    return int(m.group(1)) if m else default


def _pick_tb(B, gen):
    """Rows per grid step: grid=1 on single-TC chips, grid=2 on v7x (2 TCs)."""
    assert B % 8 == 0
    target = min(max(B // 2, 8), 256) if gen >= 7 else min(B, 256)
    tb = 8
    for cand in range(8, target + 1, 8):
        if B % cand == 0:
            tb = cand
    return tb


# ----------------------------- Pallas kernel ---------------------------------
def vae_su_kernel(x_ref, eps_ref, w1_ref, w_enc_ref, w3_ref, w5_ref,
                  wh0_ref, wh12_ref, wlast_ref, b_ref, out_ref,
                  *, H, Z, D, M, fuse_heads):
    f32 = jnp.float32
    bf16 = jnp.bfloat16
    x = x_ref[...]          # (TB, D) f32
    eps = eps_ref[...]      # (TB, Z) f32

    def bias(row, n):       # (1, n) static slice of the packed f32 bias slab
        return b_ref[row:row + 1, 0:n]

    def bcols(row, lo, hi):  # (1, hi-lo) static column window of a bias row
        return b_ref[row:row + 1, lo:hi]

    def dot(a, w):          # bf16 x bf16 MXU matmul, f32 accumulation
        return jnp.dot(a.astype(bf16), w, preferred_element_type=f32)

    # --- gaussian MLP encoder (dropout == identity at inference) ---
    h0 = _elu(dot(x, w1_ref[...]) + bias(0, H))
    h1 = jnp.tanh(dot(h0, w_enc_ref[0]) + bias(1, H))
    # full-width matmul (weight zero-padded to H lanes), slice afterwards
    ms = dot(h1, w_enc_ref[2]) + bias(2, H)                   # [mu | pre-sigma | 0]
    mu = ms[:, 0:Z]
    sigma = 1e-6 + _softplus(ms[:, Z:2 * Z])

    # --- reparameterization ---
    z = mu + sigma * eps

    # --- bernoulli MLP decoder ---
    d0 = jnp.tanh(dot(z, w3_ref[...]) + bias(3, H))
    d1 = _elu(dot(d0, w_enc_ref[1]) + bias(4, H))
    y = _sigmoid(dot(d1, w5_ref[...]) + bias(5, D))
    y = jnp.clip(y, 1e-8, 1.0 - 1e-8)
    loss = jnp.sum((y - x) ** 2, axis=-1, keepdims=True)      # (TB, 1) f32

    # --- mu_sigma_MLP heads (final layers fused, 0.5 weights folded in) ---
    if fuse_heads:
        # block-diagonal fusion: both heads per layer in one K=N=2M matmul
        h = jnp.concatenate([mu, sigma], axis=-1)             # (TB, 2Z)
        t = jnp.tanh(dot(h, wh0_ref[...]) + bias(6, 2 * M))
        t = _elu(dot(t, wh12_ref[0]) + bias(7, 2 * M))
        t = _elu(dot(t, wh12_ref[1]) + bias(8, 2 * M))        # (TB, 2M)
    else:
        t1 = jnp.tanh(dot(mu, wh0_ref[0]) + bcols(6, 0, M))
        t1 = _elu(dot(t1, wh12_ref[0]) + bcols(7, 0, M))
        t1 = _elu(dot(t1, wh12_ref[1]) + bcols(8, 0, M))
        t2 = jnp.tanh(dot(sigma, wh0_ref[1]) + bcols(6, M, 2 * M))
        t2 = _elu(dot(t2, wh12_ref[2]) + bcols(7, M, 2 * M))
        t2 = _elu(dot(t2, wh12_ref[3]) + bcols(8, M, 2 * M))
        t = jnp.concatenate([t1, t2], axis=-1)                # (TB, 2M)

    logits = dot(t, wlast_ref[...]) + bias(9, OUT_LANES)      # cols 0,1 meaningful

    # 2-class softmax == sigmoid of the logit difference (exact)
    p1 = _sigmoid(logits[:, 1:2] - logits[:, 0:1])
    p0 = 1.0 - p1

    # single lane-dense (TB, 128) store: col0/col1 = x_cent, col2 = recon loss
    pad = jnp.zeros((p0.shape[0], OUT_LANES - 3), f32)
    out_ref[...] = jnp.concatenate([p0, p1, loss, pad], axis=-1)


# ------------------------------- wrapper --------------------------------------
def vae_su_forward(x, eps, packed, *, tb, fuse_heads):
    """x: [B, D] f32, eps: [B, Z] f32, packed: dict from pack_params."""
    B, D = x.shape
    Z = eps.shape[1]
    H = packed["w1"].shape[1]
    M = packed["wlast"].shape[0] // 2
    assert B % tb == 0 and tb % 8 == 0

    kernel = functools.partial(vae_su_kernel, H=H, Z=Z, D=D, M=M,
                               fuse_heads=fuse_heads)

    def const(rank):
        return lambda i: (0,) * rank

    out = pl.pallas_call(
        kernel,
        out_shape=jax.ShapeDtypeStruct((B, OUT_LANES), jnp.float32),
        grid_spec=pltpu.PrefetchScalarGridSpec(
            num_scalar_prefetch=0,
            grid=(B // tb,),
            in_specs=[
                pl.BlockSpec((tb, D), lambda i: (i, 0)),           # x tile
                pl.BlockSpec((tb, Z), lambda i: (i, 0)),           # eps tile
                pl.BlockSpec(packed["w1"].shape, const(2)),        # (D, H)    bf16
                pl.BlockSpec(packed["w_enc"].shape, const(3)),     # (3, H, H) bf16
                pl.BlockSpec(packed["w3"].shape, const(2)),        # (Z, H)    bf16
                pl.BlockSpec(packed["w5"].shape, const(2)),        # (H, D)    bf16
                pl.BlockSpec(packed["wh0"].shape, const(len(packed["wh0"].shape))),
                pl.BlockSpec(packed["wh12"].shape, const(3)),      # head mid layers
                pl.BlockSpec(packed["wlast"].shape, const(2)),     # (2M, 128) bf16
                pl.BlockSpec(packed["bias"].shape, const(2)),      # (16, 256) f32
            ],
            out_specs=pl.BlockSpec((tb, OUT_LANES), lambda i: (i, 0)),
        ),
        compiler_params=pltpu.CompilerParams(
            dimension_semantics=("parallel",)),
    )(x, eps, packed["w1"], packed["w_enc"], packed["w3"], packed["w5"],
      packed["wh0"], packed["wh12"], packed["wlast"], packed["bias"])

    x_cent = out[:, 0:2]
    loss = out[:, 2]
    return x_cent, loss


# --------------------------- parameter packing --------------------------------
def pack_params(params, D, H, Z, M, *, fuse_heads):
    """Pack the 30 per-layer tensors into a few DMA-friendly bf16 arrays."""
    f32 = jnp.float32
    bf16 = jnp.bfloat16
    assert H == M and H % 128 == 0 and D % 128 == 0 and 2 * Z <= H

    w1 = params["w1"].astype(bf16)                                   # (D, H)
    w3 = params["w3"].astype(bf16)                                   # (Z, H)
    w5 = params["w5"].astype(bf16)                                   # (H, D)

    # [wmu | wsg] padded to H lanes so the encoder tail is a full-width matmul.
    wms = jnp.zeros((H, H), f32).at[:, :2 * Z].set(
        jnp.concatenate([params["wmu"], params["wsg"]], axis=-1))
    w_enc = jnp.stack([params["w2"], params["w4"], wms], axis=0).astype(bf16)

    if fuse_heads:
        # block-diagonal head weights: one K=N=2M matmul per head layer.
        wh0 = jnp.zeros((2 * Z, 2 * M), f32)
        wh0 = wh0.at[:Z, :M].set(params["mw0"]).at[Z:, M:].set(params["sw0"])
        wh1 = jnp.zeros((2 * M, 2 * M), f32)
        wh1 = wh1.at[:M, :M].set(params["mw1"]).at[M:, M:].set(params["sw1"])
        wh2 = jnp.zeros((2 * M, 2 * M), f32)
        wh2 = wh2.at[:M, :M].set(params["mw2"]).at[M:, M:].set(params["sw2"])
        wh0 = wh0.astype(bf16)                                       # (2Z, 2M)
        wh12 = jnp.stack([wh1, wh2], axis=0).astype(bf16)            # (2, 2M, 2M)
    else:
        wh0 = jnp.stack([params["mw0"], params["sw0"]], 0).astype(bf16)   # (2,Z,M)
        wh12 = jnp.stack([params["mw1"], params["mw2"],
                          params["sw1"], params["sw2"]], 0).astype(bf16)  # (4,M,M)

    # fused head output layer: [0.5*mw3 ; 0.5*sw3], padded to OUT_LANES lanes.
    wlast = jnp.zeros((2 * M, OUT_LANES), f32)
    wlast = wlast.at[:M, 0:2].set(0.5 * params["mw3"])
    wlast = wlast.at[M:, 0:2].set(0.5 * params["sw3"])
    wlast = wlast.astype(bf16)

    # all biases in one f32 (16, 256) slab -> a single DMA.
    bw = max(D, H, 2 * M, OUT_LANES)
    b = jnp.zeros((16, bw), f32)

    def put(slab, row, v):                      # v: (1, n)
        return slab.at[row, : v.shape[-1]].set(v[0])

    b = put(b, 0, params["b1"])
    b = put(b, 1, params["b2"])
    b = put(b, 2, jnp.concatenate([params["bmu"], params["bsg"]], -1))
    b = put(b, 3, params["b3"])
    b = put(b, 4, params["b4"])
    b = put(b, 5, params["b5"])
    b = put(b, 6, jnp.concatenate([params["mb0"], params["sb0"]], -1))
    b = put(b, 7, jnp.concatenate([params["mb1"], params["sb1"]], -1))
    b = put(b, 8, jnp.concatenate([params["mb2"], params["sb2"]], -1))
    b = put(b, 9, 0.5 * (params["mb3"] + params["sb3"]))

    return {"w1": w1, "w_enc": w_enc, "w3": w3, "w5": w5,
            "wh0": wh0, "wh12": wh12, "wlast": wlast, "bias": b}


# ------------------------- deterministic parameters ----------------------------
def init_params(key, D, H, Z, M):
    """Synthetic weights; Linear(in->out) stored transposed as W:(in,out), b:(1,out)."""
    params = {}

    def linear(k, name_w, name_b, fan_in, fan_out):
        kw, kb = jax.random.split(k)
        bound = 1.0 / jnp.sqrt(float(fan_in))
        params[name_w] = jax.random.uniform(kw, (fan_in, fan_out), jnp.float32,
                                            -bound, bound)
        params[name_b] = jax.random.uniform(kb, (1, fan_out), jnp.float32,
                                            -bound, bound)

    keys = jax.random.split(key, 15)
    linear(keys[0], "w1", "b1", D, H)          # VAE_2 encoder
    linear(keys[1], "w2", "b2", H, H)
    linear(keys[2], "wmu", "bmu", H, Z)
    linear(keys[3], "wsg", "bsg", H, Z)
    linear(keys[4], "w3", "b3", Z, H)          # VAE_2 decoder
    linear(keys[5], "w4", "b4", H, H)
    linear(keys[6], "w5", "b5", H, D)
    linear(keys[7], "mw0", "mb0", Z, M)        # mu_sigma_MLP mu_net
    linear(keys[8], "mw1", "mb1", M, M)
    linear(keys[9], "mw2", "mb2", M, M)
    linear(keys[10], "mw3", "mb3", M, 2)
    linear(keys[11], "sw0", "sb0", Z, M)       # mu_sigma_MLP sigma_net
    linear(keys[12], "sw1", "sb1", M, M)
    linear(keys[13], "sw2", "sb2", M, M)
    linear(keys[14], "sw3", "sb3", M, 2)
    return params


# ----------------------------- plain-JAX reference -----------------------------
def vae_su_reference(x, eps, params):
    def lin(h, w, b):
        return jnp.dot(h, w) + b

    h0 = _elu(lin(x, params["w1"], params["b1"]))
    h1 = jnp.tanh(lin(h0, params["w2"], params["b2"]))
    mu = lin(h1, params["wmu"], params["bmu"])
    sigma = 1e-6 + _softplus(lin(h1, params["wsg"], params["bsg"]))
    z = mu + sigma * eps
    d0 = jnp.tanh(lin(z, params["w3"], params["b3"]))
    d1 = _elu(lin(d0, params["w4"], params["b4"]))
    y = jnp.clip(_sigmoid(lin(d1, params["w5"], params["b5"])), 1e-8, 1.0 - 1e-8)

    def head(h, p):
        t = jnp.tanh(lin(h, params[p + "w0"], params[p + "b0"]))
        t = _elu(lin(t, params[p + "w1"], params[p + "b1"]))
        t = _elu(lin(t, params[p + "w2"], params[p + "b2"]))
        return lin(t, params[p + "w3"], params[p + "b3"])

    outputs = 0.5 * head(mu, "m") + 0.5 * head(sigma, "s")
    x_cent = jax.nn.softmax(outputs, axis=-1)
    loss = jnp.sum((y - x) ** 2, axis=-1)
    return x_cent, loss


# ---------------------------------- main ---------------------------------------
if __name__ == "__main__":
    # small shapes consistent with the module (dim_img, n_hidden, z_dim, mlp hidden)
    B, D, H, Z, M = 128, 256, 128, 32, 128

    gen = _tpu_generation()
    FUSE = gen >= 6            # block-diag head fusion for the 256x256 MXU (v6e/v7x)
    TB = _pick_tb(B, gen)      # grid=1 on single-TC chips, grid=2 on v7x

    key = jax.random.PRNGKey(0)
    k_x, k_eps, k_p = jax.random.split(key, 3)

    # binary-ish feature vectors like the malware-detector input
    x = (jax.random.uniform(k_x, (B, D)) < 0.3).astype(jnp.float32)
    eps = jax.random.normal(k_eps, (B, Z), dtype=jnp.float32)
    params = init_params(k_p, D, H, Z, M)
    packed = jax.tree_util.tree_map(
        jnp.asarray, pack_params(params, D, H, Z, M, fuse_heads=FUSE))

    fwd = jax.jit(functools.partial(vae_su_forward, tb=TB, fuse_heads=FUSE))
    x_cent, loss_recon = fwd(x, eps, packed)
    jax.block_until_ready((x_cent, loss_recon))

    # structural checks
    assert x_cent.shape == (B, 2)
    assert loss_recon.shape == (B,)
    assert bool(jnp.all(jnp.isfinite(x_cent))) and bool(jnp.all(jnp.isfinite(loss_recon)))
    assert bool(jnp.all(jnp.abs(jnp.sum(x_cent, axis=-1) - 1.0) < 1e-5))
    assert bool(jnp.all(loss_recon >= 0.0))

    # sanity check against a plain-JAX f32 reference (loose tol: bf16 MXU weights)
    cent_ref, loss_ref = vae_su_reference(x, eps, params)
    assert bool(jnp.max(jnp.abs(x_cent - cent_ref)) < 3e-2)
    assert bool(jnp.max(jnp.abs(loss_recon - loss_ref) / (jnp.abs(loss_ref) + 1.0)) < 5e-2)

    print("KERNEL_OK")
</pallas_src>

<mosaic_0001>
module attributes {stable_mosaic.version = 11 : i64} {
  func.func @vae_su_kernel(%arg0: i32, %arg1: memref<128x256xf32, #tpu.memory_space<vmem>>, %arg2: memref<128x32xf32, #tpu.memory_space<vmem>>, %arg3: memref<256x128xbf16, #tpu.memory_space<vmem>>, %arg4: memref<3x128x128xbf16, #tpu.memory_space<vmem>>, %arg5: memref<32x128xbf16, #tpu.memory_space<vmem>>, %arg6: memref<128x256xbf16, #tpu.memory_space<vmem>>, %arg7: memref<64x256xbf16, #tpu.memory_space<vmem>>, %arg8: memref<2x256x256xbf16, #tpu.memory_space<vmem>>, %arg9: memref<256x128xbf16, #tpu.memory_space<vmem>>, %arg10: memref<16x256xf32, #tpu.memory_space<vmem>>, %arg11: memref<128x128xf32, #tpu.memory_space<vmem>>) attributes {dimension_semantics = [#tpu.dimension_semantics<parallel>], iteration_bounds = array<i64: 1>, scalar_prefetch = 0 : i64, scratch_operands = 0 : i64, tpu.core_type = #tpu.core_type<tc>, window_params = [{transform_indices = @transform_0, window_bounds = array<i64: 128, 256>}, {transform_indices = @transform_1, window_bounds = array<i64: 128, 32>}, {pipeline_mode = #tpu.pipeline_mode<synchronous>, transform_indices = @transform_2, window_bounds = array<i64: 256, 128>}, {pipeline_mode = #tpu.pipeline_mode<synchronous>, transform_indices = @transform_3, window_bounds = array<i64: 3, 128, 128>}, {pipeline_mode = #tpu.pipeline_mode<synchronous>, transform_indices = @transform_4, window_bounds = array<i64: 32, 128>}, {pipeline_mode = #tpu.pipeline_mode<synchronous>, transform_indices = @transform_5, window_bounds = array<i64: 128, 256>}, {pipeline_mode = #tpu.pipeline_mode<synchronous>, transform_indices = @transform_6, window_bounds = array<i64: 64, 256>}, {pipeline_mode = #tpu.pipeline_mode<synchronous>, transform_indices = @transform_7, window_bounds = array<i64: 2, 256, 256>}, {pipeline_mode = #tpu.pipeline_mode<synchronous>, transform_indices = @transform_8, window_bounds = array<i64: 256, 128>}, {pipeline_mode = #tpu.pipeline_mode<synchronous>, transform_indices = @transform_9, window_bounds = array<i64: 16, 256>}, {transform_indices = @transform_10, window_bounds = array<i64: 128, 128>}]} {
    %c0 = arith.constant 0 : index
    %c0_0 = arith.constant 0 : index
    %0 = vector.load %arg1[%c0, %c0_0] : memref<128x256xf32, #tpu.memory_space<vmem>>, vector<128x256xf32>
    %c0_1 = arith.constant 0 : index
    %c0_2 = arith.constant 0 : index
    %1 = vector.load %arg2[%c0_1, %c0_2] : memref<128x32xf32, #tpu.memory_space<vmem>>, vector<128x32xf32>
    %c0_3 = arith.constant 0 : index
    %c0_4 = arith.constant 0 : index
    %2 = vector.load %arg3[%c0_3, %c0_4] : memref<256x128xbf16, #tpu.memory_space<vmem>>, vector<256x128xbf16>
    %3 = arith.truncf %0 : vector<128x256xf32> to vector<128x256xbf16>
    %cst = arith.constant dense<0.000000e+00> : vector<128x128xf32>
    %4 = tpu.matmul %3, %2, %cst {dimension_numbers = #tpu.dot_dimension_numbers<[1], [0], [0], [1], [0, 0, 1, 1], [], []>} : vector<128x256xbf16>, vector<256x128xbf16>, vector<128x128xf32> -> vector<128x128xf32>
    %c0_5 = arith.constant 0 : index
    %c0_6 = arith.constant 0 : index
    %5 = vector.load %arg10[%c0_5, %c0_6] : memref<16x256xf32, #tpu.memory_space<vmem>>, vector<1x128xf32>
    %6 = vector.broadcast %5 : vector<1x128xf32> to vector<128x128xf32>
    %7 = arith.addf %4, %6 : vector<128x128xf32>
    %cst_7 = arith.constant 0.000000e+00 : f32
    %8 = vector.broadcast %cst_7 : f32 to vector<128x128xf32>
    %9 = arith.cmpf ogt, %7, %8 : vector<128x128xf32>
    %cst_8 = arith.constant 0.000000e+00 : f32
    %10 = vector.broadcast %cst_8 : f32 to vector<128x128xf32>
    %11 = arith.minimumf %7, %10 : vector<128x128xf32>
    %12 = math.exp %11 : vector<128x128xf32>
    %cst_9 = arith.constant 1.000000e+00 : f32
    %13 = vector.broadcast %cst_9 : f32 to vector<128x128xf32>
    %14 = arith.subf %12, %13 : vector<128x128xf32>
    %15 = arith.select %9, %7, %14 : vector<128x128xi1>, vector<128x128xf32>
    %c0_10 = arith.constant 0 : index
    %c0_11 = arith.constant 0 : index
    %c0_12 = arith.constant 0 : index
    %16 = vector.load %arg4[%c0_10, %c0_11, %c0_12] : memref<3x128x128xbf16, #tpu.memory_space<vmem>>, vector<1x128x128xbf16>
    %17 = vector.shape_cast %16 : vector<1x128x128xbf16> to vector<128x128xbf16>
    %18 = arith.truncf %15 : vector<128x128xf32> to vector<128x128xbf16>
    %cst_13 = arith.constant dense<0.000000e+00> : vector<128x128xf32>
    %19 = tpu.matmul %18, %17, %cst_13 {dimension_numbers = #tpu.dot_dimension_numbers<[1], [0], [0], [1], [0, 0, 1, 1], [], []>} : vector<128x128xbf16>, vector<128x128xbf16>, vector<128x128xf32> -> vector<128x128xf32>
    %c1 = arith.constant 1 : index
    %c0_14 = arith.constant 0 : index
    %20 = vector.load %arg10[%c1, %c0_14] : memref<16x256xf32, #tpu.memory_space<vmem>>, vector<1x128xf32>
    %21 = vector.broadcast %20 : vector<1x128xf32> to vector<128x128xf32>
    %22 = arith.addf %19, %21 : vector<128x128xf32>
    %23 = math.tanh %22 : vector<128x128xf32>
    %c2 = arith.constant 2 : index
    %c0_15 = arith.constant 0 : index
    %c0_16 = arith.constant 0 : index
    %24 = vector.load %arg4[%c2, %c0_15, %c0_16] : memref<3x128x128xbf16, #tpu.memory_space<vmem>>, vector<1x128x128xbf16>
    %25 = vector.shape_cast %24 : vector<1x128x128xbf16> to vector<128x128xbf16>
    %26 = arith.truncf %23 : vector<128x128xf32> to vector<128x128xbf16>
    %cst_17 = arith.constant dense<0.000000e+00> : vector<128x128xf32>
    %27 = tpu.matmul %26, %25, %cst_17 {dimension_numbers = #tpu.dot_dimension_numbers<[1], [0], [0], [1], [0, 0, 1, 1], [], []>} : vector<128x128xbf16>, vector<128x128xbf16>, vector<128x128xf32> -> vector<128x128xf32>
    %c2_18 = arith.constant 2 : index
    %c0_19 = arith.constant 0 : index
    %28 = vector.load %arg10[%c2_18, %c0_19] : memref<16x256xf32, #tpu.memory_space<vmem>>, vector<1x128xf32>
    %29 = vector.broadcast %28 : vector<1x128xf32> to vector<128x128xf32>
    %30 = arith.addf %27, %29 : vector<128x128xf32>
    %31 = vector.extract_strided_slice %30 {offsets = [0, 0], sizes = [128, 32], strides = [1, 1]} : vector<128x128xf32> to vector<128x32xf32>
    %32 = vector.extract_strided_slice %30 {offsets = [0, 32], sizes = [128, 32], strides = [1, 1]} : vector<128x128xf32> to vector<128x32xf32>
    %cst_20 = arith.constant 0.000000e+00 : f32
    %33 = vector.broadcast %cst_20 : f32 to vector<128x32xf32>
    %34 = arith.maximumf %32, %33 : vector<128x32xf32>
    %35 = math.absf %32 : vector<128x32xf32>
    %cst_21 = arith.constant 0.000000e+00 : f32
    %36 = vector.broadcast %cst_21 : f32 to vector<128x32xf32>
    %37 = arith.subf %36, %35 : vector<128x32xf32>
    %38 = math.exp %37 : vector<128x32xf32>
    %cst_22 = arith.constant 1.000000e+00 : f32
    %39 = vector.broadcast %cst_22 : f32 to vector<128x32xf32>
    %40 = arith.addf %39, %38 : vector<128x32xf32>
    %41 = math.log %40 : vector<128x32xf32>
    %42 = arith.addf %34, %41 : vector<128x32xf32>
    %cst_23 = arith.constant 9.99999997E-7 : f32
    %43 = vector.broadcast %cst_23 : f32 to vector<128x32xf32>
    %44 = arith.addf %43, %42 : vector<128x32xf32>
    %45 = arith.mulf %44, %1 : vector<128x32xf32>
    %46 = arith.addf %31, %45 : vector<128x32xf32>
    %c0_24 = arith.constant 0 : index
    %c0_25 = arith.constant 0 : index
    %47 = vector.load %arg5[%c0_24, %c0_25] : memref<32x128xbf16, #tpu.memory_space<vmem>>, vector<32x128xbf16>
    %48 = arith.truncf %46 : vector<128x32xf32> to vector<128x32xbf16>
    %cst_26 = arith.constant dense<0.000000e+00> : vector<128x128xf32>
    %49 = tpu.matmul %48, %47, %cst_26 {dimension_numbers = #tpu.dot_dimension_numbers<[1], [0], [0], [1], [0, 0, 1, 1], [], []>} : vector<128x32xbf16>, vector<32x128xbf16>, vector<128x128xf32> -> vector<128x128xf32>
    %c3 = arith.constant 3 : index
    %c0_27 = arith.constant 0 : index
    %50 = vector.load %arg10[%c3, %c0_27] : memref<16x256xf32, #tpu.memory_space<vmem>>, vector<1x128xf32>
    %51 = vector.broadcast %50 : vector<1x128xf32> to vector<128x128xf32>
    %52 = arith.addf %49, %51 : vector<128x128xf32>
    %53 = math.tanh %52 : vector<128x128xf32>
    %c1_28 = arith.constant 1 : index
    %c0_29 = arith.constant 0 : index
    %c0_30 = arith.constant 0 : index
    %54 = vector.load %arg4[%c1_28, %c0_29, %c0_30] : memref<3x128x128xbf16, #tpu.memory_space<vmem>>, vector<1x128x128xbf16>
    %55 = vector.shape_cast %54 : vector<1x128x128xbf16> to vector<128x128xbf16>
    %56 = arith.truncf %53 : vector<128x128xf32> to vector<128x128xbf16>
    %cst_31 = arith.constant dense<0.000000e+00> : vector<128x128xf32>
    %57 = tpu.matmul %56, %55, %cst_31 {dimension_numbers = #tpu.dot_dimension_numbers<[1], [0], [0], [1], [0, 0, 1, 1], [], []>} : vector<128x128xbf16>, vector<128x128xbf16>, vector<128x128xf32> -> vector<128x128xf32>
    %c4 = arith.constant 4 : index
    %c0_32 = arith.constant 0 : index
    %58 = vector.load %arg10[%c4, %c0_32] : memref<16x256xf32, #tpu.memory_space<vmem>>, vector<1x128xf32>
    %59 = vector.broadcast %58 : vector<1x128xf32> to vector<128x128xf32>
    %60 = arith.addf %57, %59 : vector<128x128xf32>
    %cst_33 = arith.constant 0.000000e+00 : f32
    %61 = vector.broadcast %cst_33 : f32 to vector<128x128xf32>
    %62 = arith.cmpf ogt, %60, %61 : vector<128x128xf32>
    %cst_34 = arith.constant 0.000000e+00 : f32
    %63 = vector.broadcast %cst_34 : f32 to vector<128x128xf32>
    %64 = arith.minimumf %60, %63 : vector<128x128xf32>
    %65 = math.exp %64 : vector<128x128xf32>
    %cst_35 = arith.constant 1.000000e+00 : f32
    %66 = vector.broadcast %cst_35 : f32 to vector<128x128xf32>
    %67 = arith.subf %65, %66 : vector<128x128xf32>
    %68 = arith.select %62, %60, %67 : vector<128x128xi1>, vector<128x128xf32>
    %c0_36 = arith.constant 0 : index
    %c0_37 = arith.constant 0 : index
    %69 = vector.load %arg6[%c0_36, %c0_37] : memref<128x256xbf16, #tpu.memory_space<vmem>>, vector<128x256xbf16>
    %70 = arith.truncf %68 : vector<128x128xf32> to vector<128x128xbf16>
    %cst_38 = arith.constant dense<0.000000e+00> : vector<128x256xf32>
    %71 = tpu.matmul %70, %69, %cst_38 {dimension_numbers = #tpu.dot_dimension_numbers<[1], [0], [0], [1], [0, 0, 1, 1], [], []>} : vector<128x128xbf16>, vector<128x256xbf16>, vector<128x256xf32> -> vector<128x256xf32>
    %c5 = arith.constant 5 : index
    %c0_39 = arith.constant 0 : index
    %72 = vector.load %arg10[%c5, %c0_39] : memref<16x256xf32, #tpu.memory_space<vmem>>, vector<1x256xf32>
    %73 = vector.broadcast %72 : vector<1x256xf32> to vector<128x256xf32>
    %74 = arith.addf %71, %73 : vector<128x256xf32>
    %cst_40 = arith.constant 5.000000e-01 : f32
    %75 = vector.broadcast %cst_40 : f32 to vector<128x256xf32>
    %76 = arith.mulf %75, %74 : vector<128x256xf32>
    %77 = math.tanh %76 : vector<128x256xf32>
    %cst_41 = arith.constant 1.000000e+00 : f32
    %78 = vector.broadcast %cst_41 : f32 to vector<128x256xf32>
    %79 = arith.addf %77, %78 : vector<128x256xf32>
    %cst_42 = arith.constant 5.000000e-01 : f32
    %80 = vector.broadcast %cst_42 : f32 to vector<128x256xf32>
    %81 = arith.mulf %80, %79 : vector<128x256xf32>
    %cst_43 = arith.constant 9.99999993E-9 : f32
    %cst_44 = arith.constant 1.000000e+00 : f32
    %82 = vector.broadcast %cst_43 : f32 to vector<128x256xf32>
    %83 = arith.maximumf %82, %81 : vector<128x256xf32>
    %84 = vector.broadcast %cst_44 : f32 to vector<128x256xf32>
    %85 = arith.minimumf %84, %83 : vector<128x256xf32>
    %86 = arith.subf %85, %0 : vector<128x256xf32>
    %87 = arith.mulf %86, %86 : vector<128x256xf32>
    %cst_45 = arith.constant dense<0.000000e+00> : vector<128xf32>
    %88 = vector.multi_reduction <add>, %87, %cst_45 [1] : vector<128x256xf32> to vector<128xf32>
    %89 = vector.shape_cast %88 : vector<128xf32> to vector<128x1xf32>
    %90 = tpu.concatenate %31, %44 in 1 : vector<128x32xf32>, vector<128x32xf32> -> vector<128x64xf32>
    %c0_46 = arith.constant 0 : index
    %c0_47 = arith.constant 0 : index
    %91 = vector.load %arg7[%c0_46, %c0_47] : memref<64x256xbf16, #tpu.memory_space<vmem>>, vector<64x256xbf16>
    %92 = arith.truncf %90 : vector<128x64xf32> to vector<128x64xbf16>
    %cst_48 = arith.constant dense<0.000000e+00> : vector<128x256xf32>
    %93 = tpu.matmul %92, %91, %cst_48 {dimension_numbers = #tpu.dot_dimension_numbers<[1], [0], [0], [1], [0, 0, 1, 1], [], []>} : vector<128x64xbf16>, vector<64x256xbf16>, vector<128x256xf32> -> vector<128x256xf32>
    %c6 = arith.constant 6 : index
    %c0_49 = arith.constant 0 : index
    %94 = vector.load %arg10[%c6, %c0_49] : memref<16x256xf32, #tpu.memory_space<vmem>>, vector<1x256xf32>
    %95 = vector.broadcast %94 : vector<1x256xf32> to vector<128x256xf32>
    %96 = arith.addf %93, %95 : vector<128x256xf32>
    %97 = math.tanh %96 : vector<128x256xf32>
    %c0_50 = arith.constant 0 : index
    %c0_51 = arith.constant 0 : index
    %c0_52 = arith.constant 0 : index
    %98 = vector.load %arg8[%c0_50, %c0_51, %c0_52] : memref<2x256x256xbf16, #tpu.memory_space<vmem>>, vector<1x256x256xbf16>
    %99 = vector.shape_cast %98 : vector<1x256x256xbf16> to vector<256x256xbf16>
    %100 = arith.truncf %97 : vector<128x256xf32> to vector<128x256xbf16>
    %cst_53 = arith.constant dense<0.000000e+00> : vector<128x256xf32>
    %101 = tpu.matmul %100, %99, %cst_53 {dimension_numbers = #tpu.dot_dimension_numbers<[1], [0], [0], [1], [0, 0, 1, 1], [], []>} : vector<128x256xbf16>, vector<256x256xbf16>, vector<128x256xf32> -> vector<128x256xf32>
    %c7 = arith.constant 7 : index
    %c0_54 = arith.constant 0 : index
    %102 = vector.load %arg10[%c7, %c0_54] : memref<16x256xf32, #tpu.memory_space<vmem>>, vector<1x256xf32>
    %103 = vector.broadcast %102 : vector<1x256xf32> to vector<128x256xf32>
    %104 = arith.addf %101, %103 : vector<128x256xf32>
    %cst_55 = arith.constant 0.000000e+00 : f32
    %105 = vector.broadcast %cst_55 : f32 to vector<128x256xf32>
    %106 = arith.cmpf ogt, %104, %105 : vector<128x256xf32>
    %cst_56 = arith.constant 0.000000e+00 : f32
    %107 = vector.broadcast %cst_56 : f32 to vector<128x256xf32>
    %108 = arith.minimumf %104, %107 : vector<128x256xf32>
    %109 = math.exp %108 : vector<128x256xf32>
    %cst_57 = arith.constant 1.000000e+00 : f32
    %110 = vector.broadcast %cst_57 : f32 to vector<128x256xf32>
    %111 = arith.subf %109, %110 : vector<128x256xf32>
    %112 = arith.select %106, %104, %111 : vector<128x256xi1>, vector<128x256xf32>
    %c1_58 = arith.constant 1 : index
    %c0_59 = arith.constant 0 : index
    %c0_60 = arith.constant 0 : index
    %113 = vector.load %arg8[%c1_58, %c0_59, %c0_60] : memref<2x256x256xbf16, #tpu.memory_space<vmem>>, vector<1x256x256xbf16>
    %114 = vector.shape_cast %113 : vector<1x256x256xbf16> to vector<256x256xbf16>
    %115 = arith.truncf %112 : vector<128x256xf32> to vector<128x256xbf16>
    %cst_61 = arith.constant dense<0.000000e+00> : vector<128x256xf32>
    %116 = tpu.matmul %115, %114, %cst_61 {dimension_numbers = #tpu.dot_dimension_numbers<[1], [0], [0], [1], [0, 0, 1, 1], [], []>} : vector<128x256xbf16>, vector<256x256xbf16>, vector<128x256xf32> -> vector<128x256xf32>
    %c8 = arith.constant 8 : index
    %c0_62 = arith.constant 0 : index
    %117 = vector.load %arg10[%c8, %c0_62] : memref<16x256xf32, #tpu.memory_space<vmem>>, vector<1x256xf32>
    %118 = vector.broadcast %117 : vector<1x256xf32> to vector<128x256xf32>
    %119 = arith.addf %116, %118 : vector<128x256xf32>
    %cst_63 = arith.constant 0.000000e+00 : f32
    %120 = vector.broadcast %cst_63 : f32 to vector<128x256xf32>
    %121 = arith.cmpf ogt, %119, %120 : vector<128x256xf32>
    %cst_64 = arith.constant 0.000000e+00 : f32
    %122 = vector.broadcast %cst_64 : f32 to vector<128x256xf32>
    %123 = arith.minimumf %119, %122 : vector<128x256xf32>
    %124 = math.exp %123 : vector<128x256xf32>
    %cst_65 = arith.constant 1.000000e+00 : f32
    %125 = vector.broadcast %cst_65 : f32 to vector<128x256xf32>
    %126 = arith.subf %124, %125 : vector<128x256xf32>
    %127 = arith.select %121, %119, %126 : vector<128x256xi1>, vector<128x256xf32>
    %c0_66 = arith.constant 0 : index
    %c0_67 = arith.constant 0 : index
    %128 = vector.load %arg9[%c0_66, %c0_67] : memref<256x128xbf16, #tpu.memory_space<vmem>>, vector<256x128xbf16>
    %129 = arith.truncf %127 : vector<128x256xf32> to vector<128x256xbf16>
    %cst_68 = arith.constant dense<0.000000e+00> : vector<128x128xf32>
    %130 = tpu.matmul %129, %128, %cst_68 {dimension_numbers = #tpu.dot_dimension_numbers<[1], [0], [0], [1], [0, 0, 1, 1], [], []>} : vector<128x256xbf16>, vector<256x128xbf16>, vector<128x128xf32> -> vector<128x128xf32>
    %c9 = arith.constant 9 : index
    %c0_69 = arith.constant 0 : index
    %131 = vector.load %arg10[%c9, %c0_69] : memref<16x256xf32, #tpu.memory_space<vmem>>, vector<1x128xf32>
    %132 = vector.broadcast %131 : vector<1x128xf32> to vector<128x128xf32>
    %133 = arith.addf %130, %132 : vector<128x128xf32>
    %134 = vector.extract_strided_slice %133 {offsets = [0, 1], sizes = [128, 1], strides = [1, 1]} : vector<128x128xf32> to vector<128x1xf32>
    %135 = vector.extract_strided_slice %133 {offsets = [0, 0], sizes = [128, 1], strides = [1, 1]} : vector<128x128xf32> to vector<128x1xf32>
    %136 = arith.subf %134, %135 : vector<128x1xf32>
    %cst_70 = arith.constant 5.000000e-01 : f32
    %137 = vector.broadcast %cst_70 : f32 to vector<128x1xf32>
    %138 = arith.mulf %137, %136 : vector<128x1xf32>
    %139 = math.tanh %138 : vector<128x1xf32>
    %cst_71 = arith.constant 1.000000e+00 : f32
    %140 = vector.broadcast %cst_71 : f32 to vector<128x1xf32>
    %141 = arith.addf %139, %140 : vector<128x1xf32>
    %cst_72 = arith.constant 5.000000e-01 : f32
    %142 = vector.broadcast %cst_72 : f32 to vector<128x1xf32>
    %143 = arith.mulf %142, %141 : vector<128x1xf32>
    %cst_73 = arith.constant 1.000000e+00 : f32
    %144 = vector.broadcast %cst_73 : f32 to vector<128x1xf32>
    %145 = arith.subf %144, %143 : vector<128x1xf32>
    %cst_74 = arith.constant 0.000000e+00 : f32
    %146 = vector.broadcast %cst_74 : f32 to vector<128x125xf32>
    %147 = tpu.concatenate %145, %143, %89, %146 in 1 : vector<128x1xf32>, vector<128x1xf32>, vector<128x1xf32>, vector<128x125xf32> -> vector<128x128xf32>
    %c0_75 = arith.constant 0 : index
    %c0_76 = arith.constant 0 : index
    %148 = vector.load %arg11[%c0_75, %c0_76] : memref<128x128xf32, #tpu.memory_space<vmem>>, vector<128x128xf32>
    tpu.vector_store %arg11[%c0_75, %c0_76], %147 {strides = array<i32>} : memref<128x128xf32, #tpu.memory_space<vmem>>, vector<128x128xf32>,
    return
  }
  func.func @transform_0(%arg0: i32) -> (i32, i32) {
    %c0_i32 = arith.constant 0 : i32
    %c0_i32_0 = arith.constant 0 : i32
    return %arg0, %c0_i32 : i32, i32
  }
  func.func @transform_1(%arg0: i32) -> (i32, i32) {
    %c0_i32 = arith.constant 0 : i32
    %c0_i32_0 = arith.constant 0 : i32
    return %arg0, %c0_i32 : i32, i32
  }
  func.func @transform_2(%arg0: i32) -> (i32, i32) {
    %c0_i32 = arith.constant 0 : i32
    %c0_i32_0 = arith.constant 0 : i32
    %c0_i32_1 = arith.constant 0 : i32
    return %c0_i32, %c0_i32_0 : i32, i32
  }
  func.func @transform_3(%arg0: i32) -> (i32, i32, i32) {
    %c0_i32 = arith.constant 0 : i32
    %c0_i32_0 = arith.constant 0 : i32
    %c0_i32_1 = arith.constant 0 : i32
    %c0_i32_2 = arith.constant 0 : i32
    return %c0_i32, %c0_i32_0, %c0_i32_1 : i32, i32, i32
  }
  func.func @transform_4(%arg0: i32) -> (i32, i32) {
    %c0_i32 = arith.constant 0 : i32
    %c0_i32_0 = arith.constant 0 : i32
    %c0_i32_1 = arith.constant 0 : i32
    return %c0_i32, %c0_i32_0 : i32, i32
  }
  func.func @transform_5(%arg0: i32) -> (i32, i32) {
    %c0_i32 = arith.constant 0 : i32
    %c0_i32_0 = arith.constant 0 : i32
    %c0_i32_1 = arith.constant 0 : i32
    return %c0_i32, %c0_i32_0 : i32, i32
  }
  func.func @transform_6(%arg0: i32) -> (i32, i32) {
    %c0_i32 = arith.constant 0 : i32
    %c0_i32_0 = arith.constant 0 : i32
    %c0_i32_1 = arith.constant 0 : i32
    return %c0_i32, %c0_i32_0 : i32, i32
  }
  func.func @transform_7(%arg0: i32) -> (i32, i32, i32) {
    %c0_i32 = arith.constant 0 : i32
    %c0_i32_0 = arith.constant 0 : i32
    %c0_i32_1 = arith.constant 0 : i32
    %c0_i32_2 = arith.constant 0 : i32
    return %c0_i32, %c0_i32_0, %c0_i32_1 : i32, i32, i32
  }
  func.func @transform_8(%arg0: i32) -> (i32, i32) {
    %c0_i32 = arith.constant 0 : i32
    %c0_i32_0 = arith.constant 0 : i32
    %c0_i32_1 = arith.constant 0 : i32
    return %c0_i32, %c0_i32_0 : i32, i32
  }
  func.func @transform_9(%arg0: i32) -> (i32, i32) {
    %c0_i32 = arith.constant 0 : i32
    %c0_i32_0 = arith.constant 0 : i32
    %c0_i32_1 = arith.constant 0 : i32
    return %c0_i32, %c0_i32_0 : i32, i32
  }
  func.func @transform_10(%arg0: i32) -> (i32, i32) {
    %c0_i32 = arith.constant 0 : i32
    %c0_i32_0 = arith.constant 0 : i32
    return %arg0, %c0_i32 : i32, i32
  }
}

</mosaic_0001>

<bundles_post_ra>
// kernel: vae_su_forward.1
= control target key start
LH: loop header
LB: loop body
LE: loop exit
PB: predicated region body
PF: predicated region fallthrough
CT: control target
= control target key end

     0   :  { %15 = vsyncpa [#allocation3], 0  ;;  %s7280_s0 = inlined_call_operand.hbm [shape: f32[128,256], index: 0, kind: input, shape index: {}]   ;;  %s7281_s1 = inlined_call_operand.vmem [shape: f32[128,32], index: 1, kind: input, shape index: {}]   ;;  %s7282_s2 = inlined_call_operand.vmem [shape: bf16[256,128], index: 2, kind: input, shape index: {}]   ;;  %s7283_s3 = inlined_call_operand.hbm [shape: bf16[3,128,128], index: 3, kind: input, shape index: {}]   ;;  %s7284_s4 = inlined_call_operand.hbm [shape: bf16[32,128], index: 4, kind: input, shape index: {}]   ;;  %s7285_s5 = inlined_call_operand.hbm [shape: bf16[128,256], index: 5, kind: input, shape index: {}]   ;;  %s7286_s6 = inlined_call_operand.hbm [shape: bf16[64,256], index: 6, kind: input, shape index: {}]   ;;  %s7287_s7 = inlined_call_operand.hbm [shape: bf16[2,256,256], index: 7, kind: input, shape index: {}]   ;;  %s7288_s8 = inlined_call_operand.hbm [shape: bf16[256,128], index: 8, kind: input, shape index: {}]   ;;  %s7289_s9 = inlined_call_operand.vmem [shape: f32[16,256], index: 9, kind: input, shape index: {}]   ;;  %s7290_s10 = inlined_call_operand.vmem [shape: f32[128,128], index: 10, kind: output, shape index: {}]  }
   0x1   :  { %16 = vsyncpa [#allocation5], 0 }
   0x2   :  { %17 = vsyncpa [#allocation8], 0 }
   0x3   :  { %18 = vsyncpa [#allocation11], 0  ;;  %s5469_s13 = smov [#allocation4]   ;;  %s5307_s17 = scalar_lea.hbm %s7283_s3, 3072 }
   0x4   :  { %s40_s14 = sshll.u32 %s5469_s13, 4  ;;  %p5308_p0 = scmp.ne.s32.totalorder %s7283_s3, %s5307_s17  ;;  %s41_s14 = int_to_ptr.vmem [resolvable:$true] %s40_s14 }
   0x5   :  { %p5311_p1 = scmp.lt.u32.totalorder %s5307_s17, %s7283_s3 }
   0x7   :  { %p5313_p2 = pnand %p5311_p1, %p5308_p0 }
   0x9   :  { %5316 = shalt.err (!%p5313_p2)
}
   0xa   :  { %s5317_s22 = scalar_lea.vmem %s41_s14, 3072  ;;  %p5322_p4 = scmp.lt.s32.totalorder %s41_s14, %s41_s14 }
   0xb   :  { %p5318_p3 = scmp.ne.s32.totalorder %s41_s14, %s5317_s22  ;;  %p5323_p5 = scmp.lt.s32.totalorder %s5317_s22, %s5317_s22 }
   0xd   :  { %p5324_p6 = por %p5323_p5, %p5322_p4 }
   0xf   :  { %p5325_p7 = pnand %p5324_p6, %p5318_p3 }
  0x11   :  { %5328 = shalt.err (!%p5325_p7)
}
  0x12   :  { %s5470_s23 = smov 64   ;;  %s5471_s24 = smov 4  }
  0x13   :  { %46 = dma.hbm_to_vmem [thread:$0]  %s7283_s3, 3072, %s41_s14, [#allocation5], %s5470_s23, %s5470_s23, %s5471_s24  }
  0x14   :  { %s5472_s27 = smov [#allocation7]   ;;  %s5329_s11 = scalar_lea.hbm %s7285_s5, 2048 }
  0x15   :  { %s64_s28 = sshll.u32 %s5472_s27, 4  ;;  %p5330_p8 = scmp.ne.s32.totalorder %s7285_s5, %s5329_s11  ;;  %s65_s28 = int_to_ptr.vmem [resolvable:$true] %s64_s28 }
  0x16   :  { %p5333_p9 = scmp.lt.u32.totalorder %s5329_s11, %s7285_s5 }
  0x18   :  { %p5335_p10 = pnand %p5333_p9, %p5330_p8 }
  0x1a   :  { %5338 = shalt.err (!%p5335_p10)
}
  0x1b   :  { %s5339_s17 = scalar_lea.vmem %s65_s28, 2048  ;;  %p5344_p12 = scmp.lt.s32.totalorder %s65_s28, %s65_s28 }
  0x1c   :  { %p5340_p11 = scmp.ne.s32.totalorder %s65_s28, %s5339_s17  ;;  %p5345_p13 = scmp.lt.s32.totalorder %s5339_s17, %s5339_s17 }
  0x1e   :  { %p5346_p0 = por %p5345_p13, %p5344_p12 }
  0x20   :  { %p5347_p1 = pnand %p5346_p0, %p5340_p11 }
  0x22   :  { %5350 = shalt.err (!%p5347_p1)
}
  0x23   :  { %s5473_s3 = smov 128   ;;  %s5474_s14 = smov 8  }
  0x24   :  { %70 = dma.hbm_to_vmem [thread:$0]  %s7285_s5, 2048, %s65_s28, [#allocation8], %s5473_s3, %s5473_s3, %s5474_s14  }
  0x25   :  { %s5475_s20 = smov [#allocation10]   ;;  %s5476_s22 = smov [#allocation2]  }
  0x26   :  { %s88_s21 = sshll.u32 %s5475_s20, 4  ;;  %s24_s25 = sshll.u32 %s5476_s22, 4  ;;  %s89_s21 = int_to_ptr.vmem [resolvable:$true] %s88_s21  ;;  %s5572_s25 = int_to_ptr.vmem [resolvable:$true] %s24_s25 }
  0x27   :  { %s5351_s29 = scalar_lea.hbm %s7287_s7, 8192 }
  0x28   :  { %p5352_p2 = scmp.ne.s32.totalorder %s7287_s7, %s5351_s29  ;;  %p5355_p3 = scmp.lt.u32.totalorder %s5351_s29, %s7287_s7 }
  0x2a   :  { %p5357_p4 = pnand %p5355_p3, %p5352_p2 }
  0x2c   :  { %5360 = shalt.err (!%p5357_p4)
}
  0x2d   :  { %s5361_s5 = scalar_lea.vmem %s89_s21, 8192  ;;  %p5366_p6 = scmp.lt.s32.totalorder %s89_s21, %s89_s21 }
  0x2e   :  { %p5362_p5 = scmp.ne.s32.totalorder %s89_s21, %s5361_s5  ;;  %p5367_p7 = scmp.lt.s32.totalorder %s5361_s5, %s5361_s5 }
  0x30   :  { %p5368_p8 = por %p5367_p7, %p5366_p6 }
  0x32   :  { %p5369_p9 = pnand %p5368_p8, %p5362_p5 }
  0x34   :  { %5372 = shalt.err (!%p5369_p9)
}
  0x35   :  { %94 = dma.hbm_to_vmem [thread:$0]  %s7287_s7, 8192, %s89_s21, [#allocation11], %s5473_s3, %s5473_s3, %s5474_s14  }
  0x36   :  { %s5373_s18 = scalar_lea.hbm %s7280_s0, 4096 }
  0x37   :  { %p5374_p10 = scmp.ne.s32.totalorder %s7280_s0, %s5373_s18  ;;  %p5377_p11 = scmp.lt.u32.totalorder %s5373_s18, %s7280_s0 }
  0x39   :  { %p5379_p12 = pnand %p5377_p11, %p5374_p10 }
  0x3b   :  { %5382 = shalt.err (!%p5379_p12)
}
  0x3c   :  { %s5383_s27 = scalar_lea.vmem %s5572_s25, 4096  ;;  %p5388_p0 = scmp.lt.s32.totalorder %s5572_s25, %s5572_s25 }
  0x3d   :  { %p5384_p13 = scmp.ne.s32.totalorder %s5572_s25, %s5383_s27  ;;  %p5389_p1 = scmp.lt.s32.totalorder %s5383_s27, %s5383_s27 }
  0x3f   :  { %p5390_p2 = por %p5389_p1, %p5388_p0 }
  0x41   :  { %p5391_p3 = pnand %p5390_p2, %p5384_p13 }
  0x43   :  { %5394 = shalt.err (!%p5391_p3)
}
  0x44   :  { %s5477_s7 = smov 256   ;;  %s5478_s21 = smov 16  }
  0x45   :  { %30 = dma.hbm_to_vmem [thread:$0]  %s7280_s0, 4096, %s5572_s25, [#allocation3], %s5477_s7, %s5477_s7, %s5478_s21  }
  0x46   :  { %s5479_s11 = smov [#allocation6]   ;;  %s5480_s13 = smov [#allocation9]  }
  0x47   :  { %s52_s12 = sshll.u32 %s5479_s11, 4  ;;  %s76_s5 = sshll.u32 %s5480_s13, 4  ;;  %s53_s12 = int_to_ptr.vmem [resolvable:$true] %s52_s12  ;;  %s5606_s5 = int_to_ptr.vmem [resolvable:$true] %s76_s5 }
  0x48   :  { %s5395_s16 = scalar_lea.hbm %s7284_s4, 256 }
  0x49   :  { %p5396_p4 = scmp.ne.s32.totalorder %s7284_s4, %s5395_s16  ;;  %p5399_p5 = scmp.lt.u32.totalorder %s5395_s16, %s7284_s4 }
  0x4b   :  { %p5401_p6 = pnand %p5399_p5, %p5396_p4 }
  0x4d   :  { %5404 = shalt.err (!%p5401_p6)
}
  0x4e   :  { %s5405_s0 = scalar_lea.vmem %s53_s12, 256  ;;  %p5410_p8 = scmp.lt.s32.totalorder %s53_s12, %s53_s12 }
  0x4f   :  { %p5406_p7 = scmp.ne.s32.totalorder %s53_s12, %s5405_s0  ;;  %p5411_p9 = scmp.lt.s32.totalorder %s5405_s0, %s5405_s0 }
  0x51   :  { %p5412_p10 = por %p5411_p9, %p5410_p8 }
  0x53   :  { %p5413_p11 = pnand %p5412_p10, %p5406_p7 }
  0x55   :  { %5416 = shalt.err (!%p5413_p11)
}
  0x56   :  { %58 = dma.hbm_to_vmem [thread:$0]  %s7284_s4, 256, %s53_s12, [#allocation5], %s5470_s23, %s5470_s23, %s5471_s24  }
  0x57   :  { %s5417_s7 = scalar_lea.hbm %s7286_s6, 1024 }
  0x58   :  { %p5418_p12 = scmp.ne.s32.totalorder %s7286_s6, %s5417_s7  ;;  %p5421_p13 = scmp.lt.u32.totalorder %s5417_s7, %s7286_s6 }
  0x5a   :  { %p5423_p0 = pnand %p5421_p13, %p5418_p12 }
  0x5c   :  { %5426 = shalt.err (!%p5423_p0)
}
  0x5d   :  { %s5427_s13 = scalar_lea.vmem %s5606_s5, 1024  ;;  %p5432_p2 = scmp.lt.s32.totalorder %s5606_s5, %s5606_s5 }
  0x5e   :  { %p5428_p1 = scmp.ne.s32.totalorder %s5606_s5, %s5427_s13  ;;  %p5433_p3 = scmp.lt.s32.totalorder %s5427_s13, %s5427_s13 }
  0x60   :  { %p5434_p4 = por %p5433_p3, %p5432_p2 }
  0x62   :  { %p5435_p5 = pnand %p5434_p4, %p5428_p1 }
  0x64   :  { %5438 = shalt.err (!%p5435_p5)
}
  0x65   :  { %82 = dma.hbm_to_vmem [thread:$0]  %s7286_s6, 1024, %s5606_s5, [#allocation8], %s5473_s3, %s5473_s3, %s5474_s14  }
  0x66   :  { %s5481_s28 = smov [#allocation12]   ;;  %s5439_s18 = scalar_lea.hbm %s7288_s8, 2048 }
  0x67   :  { %s100_s15 = sshll.u32 %s5481_s28, 4  ;;  %p5440_p6 = scmp.ne.s32.totalorder %s7288_s8, %s5439_s18  ;;  %s101_s15 = int_to_ptr.vmem [resolvable:$true] %s100_s15 }
  0x68   :  { %p5443_p7 = scmp.lt.u32.totalorder %s5439_s18, %s7288_s8 }
  0x6a   :  { %p5445_p8 = pnand %p5443_p7, %p5440_p6 }
  0x6c   :  { %5448 = shalt.err (!%p5445_p8)
}
  0x6d   :  { %s5449_s22 = scalar_lea.vmem %s101_s15, 2048  ;;  %p5454_p10 = scmp.lt.s32.totalorder %s101_s15, %s101_s15 }
  0x6e   :  { %p5450_p9 = scmp.ne.s32.totalorder %s101_s15, %s5449_s22  ;;  %p5455_p11 = scmp.lt.s32.totalorder %s5449_s22, %s5449_s22 }
  0x70   :  { %p5456_p12 = por %p5455_p11, %p5454_p10 }
  0x72   :  { %p5457_p13 = pnand %p5456_p12, %p5450_p9 }
  0x74   :  { %5460 = shalt.err (!%p5457_p13)
}
  0x75   :  { %106 = dma.hbm_to_vmem [thread:$0]  %s7288_s8, 2048, %s101_s15, [#allocation11], %s5470_s23, %s5470_s23, %s5471_s24  }
  0x76   :  { %5461 = dma.done.wait [#allocation3], 4096  }
  0x77   :  { %5462 = vsyncadd [#allocation3], 4294963200 }
  0x78   :  { %5463 = dma.done.wait [#allocation5], 3328  }
  0x79   :  { %5464 = vsyncadd [#allocation5], 4294963968 }
  0x7a   :  { %5465 = dma.done.wait [#allocation8], 3072  }
  0x7b   :  { %5466 = vsyncadd [#allocation8], 4294964224 }
  0x7c   :  { %5467 = dma.done.wait [#allocation11], 10240  }
  0x7d   :  { %5468 = vsyncadd [#allocation11], 4294957056  ;;  %v4605_v0 = vld [vmem:[%s7282_s2 + $0x40] sm:$0xff]   ;;  %v4607_v2 = vld [vmem:[%s7282_s2 + $0x48] sm:$0xff]   ;;  %s5482_s30 = smov 32   ;;  %s5483_s12 = smov 96  }
  0x7e   :  { %v4606_v1 = vld [vmem:[%s7282_s2] sm:$0xff]   ;;  %4269 = vmatprep.subr.bf16.mxu0 %v4605_v0  ;;  %4571 = vmatprep.subr.bf16.mxu1 %v4605_v0  ;;  %v4608_v3 = vld [vmem:[%s7282_s2 + $0x8] sm:$0xff]   ;;  %v4609_v4 = vld [vmem:[%s7282_s2 + $0x50] sm:$0xff]   ;;  %s5485_s26 = smov 1  }
  0x7f   :  { %4270 = vmatpush3.bf16.msra.mxu0 %v4606_v1  ;;  %4579 = vmatpush3.bf16.msra.mxu1 %v4606_v1  ;;  %v4610_v5 = vld [vmem:[%s7282_s2 + $0x10] sm:$0xff]   ;;  %v4611_v6 = vld [vmem:[%s7282_s2 + $0x58] sm:$0xff]   ;;  %v4613_v8 = vld [vmem:[%s7282_s2 + $0x60] sm:$0xff]  }
  0x80   :  { %4271 = vmatprep.subr.bf16.mxu0 %v4607_v2  ;;  %4572 = vmatprep.subr.bf16.mxu1 %v4607_v2  ;;  %v4612_v7 = vld [vmem:[%s7282_s2 + $0x18] sm:$0xff]   ;;  %v4614_v9 = vld [vmem:[%s7282_s2 + $0x20] sm:$0xff]   ;;  %v4615_v10 = vld [vmem:[%s7282_s2 + $0x68] sm:$0xff]  }
  0x81   :  { %v132_v11 = vld [vmem:[#allocation2 + $0x8] sm:$0xff]  ;;  %v134_v12 = vld [vmem:[#allocation2 + $0x18] sm:$0xff]  ;;  %v4617_v17 = vld [vmem:[%s7282_s2 + $0x70] sm:$0xff]  }
  0x82   :  { %v212_v13 = vpack.c.bf16 %v134_v12, %v132_v11  ;;  %v148_v14 = vld [vmem:[#allocation2 + $0x88] sm:$0xff]  ;;  %v150_v16 = vld [vmem:[#allocation2 + $0x98] sm:$0xff]  ;;  %v4618_v19 = vld [vmem:[%s7282_s2 + $0x30] sm:$0xff]  }
  0x83   :  { %4272 = vmatpush3.bf16.msra.mxu0 %v4608_v3  ;;  %4580 = vmatpush3.bf16.msra.mxu1 %v4608_v3  ;;  %v4616_v15 = vld [vmem:[%s7282_s2 + $0x28] sm:$0xff]   ;;  %v220_v18 = vpack.c.bf16 %v150_v16, %v148_v14  ;;  %v4619_v20 = vld [vmem:[%s7282_s2 + $0x78] sm:$0xff]   ;;  %v131_v22 = vld [vmem:[#allocation2] sm:$0xff] }
  0x84   :  { %4273 = vmatprep.subr.bf16.mxu0 %v4609_v4  ;;  %4573 = vmatprep.subr.bf16.mxu1 %v4609_v4  ;;  %v4620_v21 = vld [vmem:[%s7282_s2 + $0x38] sm:$0xff]   ;;  %v133_v23 = vld [vmem:[#allocation2 + $0x10] sm:$0xff]  ;;  %v147_v24 = vld [vmem:[#allocation2 + $0x80] sm:$0xff] }
  0x85   :  { %356 = vmatprep.mubr.bf16.mxu0 %v212_v13  ;;  %388 = vmatprep.mubr.bf16.mxu1 %v220_v18  ;;  %v149_v25 = vld [vmem:[#allocation2 + $0x90] sm:$0xff]  ;;  %v136_v26 = vld [vmem:[#allocation2 + $0x28] sm:$0xff]  ;;  %v138_v27 = vld [vmem:[#allocation2 + $0x38] sm:$0xff]  ;;  %v211_v30 = vpack.c.bf16 %v133_v23, %v131_v22 }
  0x86   :  { %v152_v28 = vld [vmem:[#allocation2 + $0xa8] sm:$0xff]  ;;  %v154_v29 = vld [vmem:[#allocation2 + $0xb8] sm:$0xff]  ;;  %v219_v31 = vpack.c.bf16 %v149_v25, %v147_v24  ;;  %v214_v32 = vpack.c.bf16 %v138_v27, %v136_v26  ;;  %v135_v34 = vld [vmem:[#allocation2 + $0x20] sm:$0xff] }
  0x87   :  { %4274 = vmatpush3.bf16.msra.mxu0 %v4610_v5  ;;  %4581 = vmatpush3.bf16.msra.mxu1 %v4610_v5  ;;  %v222_v33 = vpack.c.bf16 %v154_v29, %v152_v28  ;;  %v137_v35 = vld [vmem:[#allocation2 + $0x30] sm:$0xff]  ;;  %v151_v36 = vld [vmem:[#allocation2 + $0xa0] sm:$0xff]  ;;  %v140_v38 = vld [vmem:[#allocation2 + $0x48] sm:$0xff] }
  0x88   :  { %4275 = vmatprep.subr.bf16.mxu0 %v4611_v6  ;;  %4574 = vmatprep.subr.bf16.mxu1 %v4611_v6  ;;  %v153_v37 = vld [vmem:[#allocation2 + $0xb0] sm:$0xff]  ;;  %v142_v39 = vld [vmem:[#allocation2 + $0x58] sm:$0xff]  ;;  %v156_v40 = vld [vmem:[#allocation2 + $0xc8] sm:$0xff]  ;;  %v213_v42 = vpack.c.bf16 %v137_v35, %v135_v34 }
  0x89   :  { %v158_v41 = vld [vmem:[#allocation2 + $0xd8] sm:$0xff]  ;;  %v221_v43 = vpack.c.bf16 %v153_v37, %v151_v36  ;;  %v216_v44 = vpack.c.bf16 %v142_v39, %v140_v38  ;;  %v139_v46 = vld [vmem:[#allocation2 + $0x40] sm:$0xff]  ;;  %v141_v47 = vld [vmem:[#allocation2 + $0x50] sm:$0xff] }
  0x8a   :  { %v224_v45 = vpack.c.bf16 %v158_v41, %v156_v40  ;;  %v155_v48 = vld [vmem:[#allocation2 + $0xc0] sm:$0xff]  ;;  %v157_v49 = vld [vmem:[#allocation2 + $0xd0] sm:$0xff]  ;;  %v144_v50 = vld [vmem:[#allocation2 + $0x68] sm:$0xff]  ;;  %v215_v54 = vpack.c.bf16 %v141_v47, %v139_v46 }
  0x8b   :  { %4276 = vmatpush3.bf16.msra.mxu0 %v4612_v7  ;;  %4582 = vmatpush3.bf16.msra.mxu1 %v4612_v7  ;;  %v146_v51 = vld [vmem:[#allocation2 + $0x78] sm:$0xff]  ;;  %v160_v52 = vld [vmem:[#allocation2 + $0xe8] sm:$0xff]  ;;  %v223_v55 = vpack.c.bf16 %v157_v49, %v155_v48  ;;  %v143_v58 = vld [vmem:[#allocation2 + $0x60] sm:$0xff] }
  0x8c   :  { %4277 = vmatprep.subr.bf16.mxu0 %v4613_v8  ;;  %4575 = vmatprep.subr.bf16.mxu1 %v4613_v8  ;;  %v162_v53 = vld [vmem:[#allocation2 + $0xf8] sm:$0xff]  ;;  %v218_v56 = vpack.c.bf16 %v146_v51, %v144_v50  ;;  %v145_v59 = vld [vmem:[#allocation2 + $0x70] sm:$0xff]  ;;  %v159_v60 = vld [vmem:[#allocation2 + $0xe0] sm:$0xff] }
  0x8d   :  { %v226_v57 = vpack.c.bf16 %v162_v53, %v160_v52  ;;  %v161_v61 = vld [vmem:[#allocation2 + $0xf0] sm:$0xff]  ;;  %v217_v62 = vpack.c.bf16 %v145_v59, %v143_v58  ;;  %v4621_v0 = vld [vmem:[#allocation4] sm:$0xff]   ;;  %v4622_v1 = vld [vmem:[#allocation4 + $0x8] sm:$0xff]  }
  0x8e   :  { %v225_v63 = vpack.c.bf16 %v161_v61, %v159_v60  ;;  %v4623_v2 = vld [vmem:[#allocation4 + $0x10] sm:$0xff]   ;;  %v4624_v3 = vld [vmem:[#allocation4 + $0x18] sm:$0xff]   ;;  %v4625_v4 = vld [vmem:[#allocation4 + $0x20] sm:$0xff]  }
  0x8f   :  { %4278 = vmatpush3.bf16.msra.mxu0 %v4614_v9  ;;  %4583 = vmatpush3.bf16.msra.mxu1 %v4614_v9  ;;  %v4626_v5 = vld [vmem:[#allocation4 + $0x28] sm:$0xff]   ;;  %v4627_v6 = vld [vmem:[#allocation4 + $0x30] sm:$0xff]   ;;  %v4628_v7 = vld [vmem:[#allocation4 + $0x38] sm:$0xff]  }
  0x90   :  { %4279 = vmatprep.subr.bf16.mxu0 %v4615_v10  ;;  %4576 = vmatprep.subr.bf16.mxu1 %v4615_v10  ;;  %v5706_v8 = vld [vmem:[#allocation4 + $0x80] sm:$0xff]  }
  0x91   :  { %v5712_v11 = vld [vmem:[%s7289_s9] ss:$0 sm:$0xff] }
  0x93   :  { %4280 = vmatpush3.bf16.msra.mxu0 %v4616_v15  ;;  %4584 = vmatpush3.bf16.msra.mxu1 %v4616_v15 }
  0x94   :  { %4281 = vmatprep.subr.bf16.mxu0 %v4617_v17  ;;  %4577 = vmatprep.subr.bf16.mxu1 %v4617_v17 }
  0x97   :  { %4282 = vmatpush3.bf16.msra.mxu0 %v4618_v19  ;;  %4585 = vmatpush3.bf16.msra.mxu1 %v4618_v19 }
  0x98   :  { %4283 = vmatprep.subr.bf16.mxu0 %v4619_v20  ;;  %4578 = vmatprep.subr.bf16.mxu1 %v4619_v20 }
  0x9b   :  { %4284 = vmatpush3.bf16.msra.mxu0 %v4620_v21  ;;  %4586 = vmatpush3.bf16.msra.mxu1 %v4620_v21 }
  0x9c   :  { %4455 = vmatprep.subr.bf16.mxu1 %v4621_v0 }
  0x9e   :  { %357 = vmatmul.mubr.bf16.vlgmr.msra.gmra.mrb[0].mxu0 %v211_v30  ;;  %389 = vmatmul.mubr.bf16.vlgmr.msra.gmra.mrb[0].mxu1 %v219_v31 }
  0x9f   :  { %364 = vmatprep.mubr.bf16.mxu0 %v214_v32  ;;  %396 = vmatprep.mubr.bf16.mxu1 %v222_v33 }
  0xa0   :  { %4456 = vmatpush3.bf16.msra.mxu1 %v4621_v0 }
  0xa1   :  { %4457 = vmatprep.subr.bf16.mxu1 %v4622_v1 }
  0xa4   :  { %4458 = vmatpush3.bf16.msra.mxu1 %v4622_v1 }
  0xa5   :  { %4459 = vmatprep.subr.bf16.mxu1 %v4623_v2 }
  0xa6   :  { %365 = vmatmul.mubr.bf16.gmra.mrb[4].mxu0 %v213_v42  ;;  %397 = vmatmul.mubr.bf16.gmra.mrb[4].mxu1 %v221_v43 }
  0xa7   :  { %372 = vmatprep.mubr.bf16.mxu0 %v216_v44  ;;  %404 = vmatprep.mubr.bf16.mxu1 %v224_v45 }
  0xa8   :  { %4460 = vmatpush3.bf16.msra.mxu1 %v4623_v2 }
  0xa9   :  { %4461 = vmatprep.subr.bf16.mxu1 %v4624_v3 }
  0xac   :  { %4462 = vmatpush3.bf16.msra.mxu1 %v4624_v3 }
  0xad   :  { %4463 = vmatprep.subr.bf16.mxu1 %v4625_v4 }
  0xae   :  { %373 = vmatmul.mubr.bf16.gmra.mrb[8].mxu0 %v215_v54  ;;  %405 = vmatmul.mubr.bf16.gmra.mrb[8].mxu1 %v223_v55 }
  0xaf   :  { %380 = vmatprep.mubr.bf16.mxu0 %v218_v56  ;;  %412 = vmatprep.mubr.bf16.mxu1 %v226_v57 }
  0xb0   :  { %4464 = vmatpush3.bf16.msra.mxu1 %v4625_v4 }
  0xb1   :  { %4465 = vmatprep.subr.bf16.mxu1 %v4626_v5 }
  0xb4   :  { %4466 = vmatpush3.bf16.msra.mxu1 %v4626_v5 }
  0xb5   :  { %4467 = vmatprep.subr.bf16.mxu1 %v4627_v6 }
  0xb6   :  { %381 = vmatmul.mubr.bf16.gmra.mrb[12].mxu0 %v217_v62  ;;  %413 = vmatmul.mubr.bf16.gmra.mrb[12].mxu1 %v225_v63 }
  0xb8   :  { %4468 = vmatpush3.bf16.msra.mxu1 %v4627_v6 }
  0xb9   :  { %4469 = vmatprep.subr.bf16.mxu1 %v4628_v7 }
  0xbc   :  { %4470 = vmatpush3.bf16.msra.mxu1 %v4628_v7 }
  0xbd   :  { %4487 = vmatprep.subr.bf16.mxu1 %v5706_v8 }
 0x171   :  { %v4285_v9 = vpop.f32.mrb[0].mxu0  ;;  %v4309_v10 = vpop.f32.mrb[0].mxu1 }
 0x172   :  { %v4286_v12 = vpop.f32.mrb[1].mxu0  ;;  %v4310_v13 = vpop.f32.mrb[1].mxu1 }
 0x173   :  { %v4287_v14 = vadd.f32 %v4286_v12, %v4285_v9  ;;  %v4288_v15 = vpop.f32.mrb[2].mxu0  ;;  %v4311_v16 = vadd.f32 %v4310_v13, %v4309_v10  ;;  %v4312_v17 = vpop.f32.mrb[2].mxu1 }
 0x174   :  { %v4289_v18 = vpop.f32.mrb[3].mxu0  ;;  %v4313_v19 = vpop.f32.mrb[3].mxu1 }
 0x175   :  { %v5715_v20 = vadd.f32 %v4287_v14, %v5712_v11  ;;  %v4290_v21 = vadd.f32 %v4289_v18, %v4288_v15  ;;  %v5718_v22 = vadd.f32 %v4311_v16, %v5712_v11  ;;  %v4314_v23 = vadd.f32 %v4313_v19, %v4312_v17 }
 0x177   :  { %v437_v24 = vmin.f32 %v5715_v20, 0.0  ;;  %v5722_v25 = vadd.f32 %v4290_v21, %v5712_v11  ;;  %v445_v26 = vmin.f32 %v5718_v22, 0.0  ;;  %v5726_v27 = vadd.f32 %v4314_v23, %v5712_v11 }
 0x178   :  { %vm421_vm0 = vcmp.gt.f32.partialorder %v5715_v20, 0.0  ;;  %vm429_vm2 = vcmp.gt.f32.partialorder %v5718_v22, 0.0 }
 0x179   :  { %v453_v28 = vmul.f32 1.442695, %v437_v24  ;;  %v438_v29 = vmin.f32 %v5722_v25, 0.0  ;;  %v4291_v30 = vpop.f32.mrb[4].mxu0  ;;  %v4315_v31 = vpop.f32.mrb[4].mxu1  ;;  %v446_v33 = vmin.f32 %v5726_v27, 0.0 }
 0x17a   :  { %v4292_v32 = vpop.f32.mrb[5].mxu0  ;;  %v4316_v34 = vpop.f32.mrb[5].mxu1  ;;  %v469_v41 = vmul.f32 1.442695, %v445_v26  ;;  %vm422_vm1 = vcmp.gt.f32.partialorder %v5722_v25, 0.0  ;;  %vm430_vm3 = vcmp.gt.f32.partialorder %v5726_v27, 0.0 }
 0x17b   :  { %4795 = vpow2.f32 %v453_v28  ;;  %v455_v35 = vmul.f32 1.442695, %v438_v29  ;;  %v4293_v36 = vadd.f32 %v4292_v32, %v4291_v30  ;;  %v4294_v37 = vpop.f32.mrb[6].mxu0  ;;  %v4317_v38 = vadd.f32 %v4316_v34, %v4315_v31  ;;  %v4318_v39 = vpop.f32.mrb[6].mxu1 }
 0x17c   :  { %v4295_v40 = vpop.f32.mrb[7].mxu0  ;;  %v4319_v42 = vpop.f32.mrb[7].mxu1  ;;  %v471_v46 = vmul.f32 1.442695, %v446_v33 }
 0x17d   :  { %4797 = vpow2.f32 %v455_v35  ;;  %v5731_v43 = vadd.f32 %v4293_v36, %v5712_v11  ;;  %v4296_v44 = vadd.f32 %v4295_v40, %v4294_v37  ;;  %v5734_v45 = vadd.f32 %v4317_v38, %v5712_v11 }
 0x17e   :  { %v4320_v47 = vadd.f32 %v4319_v42, %v4318_v39  ;;  %4799 = vpow2.f32 %v469_v41 }
 0x17f   :  { %v439_v48 = vmin.f32 %v5731_v43, 0.0  ;;  %v5738_v49 = vadd.f32 %v4296_v44, %v5712_v11  ;;  %v447_v50 = vmin.f32 %v5734_v45, 0.0  ;;  %4801 = vpow2.f32 %v471_v46 }
 0x180   :  { %v5742_v51 = vadd.f32 %v4320_v47, %v5712_v11  ;;  %vm423_vm4 = vcmp.gt.f32.partialorder %v5731_v43, 0.0  ;;  %vm431_vm6 = vcmp.gt.f32.partialorder %v5734_v45, 0.0 }
 0x181   :  { %v457_v52 = vmul.f32 1.442695, %v439_v48  ;;  %v440_v53 = vmin.f32 %v5738_v49, 0.0  ;;  %v4297_v54 = vpop.f32.mrb[8].mxu0  ;;  %v4321_v55 = vpop.f32.mrb[8].mxu1  ;;  %vm424_vm5 = vcmp.gt.f32.partialorder %v5738_v49, 0.0 }
 0x182   :  { %v4298_v56 = vpop.f32.mrb[9].mxu0  ;;  %v473_v57 = vmul.f32 1.442695, %v447_v50  ;;  %v448_v58 = vmin.f32 %v5742_v51, 0.0  ;;  %v4322_v59 = vpop.f32.mrb[9].mxu1  ;;  %vm432_vm7 = vcmp.gt.f32.partialorder %v5742_v51, 0.0 }
 0x183   :  { %4803 = vpow2.f32 %v457_v52  ;;  %v459_v60 = vmul.f32 1.442695, %v440_v53  ;;  %v4299_v61 = vadd.f32 %v4298_v56, %v4297_v54  ;;  %v4300_v62 = vpop.f32.mrb[10].mxu0  ;;  %v4323_v63 = vadd.f32 %v4322_v59, %v4321_v55  ;;  %v4324_v0 = vpop.f32.mrb[10].mxu1 }
 0x184   :  { %v4301_v1 = vpop.f32.mrb[11].mxu0  ;;  %v475_v2 = vmul.f32 1.442695, %v448_v58  ;;  %v4325_v3 = vpop.f32.mrb[11].mxu1 }
 0x185   :  { %v4796_v4 = vpop.eup %4795  ;;  %4805 = vpow2.f32 %v459_v60  ;;  %v5747_v5 = vadd.f32 %v4299_v61, %v5712_v11  ;;  %v4302_v6 = vadd.f32 %v4301_v1, %v4300_v62  ;;  %v5750_v7 = vadd.f32 %v4323_v63, %v5712_v11 }
 0x186   :  { %v4023_v9 = vadd.f32 -1.0, %v4796_v4  ;;  %v4326_v10 = vadd.f32 %v4325_v3, %v4324_v0  ;;  %4807 = vpow2.f32 %v473_v57 }
 0x187   :  { %v4798_v12 = vpop.eup %4797  ;;  %v441_v13 = vmin.f32 %v5747_v5, 0.0  ;;  %v5757_v14 = vadd.f32 %v4302_v6, %v5712_v11  ;;  %4809 = vpow2.f32 %v475_v2  ;;  %v449_v16 = vmin.f32 %v5750_v7, 0.0  ;;  %v4630_v6 = vld [vmem:[#allocation4 + $0x88] sm:$0xff]  }
 0x188   :  { %v4024_v15 = vadd.f32 -1.0, %v4798_v12  ;;  %v5761_v17 = vadd.f32 %v4326_v10, %v5712_v11  ;;  %v501_v26 = vsel %vm421_vm0, %v5715_v20, %v4023_v9  ;;  %v4800_v32 = vpop.eup %4799  ;;  %vm433_vm8 = vcmp.gt.f32.partialorder %v5750_v7, 0.0 }
 0x189   :  { %v461_v18 = vmul.f32 1.442695, %v441_v13  ;;  %v442_v19 = vmin.f32 %v5757_v14, 0.0  ;;  %v4303_v21 = vpop.f32.mrb[12].mxu0  ;;  %v4327_v23 = vpop.f32.mrb[12].mxu1  ;;  %v4031_v50 = vadd.f32 -1.0, %v4800_v32 }
 0x18a   :  { %v4304_v24 = vpop.f32.mrb[13].mxu0  ;;  %v502_v28 = vsel %vm422_vm1, %v5722_v25, %v4024_v15  ;;  %v477_v29 = vmul.f32 1.442695, %v449_v16  ;;  %v450_v30 = vmin.f32 %v5761_v17, 0.0  ;;  %v4328_v31 = vpop.f32.mrb[13].mxu1  ;;  %vm434_vm9 = vcmp.gt.f32.partialorder %v5761_v17, 0.0 }
 0x18b   :  { %4811 = vpow2.f32 %v461_v18  ;;  %v463_v33 = vmul.f32 1.442695, %v442_v19  ;;  %v4305_v34 = vadd.f32 %v4304_v24, %v4303_v21  ;;  %v4306_v35 = vpop.f32.mrb[14].mxu0  ;;  %v533_v36 = vpack.c.bf16 %v502_v28, %v501_v26  ;;  %v4330_v37 = vpop.f32.mrb[14].mxu1  ;;  %v4631_v21 = vld [vmem:[#allocation4 + $0x90] sm:$0xff]  }
 0x18c   :  { %v4802_v38 = vpop.eup %4801  ;;  %v4307_v39 = vpop.f32.mrb[15].mxu0  ;;  %4813 = vpow2.f32 %v477_v29  ;;  %v479_v20 = vmul.f32 1.442695, %v450_v30  ;;  %v4329_v40 = vadd.f32 %v4328_v31, %v4327_v23  ;;  %v5799_v2 = vsel %vm429_vm2, %v5718_v22, %v4031_v50  ;;  %v4632_v31 = vld [vmem:[#allocation4 + $0x98] sm:$0xff]  }
 0x18d   :  { %v4331_v41 = vpop.f32.mrb[15].mxu1  ;;  %v4804_v25 = vpop.eup %4803  ;;  %4815 = vpow2.f32 %v463_v33  ;;  %v5774_v42 = vadd.f32 %v4305_v34, %v5712_v11  ;;  %v4308_v44 = vadd.f32 %v4307_v39, %v4306_v35  ;;  %4471 = vmatprep.mubr.bf16.mxu1 %v533_v36  ;;  %v4032_v56 = vadd.f32 -1.0, %v4802_v38  ;;  %v166_v50 = vld [vmem:[%s7281_s1 + $0x18] sm:$0xff] }
 0x18e   :  { %v4332_v46 = vadd.f32 %v4331_v41, %v4330_v37  ;;  %v4025_v47 = vadd.f32 -1.0, %v4804_v25  ;;  %4817 = vpow2.f32 %v479_v20  ;;  %v5777_v48 = vadd.f32 %v4329_v40, %v5712_v11  ;;  %v4633_v25 = vld [vmem:[#allocation4 + $0xa0] sm:$0xff]  }
 0x18f   :  { %v4806_v52 = vpop.eup %4805  ;;  %v443_v53 = vmin.f32 %v5774_v42, 0.0  ;;  %v5781_v54 = vadd.f32 %v4308_v44, %v5712_v11  ;;  %vm425_vm10 = vcmp.gt.f32.partialorder %v5747_v5, 0.0  ;;  %vm426_vm11 = vcmp.gt.f32.partialorder %v5757_v14, 0.0  ;;  %v4634_v44 = vld [vmem:[#allocation4 + $0xa8] sm:$0xff]  }
 0x190   :  { %v5784_v55 = vadd.f32 %v4332_v46, %v5712_v11  ;;  %v4026_v57 = vadd.f32 -1.0, %v4806_v52  ;;  %v451_v58 = vmin.f32 %v5777_v48, 0.0  ;;  %v4808_v59 = vpop.eup %4807  ;;  %v503_v60 = vsel %vm423_vm4, %v5731_v43, %v4025_v47  ;;  %v4635_v46 = vld [vmem:[#allocation4 + $0xb0] sm:$0xff]   ;;  %v164_v52 = vld [vmem:[%s7281_s1 + $0x8] sm:$0xff] }
 0x191   :  { %v465_v61 = vmul.f32 1.442695, %v443_v53  ;;  %v444_v62 = vmin.f32 %v5781_v54, 0.0  ;;  %v4810_v11 = vpop.eup %4809  ;;  %v510_v43 = vsel %vm430_vm3, %v5726_v27, %v4032_v56  ;;  %v4033_v10 = vadd.f32 -1.0, %v4808_v59  ;;  %v165_v47 = vld [vmem:[%s7281_s1 + $0x10] sm:$0xff]  ;;  %v167_v53 = vld [vmem:[%s7281_s1 + $0x20] sm:$0xff] }
 0x192   :  { %v504_v63 = vsel %vm424_vm5, %v5738_v49, %v4026_v57  ;;  %v481_v0 = vmul.f32 1.442695, %v451_v58  ;;  %v452_v1 = vmin.f32 %v5784_v55, 0.0  ;;  %v537_v49 = vpack.c.bf16 %v510_v43, %v5799_v2  ;;  %1054 = vrot.lane.b32.xlu1 %v165_v47, %s5482_s30  ;;  %v170_v56 = vld [vmem:[%s7281_s1 + $0x38] sm:$0xff]  ;;  %v171_v57 = vld [vmem:[%s7281_s1 + $0x40] sm:$0xff]  ;;  %v172_v58 = vld [vmem:[%s7281_s1 + $0x48] sm:$0xff] }
 0x193   :  { %v534_v3 = vpack.c.bf16 %v504_v63, %v503_v60  ;;  %4819 = vpow2.f32 %v465_v61  ;;  %v467_v4 = vmul.f32 1.442695, %v444_v62  ;;  %v4034_v13 = vadd.f32 -1.0, %v4810_v11  ;;  %v173_v59 = vld [vmem:[%s7281_s1 + $0x50] sm:$0xff]  ;;  %v174_v60 = vld [vmem:[%s7281_s1 + $0x58] sm:$0xff]  ;;  %v175_v61 = vld [vmem:[%s7281_s1 + $0x60] sm:$0xff] }
 0x194   :  { %4821 = vpow2.f32 %v481_v0  ;;  %v483_v9 = vmul.f32 1.442695, %v452_v1  ;;  %v511_v16 = vsel %vm431_vm6, %v5734_v45, %v4033_v10  ;;  %vm435_vm12 = vcmp.gt.f32.partialorder %v5777_v48, 0.0  ;;  %v176_v62 = vld [vmem:[%s7281_s1 + $0x68] sm:$0xff]  ;;  %v177_v11 = vld [vmem:[%s7281_s1 + $0x70] sm:$0xff]  ;;  %v178_v63 = vld [vmem:[%s7281_s1 + $0x78] sm:$0xff] }
 0x195   :  { %v4812_v12 = vpop.eup %4811  ;;  %4823 = vpow2.f32 %v467_v4  ;;  %4472 = vmatmul.mubr.bf16.vlgmr.msra.gmra.mrb[16].mxu1 %v534_v3  ;;  %v512_v18 = vsel %vm432_vm7, %v5742_v51, %v4034_v13  ;;  %vm436_vm13 = vcmp.gt.f32.partialorder %v5784_v55, 0.0  ;;  %vm427_vm14 = vcmp.gt.f32.partialorder %v5774_v42, 0.0  ;;  %v541_v0 = vld [vmem:[%s7289_s9 + $0x1] ss:$0 sm:$0xff] }
 0x196   :  { %v4814_v15 = vpop.eup %4813  ;;  %4825 = vpow2.f32 %v483_v9  ;;  %v4027_v22 = vadd.f32 -1.0, %v4812_v12  ;;  %4488 = vmatpush3.bf16.msra.mxu1 %v5706_v8  ;;  %v538_v26 = vpack.c.bf16 %v512_v18, %v511_v16  ;;  %vm428_vm15 = vcmp.gt.f32.partialorder %v5781_v54, 0.0  ;;  %1056 = vrot.lane.b32.xlu1 %v166_v50, %s5482_s30 }
 0x197   :  { %v4816_v27 = vpop.eup %4815  ;;  %v4035_v19 = vadd.f32 -1.0, %v4814_v15  ;;  %4489 = vmatprep.subr.bf16.mxu1 %v4630_v6  ;;  %vm1219_vm0 = vcmask 261120   ;;  %vm2243_vm1 = vcmask 523264  }
 0x198   :  { %v4818_v23 = vpop.eup %4817  ;;  %v4028_v24 = vadd.f32 -1.0, %v4816_v27  ;;  %v505_v28 = vsel %vm425_vm10, %v5747_v5, %v4027_v22 }
 0x199   :  { %v4036_v45 = vadd.f32 -1.0, %v4818_v23  ;;  %v513_v8 = vsel %vm433_vm8, %v5750_v7, %v4035_v19 }
 0x19a   :  { %v506_v51 = vsel %vm426_vm11, %v5757_v14, %v4028_v24  ;;  %4490 = vmatpush3.bf16.msra.mxu1 %v4630_v6 }
 0x19b   :  { %v535_v29 = vpack.c.bf16 %v506_v51, %v505_v28  ;;  %v514_v30 = vsel %vm434_vm9, %v5761_v17, %v4036_v45  ;;  %4491 = vmatprep.subr.bf16.mxu1 %v4631_v21 }
 0x19c   :  { %v539_v32 = vpack.c.bf16 %v514_v30, %v513_v8 }
 0x19d   :  { %v4820_v33 = vpop.eup %4819  ;;  %4475 = vmatprep.mubr.bf16.mxu1 %v535_v29 }
 0x19e   :  { %v4822_v34 = vpop.eup %4821  ;;  %v4029_v35 = vadd.f32 -1.0, %v4820_v33  ;;  %4492 = vmatpush3.bf16.msra.mxu1 %v4631_v21 }
 0x19f   :  { %v4824_v36 = vpop.eup %4823  ;;  %v4037_v7 = vadd.f32 -1.0, %v4822_v34  ;;  %4493 = vmatprep.subr.bf16.mxu1 %v4632_v31 }
 0x1a0   :  { %v4826_v5 = vpop.eup %4825  ;;  %v4030_v14 = vadd.f32 -1.0, %v4824_v36  ;;  %v507_v38 = vsel %vm427_vm14, %v5774_v42, %v4029_v35  ;;  %v4636_v42 = vld [vmem:[#allocation4 + $0xb8] sm:$0xff]  }
 0x1a1   :  { %v4038_v17 = vadd.f32 -1.0, %v4826_v5  ;;  %v515_v37 = vsel %vm435_vm12, %v5777_v48, %v4037_v7  ;;  %v163_v48 = vld [vmem:[%s7281_s1] sm:$0xff] }
 0x1a2   :  { %v508_v39 = vsel %vm428_vm15, %v5781_v54, %v4030_v14  ;;  %4494 = vmatpush3.bf16.msra.mxu1 %v4632_v31  ;;  %1050 = vrot.lane.b32.xlu0 %v163_v48, %s5482_s30  ;;  %v168_v54 = vld [vmem:[%s7281_s1 + $0x28] sm:$0xff] }
 0x1a3   :  { %v536_v20 = vpack.c.bf16 %v508_v39, %v507_v38  ;;  %v516_v40 = vsel %vm436_vm13, %v5784_v55, %v4038_v17  ;;  %4495 = vmatprep.subr.bf16.mxu1 %v4633_v25  ;;  %1060 = vrot.lane.b32.xlu1 %v168_v54, %s5482_s30  ;;  %v169_v55 = vld [vmem:[%s7281_s1 + $0x30] sm:$0xff] }
 0x1a4   :  { %v540_v41 = vpack.c.bf16 %v516_v40, %v515_v37 }
 0x1a5   :  { %4476 = vmatmul.mubr.bf16.gmra.mrb[20].mxu1 %v536_v20 }
 0x1a6   :  { %4479 = vmatprep.mubr.bf16.mxu1 %v537_v49  ;;  %4496 = vmatpush3.bf16.msra.mxu1 %v4633_v25 }
 0x1a7   :  { %4497 = vmatprep.subr.bf16.mxu1 %v4634_v44  ;;  %1052 = vrot.lane.b32.xlu0 %v164_v52, %s5482_s30 }
 0x1a8   :  { %1064 = vrot.lane.b32.xlu1 %v170_v56, %s5482_s30 }
 0x1aa   :  { %4498 = vmatpush3.bf16.msra.mxu1 %v4634_v44 }
 0x1ab   :  { %4499 = vmatprep.subr.bf16.mxu1 %v4635_v46  ;;  %1058 = vrot.lane.b32.xlu0 %v167_v53, %s5482_s30 }
 0x1ac   :  { %1068 = vrot.lane.b32.xlu1 %v172_v58, %s5482_s30  ;;  %v4637_v58 = vld [vmem:[#allocation6] sm:$0xff]  }
 0x1ad   :  { %4480 = vmatmul.mubr.bf16.gmra.mrb[24].mxu1 %v538_v26  ;;  %4519 = vmatprep.subr.bf16.mxu0 %v4637_v58 }
 0x1ae   :  { %4483 = vmatprep.mubr.bf16.mxu1 %v539_v32  ;;  %4500 = vmatpush3.bf16.msra.mxu1 %v4635_v46 }
 0x1af   :  { %4501 = vmatprep.subr.bf16.mxu1 %v4636_v42  ;;  %1062 = vrot.lane.b32.xlu0 %v169_v55, %s5482_s30 }
 0x1b0   :  { %1072 = vrot.lane.b32.xlu1 %v174_v60, %s5482_s30  ;;  %4520 = vmatpush3.bf16.msra.mxu0 %v4637_v58  ;;  %v5884_v60 = vld [vmem:[%s7289_s9 + $0x2] ss:$0 sm:$0xff] }
 0x1b2   :  { %4502 = vmatpush3.bf16.msra.mxu1 %v4636_v42 }
 0x1b3   :  { %1066 = vrot.lane.b32.xlu0 %v171_v57, %s5482_s30 }
 0x1b4   :  { %1076 = vrot.lane.b32.xlu1 %v176_v62, %s5482_s30 }
 0x1b5   :  { %4484 = vmatmul.mubr.bf16.gmra.mrb[28].mxu1 %v540_v41 }
 0x1b7   :  { %1070 = vrot.lane.b32.xlu0 %v173_v59, %s5482_s30  ;;  %v4638_v59 = vld [vmem:[#allocation6 + $0x8] sm:$0xff]  }
 0x1b8   :  { %1080 = vrot.lane.b32.xlu1 %v178_v63, %s5482_s30  ;;  %4521 = vmatprep.subr.bf16.mxu0 %v4638_v59 }
 0x1b9   :  { %4522 = vmatpush3.bf16.msra.mxu0 %v4638_v59 }
 0x1bb   :  { %1074 = vrot.lane.b32.xlu0 %v175_v61, %s5482_s30 }
 0x1bf   :  { %1078 = vrot.lane.b32.xlu0 %v177_v11, %s5482_s30 }
 0x268   :  { %v4473_v1 = vpop.f32.mrb[16].mxu1 }
 0x269   :  { %v633_v2 = vadd.f32 %v4473_v1, %v541_v0  ;;  %v624_v3 = vpop.f32.mrb[17].mxu1 }
 0x26a   :  { %v625_v4 = vadd.f32 %v624_v3, %v541_v0  ;;  %v4474_v43 = vpop.f32.mrb[18].mxu1 }
 0x26b   :  { %4827 = vtanh.f32 %v633_v2  ;;  %v636_v6 = vadd.f32 %v4474_v43, %v541_v0  ;;  %v627_v9 = vpop.f32.mrb[19].mxu1 }
 0x26c   :  { %4829 = vtanh.f32 %v625_v4  ;;  %v628_v49 = vadd.f32 %v627_v9, %v541_v0 }
 0x26d   :  { %4831 = vtanh.f32 %v636_v6 }
 0x26e   :  { %4833 = vtanh.f32 %v628_v49 }
 0x275   :  { %v4828_v10 = vpop.eup %4827 }
 0x276   :  { %v4830_v12 = vpop.eup %4829 }
 0x277   :  { %v4832_v13 = vpop.eup %4831 }
 0x278   :  { %v4834_v15 = vpop.eup %4833  ;;  %v4477_v22 = vpop.f32.mrb[20].mxu1  ;;  %v721_v16 = vpack.c.bf16 %v4832_v13, %v4828_v10 }
 0x279   :  { %v649_v27 = vadd.f32 %v4477_v22, %v541_v0  ;;  %v640_v18 = vpop.f32.mrb[21].mxu1  ;;  %v720_v19 = vpack.c.bf16 %v4834_v15, %v4830_v12 }
 0x27a   :  { %v641_v21 = vadd.f32 %v640_v18, %v541_v0  ;;  %v4478_v23 = vpop.f32.mrb[22].mxu1 }
 0x27b   :  { %4835 = vtanh.f32 %v649_v27  ;;  %v652_v24 = vadd.f32 %v4478_v23, %v541_v0  ;;  %v643_v26 = vpop.f32.mrb[23].mxu1  ;;  %4503 = vmatprep.mubr.bf16.mxu1 %v720_v19 }
 0x27c   :  { %4837 = vtanh.f32 %v641_v21  ;;  %v644_v45 = vadd.f32 %v643_v26, %v541_v0  ;;  %4504 = vmatmul.mubr.bf16.vlgmr.msra.gmra.mrb[32].mxu1 %v721_v16 }
 0x27d   :  { %4839 = vtanh.f32 %v652_v24 }
 0x27e   :  { %4841 = vtanh.f32 %v644_v45 }
 0x280   :  { %v4481_v8 = vpop.f32.mrb[24].mxu1 }
 0x281   :  { %v665_v28 = vadd.f32 %v4481_v8, %v541_v0  ;;  %v656_v51 = vpop.f32.mrb[25].mxu1 }
 0x282   :  { %v657_v29 = vadd.f32 %v656_v51, %v541_v0  ;;  %v4482_v30 = vpop.f32.mrb[26].mxu1 }
 0x283   :  { %4843 = vtanh.f32 %v665_v28  ;;  %v668_v31 = vadd.f32 %v4482_v30, %v541_v0  ;;  %v659_v32 = vpop.f32.mrb[27].mxu1 }
 0x284   :  { %4845 = vtanh.f32 %v657_v29  ;;  %v660_v33 = vadd.f32 %v659_v32, %v541_v0 }
 0x285   :  { %v4836_v34 = vpop.eup %4835  ;;  %4847 = vtanh.f32 %v668_v31 }
 0x286   :  { %v4838_v35 = vpop.eup %4837  ;;  %4849 = vtanh.f32 %v660_v33 }
 0x287   :  { %v4840_v36 = vpop.eup %4839 }
 0x288   :  { %v4842_v7 = vpop.eup %4841  ;;  %v4485_v5 = vpop.f32.mrb[28].mxu1  ;;  %v723_v14 = vpack.c.bf16 %v4840_v36, %v4836_v34 }
 0x289   :  { %v681_v17 = vadd.f32 %v4485_v5, %v541_v0  ;;  %v672_v37 = vpop.f32.mrb[29].mxu1  ;;  %v722_v38 = vpack.c.bf16 %v4842_v7, %v4838_v35 }
 0x28a   :  { %v673_v39 = vadd.f32 %v672_v37, %v541_v0  ;;  %v4486_v20 = vpop.f32.mrb[30].mxu1 }
 0x28b   :  { %4851 = vtanh.f32 %v681_v17  ;;  %v684_v40 = vadd.f32 %v4486_v20, %v541_v0  ;;  %v675_v41 = vpop.f32.mrb[31].mxu1  ;;  %4507 = vmatprep.mubr.bf16.mxu1 %v722_v38 }
 0x28c   :  { %4853 = vtanh.f32 %v673_v39  ;;  %v676_v25 = vadd.f32 %v675_v41, %v541_v0  ;;  %4508 = vmatmul.mubr.bf16.gmra.mrb[36].mxu1 %v723_v14 }
 0x28d   :  { %v4844_v44 = vpop.eup %4843  ;;  %4855 = vtanh.f32 %v684_v40 }
 0x28e   :  { %v4846_v46 = vpop.eup %4845  ;;  %4857 = vtanh.f32 %v676_v25 }
 0x28f   :  { %v4848_v42 = vpop.eup %4847 }
 0x290   :  { %v4850_v47 = vpop.eup %4849  ;;  %v725_v48 = vpack.c.bf16 %v4848_v42, %v4844_v44 }
 0x291   :  { %v724_v50 = vpack.c.bf16 %v4850_v47, %v4846_v46 }
 0x293   :  { %4511 = vmatprep.mubr.bf16.mxu1 %v724_v50 }
 0x294   :  { %4512 = vmatmul.mubr.bf16.gmra.mrb[40].mxu1 %v725_v48 }
 0x295   :  { %v4852_v52 = vpop.eup %4851 }
 0x296   :  { %v4854_v53 = vpop.eup %4853 }
 0x297   :  { %v4856_v54 = vpop.eup %4855 }
 0x298   :  { %v4858_v55 = vpop.eup %4857  ;;  %v727_v56 = vpack.c.bf16 %v4856_v54, %v4852_v52 }
 0x299   :  { %v726_v57 = vpack.c.bf16 %v4858_v55, %v4854_v53 }
 0x29b   :  { %4515 = vmatprep.mubr.bf16.mxu1 %v726_v57 }
 0x29c   :  { %4516 = vmatmul.mubr.bf16.gmra.mrb[44].mxu1 %v727_v56 }
 0x34f   :  { %v4505_v61 = vpop.f32.mrb[32].mxu1 }
 0x350   :  { %v5887_v62 = vadd.f32 %v4505_v61, %v5884_v60  ;;  %v811_v11 = vpop.f32.mrb[33].mxu1 }
 0x351   :  { %v5890_v63 = vadd.f32 %v811_v11, %v5884_v60  ;;  %v4506_v0 = vpop.f32.mrb[34].mxu1 }
 0x352   :  { %v892_v1 = vand.u32 2147483647, %v5887_v62  ;;  %v5894_v2 = vadd.f32 %v4506_v0, %v5884_v60  ;;  %v814_v3 = vpop.f32.mrb[35].mxu1  ;;  %v876_v11 = vmax.f32 %v5887_v62, 0.0 }
 0x353   :  { %v890_v4 = vand.u32 2147483647, %v5890_v63  ;;  %v5898_v43 = vadd.f32 %v814_v3, %v5884_v60 }
 0x354   :  { %v908_v6 = vsub.f32 0.0, %v892_v1  ;;  %v893_v9 = vand.u32 2147483647, %v5894_v2 }
 0x355   :  { %v906_v49 = vsub.f32 0.0, %v890_v4  ;;  %v891_v10 = vand.u32 2147483647, %v5898_v43 }
 0x356   :  { %v926_v12 = vmul.f32 1.442695, %v908_v6  ;;  %v909_v13 = vsub.f32 0.0, %v893_v9  ;;  %v874_v6 = vmax.f32 %v5890_v63, 0.0 }
 0x357   :  { %v922_v15 = vmul.f32 1.442695, %v906_v49  ;;  %v907_v22 = vsub.f32 0.0, %v891_v10 }
 0x358   :  { %4859 = vpow2.f32 %v926_v12  ;;  %v928_v16 = vmul.f32 1.442695, %v909_v13 }
 0x359   :  { %4861 = vpow2.f32 %v922_v15  ;;  %v924_v27 = vmul.f32 1.442695, %v907_v22 }
 0x35a   :  { %4863 = vpow2.f32 %v928_v16 }
 0x35b   :  { %4865 = vpow2.f32 %v924_v27 }
 0x35f   :  { %v4509_v18 = vpop.f32.mrb[36].mxu1 }
 0x360   :  { %v5903_v19 = vadd.f32 %v4509_v18, %v5884_v60  ;;  %v827_v21 = vpop.f32.mrb[37].mxu1 }
 0x361   :  { %v5906_v23 = vadd.f32 %v827_v21, %v5884_v60  ;;  %v4510_v24 = vpop.f32.mrb[38].mxu1 }
 0x362   :  { %v4860_v26 = vpop.eup %4859  ;;  %v896_v45 = vand.u32 2147483647, %v5903_v19  ;;  %v5910_v8 = vadd.f32 %v4510_v24, %v5884_v60  ;;  %v830_v28 = vpop.f32.mrb[39].mxu1 }
 0x363   :  { %v4862_v51 = vpop.eup %4861  ;;  %v894_v29 = vand.u32 2147483647, %v5906_v23  ;;  %v5914_v30 = vadd.f32 %v830_v28, %v5884_v60  ;;  %v956_v31 = vadd.f32 1.0, %v4860_v26 }
 0x364   :  { %v4864_v32 = vpop.eup %4863  ;;  %v897_v33 = vand.u32 2147483647, %v5910_v8  ;;  %v954_v34 = vadd.f32 1.0, %v4862_v51  ;;  %v912_v14 = vsub.f32 0.0, %v896_v45 }
 0x365   :  { %v4866_v35 = vpop.eup %4865  ;;  %v910_v36 = vsub.f32 0.0, %v894_v29  ;;  %v895_v7 = vand.u32 2147483647, %v5914_v30  ;;  %4867 = vlog2.f32 %v956_v31  ;;  %v957_v5 = vadd.f32 1.0, %v4864_v32 }
 0x366   :  { %4869 = vlog2.f32 %v954_v34  ;;  %v913_v37 = vsub.f32 0.0, %v897_v33  ;;  %v955_v41 = vadd.f32 1.0, %v4866_v35  ;;  %v934_v42 = vmul.f32 1.442695, %v912_v14 }
 0x367   :  { %v930_v17 = vmul.f32 1.442695, %v910_v36  ;;  %v911_v38 = vsub.f32 0.0, %v895_v7  ;;  %v4513_v39 = vpop.f32.mrb[40].mxu1  ;;  %4871 = vlog2.f32 %v957_v5  ;;  %v1051_v7 = vpop.permute.xlu0 %1050  ;;  %v877_v14 = vmax.f32 %v5894_v2, 0.0 }
 0x368   :  { %v5919_v20 = vadd.f32 %v4513_v39, %v5884_v60  ;;  %v843_v40 = vpop.f32.mrb[41].mxu1  ;;  %v936_v52 = vmul.f32 1.442695, %v913_v37 }
 0x369   :  { %v932_v25 = vmul.f32 1.442695, %v911_v38  ;;  %v5922_v44 = vadd.f32 %v843_v40, %v5884_v60  ;;  %v4514_v46 = vpop.f32.mrb[42].mxu1  ;;  %4873 = vpow2.f32 %v930_v17 }
 0x36a   :  { %v900_v47 = vand.u32 2147483647, %v5919_v20  ;;  %v5926_v48 = vadd.f32 %v4514_v46, %v5884_v60  ;;  %v846_v50 = vpop.f32.mrb[43].mxu1 }
 0x36b   :  { %4875 = vpow2.f32 %v932_v25  ;;  %v898_v53 = vand.u32 2147483647, %v5922_v44  ;;  %v5930_v54 = vadd.f32 %v846_v50, %v5884_v60  ;;  %v1055_v25 = vpop.permute.xlu1 %1054 }
 0x36c   :  { %v916_v55 = vsub.f32 0.0, %v900_v47  ;;  %v901_v56 = vand.u32 2147483647, %v5926_v48  ;;  %4877 = vlog2.f32 %v955_v41 }
 0x36d   :  { %v914_v57 = vsub.f32 0.0, %v898_v53  ;;  %v899_v58 = vand.u32 2147483647, %v5930_v54  ;;  %4879 = vpow2.f32 %v934_v42 }
 0x36e   :  { %v942_v59 = vmul.f32 1.442695, %v916_v55  ;;  %v917_v61 = vsub.f32 0.0, %v901_v56  ;;  %4881 = vpow2.f32 %v936_v52 }
 0x36f   :  { %v4868_v0 = vpop.eup %4867  ;;  %v938_v1 = vmul.f32 1.442695, %v914_v57  ;;  %v915_v3 = vsub.f32 0.0, %v899_v58  ;;  %v4517_v4 = vpop.f32.mrb[44].mxu1 }
 0x370   :  { %v4870_v9 = vpop.eup %4869  ;;  %4883 = vpow2.f32 %v942_v59  ;;  %v944_v49 = vmul.f32 1.442695, %v917_v61  ;;  %v5937_v10 = vadd.f32 %v4517_v4, %v5884_v60  ;;  %v859_v12 = vpop.f32.mrb[45].mxu1  ;;  %v975_v13 = vmul.f32 0.6931472, %v4868_v0 }
 0x371   :  { %4885 = vpow2.f32 %v938_v1  ;;  %v940_v15 = vmul.f32 1.442695, %v915_v3  ;;  %v5940_v22 = vadd.f32 %v859_v12, %v5884_v60  ;;  %v4518_v16 = vpop.f32.mrb[46].mxu1  ;;  %v971_v27 = vmul.f32 0.6931472, %v4870_v9  ;;  %v4872_v45 = vpop.eup %4871 }
 0x372   :  { %4887 = vpow2.f32 %v944_v49  ;;  %v904_v18 = vand.u32 2147483647, %v5937_v10  ;;  %v5944_v21 = vadd.f32 %v4518_v16, %v5884_v60  ;;  %v862_v24 = vpop.f32.mrb[47].mxu1  ;;  %v1004_v26 = vadd.f32 %v975_v13, %v876_v11  ;;  %v1053_v1 = vpop.permute.xlu0 %1052 }
 0x373   :  { %4889 = vpow2.f32 %v940_v15  ;;  %v902_v28 = vand.u32 2147483647, %v5940_v22  ;;  %v5948_v51 = vadd.f32 %v862_v24, %v5884_v60  ;;  %v1002_v29 = vadd.f32 %v971_v27, %v874_v6  ;;  %v4874_v31 = vpop.eup %4873  ;;  %v1057_v16 = vpop.permute.xlu1 %1056 }
 0x374   :  { %v920_v32 = vsub.f32 0.0, %v904_v18  ;;  %v905_v33 = vand.u32 2147483647, %v5944_v21  ;;  %v1020_v39 = vadd.f32 1e-06, %v1004_v26  ;;  %v875_v60 = vmax.f32 %v5898_v43, 0.0 }
 0x375   :  { %v4876_v34 = vpop.eup %4875  ;;  %v918_v35 = vsub.f32 0.0, %v902_v28  ;;  %v903_v36 = vand.u32 2147483647, %v5948_v51  ;;  %v1018_v5 = vadd.f32 1e-06, %v1002_v29  ;;  %v958_v42 = vadd.f32 1.0, %v4874_v31 }
 0x376   :  { %v4878_v17 = vpop.eup %4877  ;;  %v950_v37 = vmul.f32 1.442695, %v920_v32  ;;  %v921_v38 = vsub.f32 0.0, %v905_v33  ;;  %v977_v52 = vmul.f32 0.6931472, %v4872_v45  ;;  %v959_v57 = vadd.f32 1.0, %v4876_v34  ;;  %v1059_v32 = vpop.permute.xlu0 %1058 }
 0x377   :  { %v946_v40 = vmul.f32 1.442695, %v918_v35  ;;  %v919_v41 = vsub.f32 0.0, %v903_v36  ;;  %v1098_v46 = vmul.f32 %v1051_v7, %v1018_v5  ;;  %v4880_v47 = vpop.eup %4879  ;;  %v973_v53 = vmul.f32 0.6931472, %v4878_v17  ;;  %v1061_v34 = vpop.permute.xlu1 %1060 }
 0x378   :  { %4891 = vpow2.f32 %v950_v37  ;;  %v952_v50 = vmul.f32 1.442695, %v921_v38  ;;  %v4882_v55 = vpop.eup %4881  ;;  %v1005_v59 = vadd.f32 %v977_v52, %v877_v14  ;;  %v1100_v0 = vmul.f32 %v1055_v25, %v1020_v39 }
 0x379   :  { %4893 = vpow2.f32 %v946_v40  ;;  %v948_v56 = vmul.f32 1.442695, %v919_v41  ;;  %1130 = vrot.lane.b32.xlu0 %v1098_v46, %s5483_s12  ;;  %v1003_v61 = vadd.f32 %v973_v53, %v875_v60  ;;  %v960_v3 = vadd.f32 1.0, %v4880_v47 }
 0x37a   :  { %v4884_v58 = vpop.eup %4883  ;;  %4895 = vpow2.f32 %v952_v50  ;;  %v1021_v6 = vadd.f32 1e-06, %v1005_v59  ;;  %v961_v49 = vadd.f32 1.0, %v4882_v55  ;;  %v5957_v13 = vsel %vm1219_vm0, %v5887_v62, %v1020_v39  ;;  %v1063_v60 = vpop.permute.xlu0 %1062 }
 0x37b   :  { %v4886_v11 = vpop.eup %4885  ;;  %4897 = vpow2.f32 %v948_v56  ;;  %v1019_v9 = vadd.f32 1e-06, %v1003_v61  ;;  %v5961_v15 = vsel %vm1219_vm0, %v5890_v63, %v1018_v5  ;;  %v964_v45 = vadd.f32 1.0, %v4884_v58 }
 0x37c   :  { %v4888_v4 = vpop.eup %4887  ;;  %4899 = vlog2.f32 %v958_v42  ;;  %v962_v27 = vadd.f32 1.0, %v4886_v11  ;;  %v5966_v18 = vsel %vm1219_vm0, %v5894_v2, %v1021_v6  ;;  %v1101_v36 = vmul.f32 %v1057_v16, %v1021_v6  ;;  %v1065_v42 = vpop.permute.xlu1 %1064 }
 0x37d   :  { %v4890_v12 = vpop.eup %4889  ;;  %1134 = vrot.lane.b32.xlu0 %v1100_v0, %s5483_s12  ;;  %4901 = vlog2.f32 %v959_v57  ;;  %v1099_v24 = vmul.f32 %v1053_v1, %v1019_v9  ;;  %v5970_v26 = vsel %vm1219_vm0, %v5898_v43, %v1019_v9  ;;  %v2183_v31 = vpack.c.bf16 %v5966_v18, %v5957_v13  ;;  %v4667_v13 = vld [vmem:[#allocation7 + $0x24] ss:$8 sps:$4 sm:$0xff]   ;;  %v4670_v18 = vld [vmem:[#allocation7 + $0x34] ss:$8 sps:$4 sm:$0xff]  }
 0x37e   :  { %v2182_v28 = vpack.c.bf16 %v5970_v26, %v5961_v15  ;;  %4903 = vlog2.f32 %v960_v3  ;;  %v963_v29 = vadd.f32 1.0, %v4890_v12  ;;  %v965_v33 = vadd.f32 1.0, %v4888_v4  ;;  %v1067_v16 = vpop.permute.xlu0 %1066  ;;  %v4665_v15 = vld [vmem:[#allocation7 + $0x20] ss:$8 sps:$4 sm:$0xff]   ;;  %v4668_v26 = vld [vmem:[#allocation7 + $0x30] ss:$8 sps:$4 sm:$0xff]  }
 0x37f   :  { %1132 = vrot.lane.b32.xlu1 %v1099_v24, %s5483_s12  ;;  %4905 = vlog2.f32 %v961_v49  ;;  %v878_v25 = vmax.f32 %v5906_v23, 0.0  ;;  %v879_v47 = vmax.f32 %v5914_v30, 0.0  ;;  %v880_v55 = vmax.f32 %v5903_v19, 0.0 }
 0x380   :  { %4907 = vlog2.f32 %v962_v27  ;;  %v881_v56 = vmax.f32 %v5910_v8, 0.0  ;;  %v882_v61 = vmax.f32 %v5922_v44, 0.0  ;;  %v884_v11 = vmax.f32 %v5919_v20, 0.0 }
 0x381   :  { %4909 = vlog2.f32 %v963_v29  ;;  %v883_v4 = vmax.f32 %v5930_v54, 0.0  ;;  %v885_v6 = vmax.f32 %v5926_v48, 0.0  ;;  %v886_v24 = vmax.f32 %v5940_v22, 0.0 }
 0x382   :  { %v4892_v35 = vpop.eup %4891  ;;  %4911 = vlog2.f32 %v964_v45 }
 0x383   :  { %v4894_v7 = vpop.eup %4893  ;;  %v968_v5 = vadd.f32 1.0, %v4892_v35  ;;  %1136 = vrot.lane.b32.xlu1 %v1101_v36, %s5483_s12  ;;  %4913 = vlog2.f32 %v965_v33  ;;  %v1069_v35 = vpop.permute.xlu1 %1068 }
 0x384   :  { %v4896_v14 = vpop.eup %4895  ;;  %v966_v17 = vadd.f32 1.0, %v4894_v7  ;;  %v887_v7 = vmax.f32 %v5948_v51, 0.0 }
 0x385   :  { %v4898_v37 = vpop.eup %4897  ;;  %4915 = vlog2.f32 %v968_v5  ;;  %v969_v38 = vadd.f32 1.0, %v4896_v14 }
 0x386   :  { %v4900_v39 = vpop.eup %4899  ;;  %4917 = vlog2.f32 %v966_v17  ;;  %v967_v40 = vadd.f32 1.0, %v4898_v37 }
 0x387   :  { %v4902_v41 = vpop.eup %4901  ;;  %v979_v46 = vmul.f32 0.6931472, %v4900_v39  ;;  %4919 = vlog2.f32 %v969_v38  ;;  %v888_v38 = vmax.f32 %v5937_v10, 0.0 }
 0x388   :  { %v981_v50 = vmul.f32 0.6931472, %v4902_v41  ;;  %4921 = vlog2.f32 %v967_v40  ;;  %v4904_v52 = vpop.eup %4903 }
 0x389   :  { %v1006_v53 = vadd.f32 %v979_v46, %v878_v25  ;;  %v4906_v57 = vpop.eup %4905  ;;  %v983_v59 = vmul.f32 0.6931472, %v4904_v52 }
 0x38a   :  { %v1007_v58 = vadd.f32 %v981_v50, %v879_v47  ;;  %v4908_v0 = vpop.eup %4907  ;;  %v985_v3 = vmul.f32 0.6931472, %v4906_v57 }
 0x38b   :  { %v1022_v1 = vadd.f32 1e-06, %v1006_v53  ;;  %v4910_v9 = vpop.eup %4909  ;;  %v1008_v12 = vadd.f32 %v983_v59, %v880_v55  ;;  %v987_v27 = vmul.f32 0.6931472, %v4908_v0 }
 0x38c   :  { %v1023_v49 = vadd.f32 1e-06, %v1007_v58  ;;  %v4912_v45 = vpop.eup %4911  ;;  %v1009_v33 = vadd.f32 %v985_v3, %v881_v56  ;;  %v989_v36 = vmul.f32 0.6931472, %v4910_v9 }
 0x38d   :  { %v1102_v29 = vmul.f32 %v1059_v32, %v1022_v1  ;;  %v4914_v5 = vpop.eup %4913  ;;  %v1024_v17 = vadd.f32 1e-06, %v1008_v12  ;;  %v1010_v37 = vadd.f32 %v987_v27, %v882_v61  ;;  %v991_v25 = vmul.f32 0.6931472, %v4912_v45 }
 0x38e   :  { %v1103_v14 = vmul.f32 %v1061_v34, %v1023_v49  ;;  %v1025_v40 = vadd.f32 1e-06, %v1009_v33  ;;  %v1011_v41 = vadd.f32 %v989_v36, %v883_v4  ;;  %v993_v46 = vmul.f32 0.6931472, %v4914_v5 }
 0x38f   :  { %v4916_v39 = vpop.eup %4915  ;;  %1138 = vrot.lane.b32.xlu0 %v1102_v29, %s5483_s12  ;;  %v5992_v32 = vsel %vm1219_vm0, %v5906_v23, %v1022_v1  ;;  %v5996_v50 = vsel %vm1219_vm0, %v5914_v30, %v1023_v49  ;;  %v1026_v34 = vadd.f32 1e-06, %v1010_v37  ;;  %v1104_v55 = vmul.f32 %v1063_v60, %v1024_v17  ;;  %v1071_v1 = vpop.permute.xlu0 %1070 }
 0x390   :  { %v4918_v47 = vpop.eup %4917  ;;  %1140 = vrot.lane.b32.xlu1 %v1103_v14, %s5483_s12  ;;  %v999_v52 = vmul.f32 0.6931472, %v4916_v39  ;;  %v1105_v56 = vmul.f32 %v1065_v42, %v1025_v40  ;;  %v1027_v57 = vadd.f32 1e-06, %v1011_v41  ;;  %v1012_v58 = vadd.f32 %v991_v25, %v884_v11  ;;  %v1073_v60 = vpop.permute.xlu1 %1072 }
 0x391   :  { %v4920_v53 = vpop.eup %4919  ;;  %v6001_v61 = vsel %vm1219_vm0, %v5910_v8, %v1025_v40  ;;  %v1106_v0 = vmul.f32 %v1067_v16, %v1026_v34  ;;  %v1013_v3 = vadd.f32 %v993_v46, %v885_v6  ;;  %v995_v4 = vmul.f32 0.6931472, %v4918_v47 }
 0x392   :  { %v4922_v59 = vpop.eup %4921  ;;  %v1107_v9 = vmul.f32 %v1069_v35, %v1027_v57  ;;  %v6005_v49 = vsel %vm1219_vm0, %v5930_v54, %v1027_v57  ;;  %v1028_v12 = vadd.f32 1e-06, %v1012_v58  ;;  %v1016_v45 = vadd.f32 %v999_v52, %v888_v38 }
 0x393   :  { %1142 = vrot.lane.b32.xlu0 %v1104_v55, %s5483_s12  ;;  %v997_v42 = vmul.f32 0.6931472, %v4922_v59  ;;  %v1029_v11 = vadd.f32 1e-06, %v1013_v3  ;;  %v1014_v27 = vadd.f32 %v995_v4, %v886_v24  ;;  %v1001_v29 = vmul.f32 0.6931472, %v4920_v53  ;;  %v1075_v41 = vpop.permute.xlu0 %1074 }
 0x394   :  { %1144 = vrot.lane.b32.xlu1 %v1105_v56, %s5483_s12  ;;  %v6011_v6 = vsel %vm1219_vm0, %v5903_v19, %v1024_v17  ;;  %v889_v33 = vmax.f32 %v5944_v21, 0.0  ;;  %v2184_v35 = vpack.c.bf16 %v5996_v50, %v5992_v32  ;;  %v6018_v36 = vsel %vm1219_vm0, %v5922_v44, %v1026_v34  ;;  %v1077_v46 = vpop.permute.xlu1 %1076  ;;  %v4639_v59 = vld [vmem:[#allocation4 + $0x40] sm:$0xff]  }
 0x395   :  { %v1015_v16 = vadd.f32 %v997_v42, %v887_v7  ;;  %v6022_v5 = vsel %vm1219_vm0, %v5926_v48, %v1029_v11  ;;  %v1030_v24 = vadd.f32 1e-06, %v1014_v27  ;;  %v1032_v14 = vadd.f32 1e-06, %v1016_v45  ;;  %4539 = vmatprep.subr.bf16.mxu1 %v4639_v59  ;;  %v4676_v32 = vld [vmem:[#allocation7 + $0x54] ss:$8 sps:$4 sm:$0xff]  }
 0x396   :  { %v1017_v37 = vadd.f32 %v1001_v29, %v889_v33  ;;  %v2185_v7 = vpack.c.bf16 %v6001_v61, %v6011_v6  ;;  %v2186_v38 = vpack.c.bf16 %v6005_v49, %v6018_v36  ;;  %v1108_v39 = vmul.f32 %v1071_v1, %v1028_v12  ;;  %4540 = vmatpush3.bf16.msra.mxu1 %v4639_v59  ;;  %v4674_v50 = vld [vmem:[#allocation7 + $0x50] ss:$8 sps:$4 sm:$0xff]   ;;  %v4679_v61 = vld [vmem:[#allocation7 + $0x64] ss:$8 sps:$4 sm:$0xff]   ;;  %v4677_v49 = vld [vmem:[#allocation7 + $0x60] ss:$8 sps:$4 sm:$0xff]  }
 0x397   :  { %1146 = vrot.lane.b32.xlu0 %v1106_v0, %s5483_s12  ;;  %v1031_v17 = vadd.f32 1e-06, %v1015_v16  ;;  %v6031_v40 = vsel %vm1219_vm0, %v5919_v20, %v1028_v12  ;;  %v6036_v25 = vsel %vm1219_vm0, %v5940_v22, %v1030_v24  ;;  %v1109_v53 = vmul.f32 %v1073_v60, %v1029_v11  ;;  %v4640_v0 = vld [vmem:[#allocation4 + $0x48] sm:$0xff]   ;;  %v1079_v4 = vpop.permute.xlu0 %1078  ;;  %v4641_v12 = vld [vmem:[#allocation4 + $0x50] sm:$0xff]   ;;  %v4642_v11 = vld [vmem:[#allocation4 + $0x58] sm:$0xff]  }
 0x398   :  { %1148 = vrot.lane.b32.xlu1 %v1107_v9, %s5483_s12  ;;  %v1033_v34 = vadd.f32 1e-06, %v1017_v37  ;;  %v2187_v52 = vpack.c.bf16 %v6022_v5, %v6031_v40  ;;  %v1110_v56 = vmul.f32 %v1075_v41, %v1030_v24  ;;  %v6048_v57 = vsel %vm1219_vm0, %v5937_v10, %v1032_v14  ;;  %v1081_v9 = vpop.permute.xlu1 %1080  ;;  %4541 = vmatprep.subr.bf16.mxu1 %v4640_v0  ;;  %v4682_v6 = vld [vmem:[#allocation7 + $0x74] ss:$8 sps:$4 sm:$0xff]   ;;  %v4685_v36 = vld [vmem:[#allocation10 + $0x4] ss:$8 sps:$4 sm:$0xff]  }
 0x399   :  { %v6040_v47 = vsel %vm1219_vm0, %v5948_v51, %v1031_v17  ;;  %v1111_v1 = vmul.f32 %v1077_v46, %v1031_v17  ;;  %v1112_v60 = vmul.f32 %v1079_v4, %v1032_v14  ;;  %v6151_v5 = vld [vmem:[%s7289_s9 + $0x4] ss:$0 sm:$0xff] }
 0x39a   :  { %v2188_v55 = vpack.c.bf16 %v6040_v47, %v6036_v25  ;;  %v6053_v58 = vsel %vm1219_vm0, %v5944_v21, %v1033_v34  ;;  %v1113_v42 = vmul.f32 %v1081_v9, %v1033_v34  ;;  %4542 = vmatpush3.bf16.msra.mxu1 %v4640_v0 }
 0x39b   :  { %1150 = vrot.lane.b32.xlu0 %v1108_v39, %s5483_s12  ;;  %v2189_v3 = vpack.c.bf16 %v6053_v58, %v6048_v57  ;;  %4543 = vmatprep.subr.bf16.mxu1 %v4641_v12 }
 0x39c   :  { %1152 = vrot.lane.b32.xlu1 %v1109_v53, %s5483_s12 }
 0x39e   :  { %4544 = vmatpush3.bf16.msra.mxu1 %v4641_v12 }
 0x39f   :  { %1154 = vrot.lane.b32.xlu0 %v1110_v56, %s5483_s12  ;;  %4545 = vmatprep.subr.bf16.mxu1 %v4642_v11 }
 0x3a0   :  { %1156 = vrot.lane.b32.xlu1 %v1111_v1, %s5483_s12 }
 0x3a2   :  { %4546 = vmatpush3.bf16.msra.mxu1 %v4642_v11 }
 0x3a3   :  { %1158 = vrot.lane.b32.xlu0 %v1112_v60, %s5483_s12 }
 0x3a4   :  { %1160 = vrot.lane.b32.xlu1 %v1113_v42, %s5483_s12 }
 0x3eb   :  { %v1131_v27 = vpop.permute.xlu0 %1130 }
 0x3ec   :  { %v1178_v29 = vadd.f32 %v1131_v27, %v5890_v63 }
 0x3ef   :  { %v1135_v33 = vpop.permute.xlu0 %1134 }
 0x3f0   :  { %v1180_v17 = vadd.f32 %v1135_v33, %v5887_v62  ;;  %v4643_v33 = vld [vmem:[#allocation4 + $0x60] sm:$0xff]  }
 0x3f1   :  { %v1133_v45 = vpop.permute.xlu1 %1132  ;;  %4547 = vmatprep.subr.bf16.mxu1 %v4643_v33 }
 0x3f2   :  { %v1179_v16 = vadd.f32 %v1133_v45, %v5898_v43  ;;  %4548 = vmatpush3.bf16.msra.mxu1 %v4643_v33  ;;  %v4653_v33 = vld [vmem:[#allocation9 + $0x20] ss:$8 sps:$4 sm:$0xff]  }
 0x3f4   :  { %v1198_v24 = vpack.c.bf16 %v1179_v16, %v1178_v29 }
 0x3f5   :  { %v1137_v14 = vpop.permute.xlu1 %1136 }
 0x3f6   :  { %v1181_v37 = vadd.f32 %v1137_v14, %v5894_v2  ;;  %4523 = vmatprep.mubr.msk.bf16.mxu0 %vm1219_vm0, %v1198_v24  ;;  %v4644_v24 = vld [vmem:[#allocation4 + $0x68] sm:$0xff]   ;;  %v4659_v14 = vld [vmem:[#allocation7] ss:$8 sps:$4 sm:$0xff]  }
 0x3f7   :  { %4549 = vmatprep.subr.bf16.mxu1 %v4644_v24 }
 0x3f8   :  { %v1199_v39 = vpack.c.bf16 %v1181_v37, %v1180_v17  ;;  %4550 = vmatpush3.bf16.msra.mxu1 %v4644_v24  ;;  %v4661_v17 = vld [vmem:[#allocation7 + $0x4] ss:$8 sps:$4 sm:$0xff]   ;;  %v4664_v37 = vld [vmem:[#allocation7 + $0x14] ss:$8 sps:$4 sm:$0xff]  }
 0x3f9   :  { %1741 = vmatprep.subr.bf16.mxu0 %v4661_v17 }
 0x3fa   :  { %4524 = vmatmul.mubr.msk.bf16.vlgmr.msra.gmra.mrb[16].mxu0 %vm1219_vm0, %v1199_v39  ;;  %v4662_v39 = vld [vmem:[#allocation7 + $0x10] ss:$8 sps:$4 sm:$0xff]  }
 0x3fb   :  { %1742 = vmatpush1.bf16.msra.mxu0 %v4659_v14 }
 0x3fc   :  { %1743 = vmatprep.subr.bf16.mxu0 %v4664_v37 }
 0x3ff   :  { %1744 = vmatpush1.bf16.msra.mxu0 %v4662_v39  ;;  %v4656_v39 = vld [vmem:[#allocation9 + $0x30] ss:$8 sps:$4 sm:$0xff]  }
 0x400   :  { %1745 = vmatprep.subr.bf16.mxu0 %v4667_v13 }
 0x401   :  { %v1139_v41 = vpop.permute.xlu0 %1138 }
 0x402   :  { %v1141_v46 = vpop.permute.xlu1 %1140  ;;  %v1182_v34 = vadd.f32 %v1139_v41, %v5906_v23  ;;  %v6090_v41 = vld [vmem:[%s7289_s9 + $0x3] ss:$0 sm:$0xff] }
 0x403   :  { %v1183_v63 = vadd.f32 %v1141_v46, %v5914_v30  ;;  %1746 = vmatpush1.bf16.msra.mxu0 %v4665_v15 }
 0x404   :  { %1747 = vmatprep.subr.bf16.mxu0 %v4670_v18 }
 0x405   :  { %v1200_v53 = vpack.c.bf16 %v1183_v63, %v1182_v34  ;;  %v1143_v43 = vpop.permute.xlu0 %1142 }
 0x406   :  { %v1145_v56 = vpop.permute.xlu1 %1144  ;;  %v1184_v59 = vadd.f32 %v1143_v43, %v5903_v19 }
 0x407   :  { %v1185_v62 = vadd.f32 %v1145_v56, %v5910_v8  ;;  %4527 = vmatprep.mubr.msk.bf16.mxu0 %vm1219_vm0, %v1200_v53  ;;  %1748 = vmatpush1.bf16.msra.mxu0 %v4668_v26 }
 0x409   :  { %v1201_v2 = vpack.c.bf16 %v1185_v62, %v1184_v59  ;;  %v1147_v0 = vpop.permute.xlu0 %1146 }
 0x40a   :  { %v1149_v1 = vpop.permute.xlu1 %1148  ;;  %v1186_v4 = vadd.f32 %v1147_v0, %v5922_v44 }
 0x40b   :  { %v1187_v9 = vadd.f32 %v1149_v1, %v5930_v54  ;;  %4528 = vmatmul.mubr.msk.bf16.gmra.mrb[20].mxu0 %vm1219_vm0, %v1201_v2 }
 0x40d   :  { %v1202_v23 = vpack.c.bf16 %v1187_v9, %v1186_v4  ;;  %v1151_v30 = vpop.permute.xlu0 %1150 }
 0x40e   :  { %v1153_v12 = vpop.permute.xlu1 %1152  ;;  %v1188_v60 = vadd.f32 %v1151_v30, %v5919_v20 }
 0x40f   :  { %v1189_v19 = vadd.f32 %v1153_v12, %v5926_v48  ;;  %4531 = vmatprep.mubr.msk.bf16.mxu0 %vm1219_vm0, %v1202_v23 }
 0x411   :  { %v1203_v8 = vpack.c.bf16 %v1189_v19, %v1188_v60  ;;  %v1155_v42 = vpop.permute.xlu0 %1154  ;;  %v4647_v19 = vld [vmem:[#allocation9] ss:$8 sps:$4 sm:$0xff]  }
 0x412   :  { %v1157_v11 = vpop.permute.xlu1 %1156  ;;  %v1190_v27 = vadd.f32 %v1155_v42, %v5940_v22  ;;  %v4645_v22 = vld [vmem:[#allocation4 + $0x70] sm:$0xff]  }
 0x413   :  { %v1191_v44 = vadd.f32 %v1157_v11, %v5948_v51  ;;  %4532 = vmatmul.mubr.msk.bf16.gmra.mrb[24].mxu0 %vm1219_vm0, %v1203_v8  ;;  %4551 = vmatprep.subr.bf16.mxu1 %v4645_v22  ;;  %v4646_v51 = vld [vmem:[#allocation4 + $0x78] sm:$0xff]   ;;  %v4652_v11 = vld [vmem:[#allocation9 + $0x14] ss:$8 sps:$4 sm:$0xff]  }
 0x414   :  { %4552 = vmatpush3.bf16.msra.mxu1 %v4645_v22 }
 0x415   :  { %v1204_v54 = vpack.c.bf16 %v1191_v44, %v1190_v27  ;;  %v1159_v45 = vpop.permute.xlu0 %1158  ;;  %4553 = vmatprep.subr.bf16.mxu1 %v4646_v51 }
 0x416   :  { %v1161_v29 = vpop.permute.xlu1 %1160  ;;  %v1192_v16 = vadd.f32 %v1159_v45, %v5937_v10  ;;  %v4649_v10 = vld [vmem:[#allocation9 + $0x4] ss:$8 sps:$4 sm:$0xff]   ;;  %v4650_v45 = vld [vmem:[#allocation9 + $0x10] ss:$8 sps:$4 sm:$0xff]  }
 0x417   :  { %v1193_v20 = vadd.f32 %v1161_v29, %v5944_v21  ;;  %4535 = vmatprep.mubr.msk.bf16.mxu0 %vm1219_vm0, %v1204_v54  ;;  %v5484_v21 = vmov 0   ;;  %v4655_v29 = vld [vmem:[#allocation9 + $0x24] ss:$8 sps:$4 sm:$0xff]  }
 0x418   :  { %4554 = vmatpush3.bf16.msra.mxu1 %v4646_v51  ;;  %v4658_v51 = vld [vmem:[#allocation9 + $0x34] ss:$8 sps:$4 sm:$0xff]  }
 0x419   :  { %v1205_v48 = vpack.c.bf16 %v1193_v20, %v1192_v16  ;;  %2268 = vmatprep.subr.bf16.mxu1 %v4649_v10 }
 0x41b   :  { %4536 = vmatmul.mubr.msk.bf16.gmra.mrb[28].mxu0 %vm1219_vm0, %v1205_v48 }
 0x41c   :  { %1773 = vmatprep.mubr.bf16.mxu0 %v5484_v21 }
 0x4cd   :  { %v4525_v46 = vpop.f32.mrb[16].mxu0 }
 0x4ce   :  { %v1287_v34 = vadd.f32 %v4525_v46, %v6090_v41  ;;  %v1278_v63 = vpop.f32.mrb[17].mxu0 }
 0x4cf   :  { %v1279_v53 = vadd.f32 %v1278_v63, %v6090_v41  ;;  %v4526_v43 = vpop.f32.mrb[18].mxu0 }
 0x4d0   :  { %4923 = vtanh.f32 %v1287_v34  ;;  %v1290_v56 = vadd.f32 %v4526_v43, %v6090_v41  ;;  %v1281_v59 = vpop.f32.mrb[19].mxu0 }
 0x4d1   :  { %4925 = vtanh.f32 %v1279_v53  ;;  %v1282_v62 = vadd.f32 %v1281_v59, %v6090_v41 }
 0x4d2   :  { %4927 = vtanh.f32 %v1290_v56 }
 0x4d3   :  { %4929 = vtanh.f32 %v1282_v62 }
 0x4da   :  { %v4924_v2 = vpop.eup %4923 }
 0x4db   :  { %v4926_v0 = vpop.eup %4925 }
 0x4dc   :  { %v4928_v1 = vpop.eup %4927 }
 0x4dd   :  { %v4930_v4 = vpop.eup %4929  ;;  %v1375_v23 = vpack.c.bf16 %v4928_v1, %v4924_v2 }
 0x4de   :  { %v4529_v9 = vpop.f32.mrb[20].mxu0  ;;  %v1374_v60 = vpack.c.bf16 %v4930_v4, %v4926_v0 }
 0x4df   :  { %v1303_v30 = vadd.f32 %v4529_v9, %v6090_v41  ;;  %v1294_v12 = vpop.f32.mrb[21].mxu0 }
 0x4e0   :  { %v1295_v8 = vadd.f32 %v1294_v12, %v6090_v41  ;;  %v4530_v42 = vpop.f32.mrb[22].mxu0  ;;  %4555 = vmatprep.mubr.bf16.mxu1 %v1374_v60 }
 0x4e1   :  { %4931 = vtanh.f32 %v1303_v30  ;;  %v1306_v27 = vadd.f32 %v4530_v42, %v6090_v41  ;;  %v1297_v44 = vpop.f32.mrb[23].mxu0  ;;  %4556 = vmatmul.mubr.bf16.vlgmr.msra.gmra.mrb[48].mxu1 %v1375_v23 }
 0x4e2   :  { %4933 = vtanh.f32 %v1295_v8  ;;  %v1298_v54 = vadd.f32 %v1297_v44, %v6090_v41  ;;  %2269 = vmatpush1.bf16.msra.mxu1 %v4647_v19 }
 0x4e3   :  { %4935 = vtanh.f32 %v1306_v27  ;;  %2270 = vmatprep.subr.bf16.mxu1 %v4652_v11 }
 0x4e4   :  { %4937 = vtanh.f32 %v1298_v54 }
 0x4e6   :  { %v4533_v16 = vpop.f32.mrb[24].mxu0  ;;  %2271 = vmatpush1.bf16.msra.mxu1 %v4650_v45 }
 0x4e7   :  { %v1319_v20 = vadd.f32 %v4533_v16, %v6090_v41  ;;  %v1310_v48 = vpop.f32.mrb[25].mxu0  ;;  %2272 = vmatprep.subr.bf16.mxu1 %v4655_v29 }
 0x4e8   :  { %v1311_v24 = vadd.f32 %v1310_v48, %v6090_v41  ;;  %v4534_v22 = vpop.f32.mrb[26].mxu0 }
 0x4e9   :  { %4939 = vtanh.f32 %v1319_v20  ;;  %v1322_v10 = vadd.f32 %v4534_v22, %v6090_v41  ;;  %v1313_v14 = vpop.f32.mrb[27].mxu0 }
 0x4ea   :  { %4941 = vtanh.f32 %v1311_v24  ;;  %v1314_v17 = vadd.f32 %v1313_v14, %v6090_v41  ;;  %2273 = vmatpush1.bf16.msra.mxu1 %v4653_v33  ;;  %v1651_v24 = vlaneseq }
 0x4eb   :  { %v4932_v37 = vpop.eup %4931  ;;  %4943 = vtanh.f32 %v1322_v10  ;;  %2274 = vmatprep.subr.bf16.mxu1 %v4658_v51 }
 0x4ec   :  { %v4934_v46 = vpop.eup %4933  ;;  %4945 = vtanh.f32 %v1314_v17 }
 0x4ed   :  { %v4936_v34 = vpop.eup %4935 }
 0x4ee   :  { %v4938_v63 = vpop.eup %4937  ;;  %v4537_v53 = vpop.f32.mrb[28].mxu0  ;;  %v1377_v43 = vpack.c.bf16 %v4936_v34, %v4932_v37  ;;  %2275 = vmatpush1.bf16.msra.mxu1 %v4656_v39 }
 0x4ef   :  { %v1335_v56 = vadd.f32 %v4537_v53, %v6090_v41  ;;  %v1326_v59 = vpop.f32.mrb[29].mxu0  ;;  %v1376_v62 = vpack.c.bf16 %v4938_v63, %v4934_v46  ;;  %v1652_v46 = vshrl.u32 %v1651_v24, 7 }
 0x4f0   :  { %v1327_v2 = vadd.f32 %v1326_v59, %v6090_v41  ;;  %v4538_v0 = vpop.f32.mrb[30].mxu0 }
 0x4f1   :  { %4947 = vtanh.f32 %v1335_v56  ;;  %v1338_v1 = vadd.f32 %v4538_v0, %v6090_v41  ;;  %v1329_v4 = vpop.f32.mrb[31].mxu0  ;;  %4559 = vmatprep.mubr.bf16.mxu1 %v1376_v62 }
 0x4f2   :  { %4949 = vtanh.f32 %v1327_v2  ;;  %v1330_v9 = vadd.f32 %v1329_v4, %v6090_v41  ;;  %4560 = vmatmul.mubr.bf16.gmra.mrb[52].mxu1 %v1377_v43 }
 0x4f3   :  { %v4940_v23 = vpop.eup %4939  ;;  %4951 = vtanh.f32 %v1338_v1 }
 0x4f4   :  { %v4942_v30 = vpop.eup %4941  ;;  %4953 = vtanh.f32 %v1330_v9 }
 0x4f5   :  { %v4944_v12 = vpop.eup %4943 }
 0x4f6   :  { %v4946_v60 = vpop.eup %4945  ;;  %v1379_v19 = vpack.c.bf16 %v4944_v12, %v4940_v23 }
 0x4f7   :  { %v1378_v8 = vpack.c.bf16 %v4946_v60, %v4942_v30 }
 0x4f9   :  { %4563 = vmatprep.mubr.bf16.mxu1 %v1378_v8  ;;  %v4683_v8 = vld [vmem:[#allocation10] ss:$8 sps:$4 sm:$0xff]  }
 0x4fa   :  { %4564 = vmatmul.mubr.bf16.gmra.mrb[56].mxu1 %v1379_v19 }
 0x4fb   :  { %v4948_v42 = vpop.eup %4947 }
 0x4fc   :  { %v4950_v11 = vpop.eup %4949 }
 0x4fd   :  { %v4952_v27 = vpop.eup %4951 }
 0x4fe   :  { %v4954_v44 = vpop.eup %4953  ;;  %v1381_v54 = vpack.c.bf16 %v4952_v27, %v4948_v42  ;;  %v4688_v42 = vld [vmem:[#allocation10 + $0x14] ss:$8 sps:$4 sm:$0xff]  }
 0x4ff   :  { %v1380_v45 = vpack.c.bf16 %v4954_v44, %v4950_v11 }
 0x501   :  { %4567 = vmatprep.mubr.bf16.mxu1 %v1380_v45 }
 0x502   :  { %4568 = vmatmul.mubr.bf16.gmra.mrb[60].mxu1 %v1381_v54 }
 0x503   :  { %2300 = vmatprep.mubr.bf16.mxu1 %v5484_v21 }
 0x50a   :  { %4115 = vmatmul.mubr.msk.bf16.vlgmr.msra.gmra.mrb[64].mxu1 %vm2243_vm1, %v2182_v28  ;;  %v4673_v28 = vld [vmem:[#allocation7 + $0x44] ss:$8 sps:$4 sm:$0xff]  }
 0x50b   :  { %2310 = vmatprep.mubr.bf16.mxu1 %v5484_v21  ;;  %1749 = vmatprep.subr.bf16.mxu0 %v4673_v28 }
 0x512   :  { %4116 = vmatmul.mubr.msk.bf16.gmra.mrb[68].mxu1 %vm2243_vm1, %v2183_v31  ;;  %v4671_v31 = vld [vmem:[#allocation7 + $0x40] ss:$8 sps:$4 sm:$0xff]  }
 0x513   :  { %2320 = vmatprep.mubr.bf16.mxu1 %v5484_v21  ;;  %1750 = vmatpush1.bf16.msra.mxu0 %v4671_v31 }
 0x514   :  { %1751 = vmatprep.subr.bf16.mxu0 %v4676_v32 }
 0x517   :  { %1752 = vmatpush1.bf16.msra.mxu0 %v4674_v50 }
 0x518   :  { %1753 = vmatprep.subr.bf16.mxu0 %v4679_v61 }
 0x51a   :  { %4117 = vmatmul.mubr.msk.bf16.gmra.mrb[72].mxu1 %vm2243_vm1, %v2184_v35  ;;  %v4680_v35 = vld [vmem:[#allocation7 + $0x70] ss:$8 sps:$4 sm:$0xff]  }
 0x51b   :  { %2330 = vmatprep.mubr.bf16.mxu1 %v5484_v21  ;;  %1754 = vmatpush1.bf16.msra.mxu0 %v4677_v49  ;;  %v4686_v49 = vld [vmem:[#allocation10 + $0x10] ss:$8 sps:$4 sm:$0xff]  }
 0x51c   :  { %1755 = vmatprep.subr.bf16.mxu0 %v4682_v6 }
 0x51f   :  { %1756 = vmatpush1.bf16.msra.mxu0 %v4680_v35 }
 0x520   :  { %2634 = vmatprep.subr.bf16.mxu0 %v4685_v36  ;;  %v4691_v36 = vld [vmem:[#allocation10 + $0x24] ss:$8 sps:$4 sm:$0xff]  }
 0x522   :  { %4118 = vmatmul.mubr.msk.bf16.gmra.mrb[76].mxu1 %vm2243_vm1, %v2185_v7 }
 0x523   :  { %2340 = vmatprep.mubr.bf16.mxu1 %v5484_v21 }
 0x52a   :  { %4119 = vmatmul.mubr.msk.bf16.gmra.mrb[80].mxu1 %vm2243_vm1, %v2186_v38 }
 0x52b   :  { %2350 = vmatprep.mubr.bf16.mxu1 %v5484_v21 }
 0x532   :  { %4120 = vmatmul.mubr.msk.bf16.gmra.mrb[84].mxu1 %vm2243_vm1, %v2187_v52 }
 0x533   :  { %2360 = vmatprep.mubr.bf16.mxu1 %v5484_v21 }
 0x53a   :  { %4121 = vmatmul.mubr.msk.bf16.gmra.mrb[88].mxu1 %vm2243_vm1, %v2188_v55 }
 0x53b   :  { %2370 = vmatprep.mubr.bf16.mxu1 %v5484_v21 }
 0x542   :  { %4122 = vmatmul.mubr.msk.bf16.gmra.mrb[92].mxu1 %vm2243_vm1, %v2189_v3 }
 0x5b4   :  { %v4557_v7 = vpop.f32.mrb[48].mxu1 }
 0x5b5   :  { %v1474_v38 = vadd.f32 %v4557_v7, %v6151_v5  ;;  %v1465_v40 = vpop.f32.mrb[49].mxu1  ;;  %v6189_v7 = vsub.s32 0, %v1652_v46 }
 0x5b6   :  { %v1466_v25 = vadd.f32 %v1465_v40, %v6151_v5  ;;  %v4558_v47 = vpop.f32.mrb[50].mxu1 }
 0x5b7   :  { %v1546_v52 = vmin.f32 %v1474_v38, 0.0  ;;  %v1477_v55 = vadd.f32 %v4558_v47, %v6151_v5  ;;  %v1468_v57 = vpop.f32.mrb[51].mxu1  ;;  %vm1530_vm2 = vcmp.gt.f32.partialorder %v1474_v38, 0.0 }
 0x5b8   :  { %v1544_v58 = vmin.f32 %v1466_v25, 0.0  ;;  %v1469_v3 = vadd.f32 %v1468_v57, %v6151_v5  ;;  %vm1528_vm3 = vcmp.gt.f32.partialorder %v1466_v25, 0.0 }
 0x5b9   :  { %v1564_v41 = vmul.f32 1.442695, %v1546_v52  ;;  %v1547_v29 = vmin.f32 %v1477_v55, 0.0  ;;  %vm1531_vm4 = vcmp.gt.f32.partialorder %v1477_v55, 0.0 }
 0x5ba   :  { %v1560_v16 = vmul.f32 1.442695, %v1544_v58  ;;  %v1545_v20 = vmin.f32 %v1469_v3, 0.0  ;;  %vm1529_vm5 = vcmp.gt.f32.partialorder %v1469_v3, 0.0  ;;  %v4689_v58 = vld [vmem:[#allocation10 + $0x20] ss:$8 sps:$4 sm:$0xff]  }
 0x5bb   :  { %4955 = vpow2.f32 %v1564_v41  ;;  %v1566_v48 = vmul.f32 1.442695, %v1547_v29  ;;  %v4694_v29 = vld [vmem:[#allocation10 + $0x34] ss:$8 sps:$4 sm:$0xff]  }
 0x5bc   :  { %4957 = vpow2.f32 %v1560_v16  ;;  %v1562_v33 = vmul.f32 1.442695, %v1545_v20 }
 0x5bd   :  { %4959 = vpow2.f32 %v1566_v48 }
 0x5be   :  { %4961 = vpow2.f32 %v1562_v33 }
 0x5c5   :  { %v4561_v22 = vpop.f32.mrb[52].mxu1  ;;  %v4956_v51 = vpop.eup %4955 }
 0x5c6   :  { %v6158_v10 = vadd.f32 %v4561_v22, %v6151_v5  ;;  %v1481_v14 = vpop.f32.mrb[53].mxu1  ;;  %v4958_v17 = vpop.eup %4957  ;;  %v4075_v63 = vadd.f32 -1.0, %v4956_v51 }
 0x5c7   :  { %v6161_v37 = vadd.f32 %v1481_v14, %v6151_v5  ;;  %v4562_v39 = vpop.f32.mrb[54].mxu1  ;;  %v4960_v34 = vpop.eup %4959  ;;  %v4073_v53 = vadd.f32 -1.0, %v4958_v17 }
 0x5c8   :  { %v1550_v43 = vmin.f32 %v6158_v10, 0.0  ;;  %v6165_v56 = vadd.f32 %v4562_v39, %v6151_v5  ;;  %v1484_v59 = vpop.f32.mrb[55].mxu1  ;;  %v4962_v62 = vpop.eup %4961  ;;  %v4076_v2 = vadd.f32 -1.0, %v4960_v34  ;;  %v1610_v11 = vsel %vm1530_vm2, %v1474_v38, %v4075_v63 }
 0x5c9   :  { %v1548_v0 = vmin.f32 %v6161_v37, 0.0  ;;  %v6169_v1 = vadd.f32 %v1484_v59, %v6151_v5  ;;  %v4074_v4 = vadd.f32 -1.0, %v4962_v62  ;;  %v1608_v23 = vsel %vm1528_vm3, %v1466_v25, %v4073_v53  ;;  %v4106_v25 = vld [vmem:[%s7289_s9 + $0x6] ss:$8 sm:$0x3] }
 0x5ca   :  { %v1572_v9 = vmul.f32 1.442695, %v1550_v43  ;;  %v1551_v12 = vmin.f32 %v6165_v56, 0.0  ;;  %v1611_v27 = vsel %vm1531_vm4, %v1477_v55, %v4076_v2  ;;  %v6196_v55 = vsub.s32 1, %v1652_v46  ;;  %v4692_v53 = vld [vmem:[#allocation10 + $0x30] ss:$8 sps:$4 sm:$0xff]  }
 0x5cb   :  { %v1568_v30 = vmul.f32 1.442695, %v1548_v0  ;;  %v1549_v60 = vmin.f32 %v6169_v1, 0.0  ;;  %v1609_v19 = vsel %vm1529_vm5, %v1469_v3, %v4074_v4  ;;  %v1641_v26 = vpack.c.bf16 %v1611_v27, %v1610_v11  ;;  %v4697_v2 = vld [vmem:[#allocation10 + $0x44] ss:$8 sps:$4 sm:$0xff]  }
 0x5cc   :  { %4963 = vpow2.f32 %v1572_v9  ;;  %v1640_v44 = vpack.c.bf16 %v1609_v19, %v1608_v23  ;;  %v1574_v54 = vmul.f32 1.442695, %v1551_v12  ;;  %v6202_v33 = vrot.slane %v4106_v25, %v6189_v7 }
 0x5cd   :  { %4965 = vpow2.f32 %v1568_v30  ;;  %v1570_v45 = vmul.f32 1.442695, %v1549_v60  ;;  %v4565_v13 = vpop.f32.mrb[56].mxu1  ;;  %v6208_v17 = vrot.slane %v4106_v25, %v6196_v55  ;;  %vm1534_vm6 = vcmp.gt.f32.partialorder %v6158_v10, 0.0 }
 0x5ce   :  { %v6175_v15 = vadd.f32 %v4565_v13, %v6151_v5  ;;  %v1497_v18 = vpop.f32.mrb[57].mxu1  ;;  %4967 = vpow2.f32 %v1574_v54  ;;  %1774 = vmatmul.mubr.bf16.vlgmr.msra.gmra.mrb[32].mxu0 %v1640_v44  ;;  %vm1532_vm7 = vcmp.gt.f32.partialorder %v6161_v37, 0.0  ;;  %vm1535_vm8 = vcmp.gt.f32.partialorder %v6165_v56, 0.0  ;;  %v4695_v44 = vld [vmem:[#allocation10 + $0x40] ss:$8 sps:$4 sm:$0xff]  }
 0x5cf   :  { %v6178_v28 = vadd.f32 %v1497_v18, %v6151_v5  ;;  %v4566_v31 = vpop.f32.mrb[58].mxu1  ;;  %4969 = vpow2.f32 %v1570_v45  ;;  %2635 = vmatpush1.bf16.msra.mxu0 %v4683_v8  ;;  %1783 = vmatprep.mubr.bf16.mxu0 %v5484_v21  ;;  %vm1533_vm9 = vcmp.gt.f32.partialorder %v6169_v1, 0.0 }
 0x5d0   :  { %v1554_v32 = vmin.f32 %v6175_v15, 0.0  ;;  %v6182_v50 = vadd.f32 %v4566_v31, %v6151_v5  ;;  %v1500_v61 = vpop.f32.mrb[59].mxu1  ;;  %2636 = vmatprep.subr.bf16.mxu0 %v4688_v42  ;;  %vm1538_vm10 = vcmp.gt.f32.partialorder %v6175_v15, 0.0 }
 0x5d1   :  { %v1552_v6 = vmin.f32 %v6178_v28, 0.0  ;;  %v6187_v35 = vadd.f32 %v1500_v61, %v6151_v5  ;;  %vm1536_vm11 = vcmp.gt.f32.partialorder %v6178_v28, 0.0 }
 0x5d2   :  { %v1580_v38 = vmul.f32 1.442695, %v1554_v32  ;;  %v1555_v40 = vmin.f32 %v6182_v50, 0.0  ;;  %vm1539_vm12 = vcmp.gt.f32.partialorder %v6182_v50, 0.0 }
 0x5d3   :  { %v1576_v47 = vmul.f32 1.442695, %v1552_v6  ;;  %v1553_v52 = vmin.f32 %v6187_v35, 0.0  ;;  %2637 = vmatpush1.bf16.msra.mxu0 %v4686_v49  ;;  %vm1537_vm13 = vcmp.gt.f32.partialorder %v6187_v35, 0.0 }
 0x5d4   :  { %4971 = vpow2.f32 %v1580_v38  ;;  %v1582_v57 = vmul.f32 1.442695, %v1555_v40  ;;  %2638 = vmatprep.subr.bf16.mxu0 %v4691_v36 }
 0x5d5   :  { %4973 = vpow2.f32 %v1576_v47  ;;  %v1578_v3 = vmul.f32 1.442695, %v1553_v52  ;;  %v4569_v41 = vpop.f32.mrb[60].mxu1  ;;  %v4698_v47 = vld [vmem:[#allocation10 + $0x50] ss:$8 sps:$4 sm:$0xff]  }
 0x5d6   :  { %v4964_v16 = vpop.eup %4963  ;;  %4975 = vpow2.f32 %v1582_v57  ;;  %v6199_v20 = vadd.f32 %v4569_v41, %v6151_v5  ;;  %v1513_v48 = vpop.f32.mrb[61].mxu1  ;;  %1784 = vmatmul.mubr.bf16.gmra.mrb[36].mxu0 %v1641_v26  ;;  %v4700_v26 = vld [vmem:[#allocation10 + $0x54] ss:$8 sps:$4 sm:$0xff]   ;;  %v4703_v57 = vld [vmem:[#allocation10 + $0x64] ss:$8 sps:$4 sm:$0xff]  }
 0x5d7   :  { %v4966_v24 = vpop.eup %4965  ;;  %v4079_v22 = vadd.f32 -1.0, %v4964_v16  ;;  %4977 = vpow2.f32 %v1578_v3  ;;  %v6205_v51 = vadd.f32 %v1513_v48, %v6151_v5  ;;  %v4570_v14 = vpop.f32.mrb[62].mxu1  ;;  %2639 = vmatpush1.bf16.msra.mxu0 %v4689_v58  ;;  %1793 = vmatprep.mubr.bf16.mxu0 %v5484_v21 }
 0x5d8   :  { %v4077_v39 = vadd.f32 -1.0, %v4966_v24  ;;  %v1558_v46 = vmin.f32 %v6199_v20, 0.0  ;;  %v6213_v34 = vadd.f32 %v4570_v14, %v6151_v5  ;;  %v1516_v63 = vpop.f32.mrb[63].mxu1  ;;  %v4968_v43 = vpop.eup %4967  ;;  %2640 = vmatprep.subr.bf16.mxu0 %v4694_v29  ;;  %v4701_v24 = vld [vmem:[#allocation10 + $0x60] ss:$8 sps:$4 sm:$0xff]   ;;  %vm1542_vm14 = vcmp.gt.f32.partialorder %v6199_v20, 0.0 }
 0x5d9   :  { %v1556_v59 = vmin.f32 %v6205_v51, 0.0  ;;  %v6220_v62 = vadd.f32 %v1516_v63, %v6151_v5  ;;  %v4970_v0 = vpop.eup %4969  ;;  %v4080_v4 = vadd.f32 -1.0, %v4968_v43  ;;  %v6228_v19 = vsel %vm1534_vm6, %v6158_v10, %v4079_v22 }
 0x5da   :  { %v1588_v9 = vmul.f32 1.442695, %v1558_v46  ;;  %v1559_v23 = vmin.f32 %v6213_v34, 0.0  ;;  %v4078_v30 = vadd.f32 -1.0, %v4970_v0  ;;  %v1612_v8 = vsel %vm1532_vm7, %v6161_v37, %v4077_v39 }
 0x5db   :  { %v1584_v12 = vmul.f32 1.442695, %v1556_v59  ;;  %v1557_v60 = vmin.f32 %v6220_v62, 0.0  ;;  %2641 = vmatpush1.bf16.msra.mxu0 %v4692_v53  ;;  %v1615_v42 = vsel %vm1535_vm8, %v6165_v56, %v4080_v4  ;;  %vm1540_vm15 = vcmp.gt.f32.partialorder %v6205_v51, 0.0 }
 0x5dc   :  { %4979 = vpow2.f32 %v1588_v9  ;;  %v1590_v5 = vmul.f32 1.442695, %v1559_v23  ;;  %2642 = vmatprep.subr.bf16.mxu0 %v4697_v2  ;;  %v1613_v10 = vsel %vm1533_vm9, %v6169_v1, %v4078_v30  ;;  %v1643_v54 = vpack.c.bf16 %v1615_v42, %v6228_v19  ;;  %v4704_v23 = vld [vmem:[#allocation10 + $0x70] ss:$8 sps:$4 sm:$0xff]  }
 0x5dd   :  { %4981 = vpow2.f32 %v1584_v12  ;;  %v1586_v11 = vmul.f32 1.442695, %v1557_v60  ;;  %v2302_v27 = vpop.f32.mrb[64].mxu1  ;;  %v1642_v18 = vpack.c.bf16 %v1613_v10, %v1612_v8  ;;  %vm1543_vm0 = vcmp.gt.f32.partialorder %v6213_v34, 0.0  ;;  %v4709_v60 = vld [vmem:[#allocation10 + $0x84] ss:$8 sps:$4 sm:$0xff]  }
 0x5de   :  { %v4972_v45 = vpop.eup %4971  ;;  %4983 = vpow2.f32 %v1590_v5  ;;  %v2303_v13 = vadd.f32 %v2302_v27, %v6202_v33  ;;  %v2304_v37 = vpop.f32.mrb[65].mxu1  ;;  %vm1541_vm1 = vcmp.gt.f32.partialorder %v6220_v62, 0.0 }
 0x5df   :  { %v4974_v31 = vpop.eup %4973  ;;  %v4083_v56 = vadd.f32 -1.0, %v4972_v45  ;;  %4985 = vpow2.f32 %v1586_v11  ;;  %v2305_v32 = vadd.f32 %v2304_v37, %v6208_v17  ;;  %v2306_v61 = vpop.f32.mrb[66].mxu1  ;;  %1794 = vmatmul.mubr.bf16.gmra.mrb[40].mxu0 %v1642_v18 }
 0x5e0   :  { %v4976_v49 = vpop.eup %4975  ;;  %v4081_v6 = vadd.f32 -1.0, %v4974_v31  ;;  %4987 = vtanh.f32 %v2303_v13  ;;  %v2307_v1 = vadd.f32 %v2306_v61, %v6202_v33  ;;  %v2308_v36 = vpop.f32.mrb[67].mxu1  ;;  %2643 = vmatpush1.bf16.msra.mxu0 %v4695_v44  ;;  %1803 = vmatprep.mubr.bf16.mxu0 %v5484_v21  ;;  %v4710_v61 = vld [vmem:[#allocation10 + $0x90] ss:$8 sps:$4 sm:$0xff]  }
 0x5e1   :  { %v4978_v38 = vpop.eup %4977  ;;  %v4084_v40 = vadd.f32 -1.0, %v4976_v49  ;;  %4989 = vtanh.f32 %v2305_v32  ;;  %v2309_v25 = vadd.f32 %v2308_v36, %v6208_v17  ;;  %2644 = vmatprep.subr.bf16.mxu0 %v4700_v26  ;;  %v6250_v58 = vsel %vm1538_vm10, %v6175_v15, %v4083_v56  ;;  %v4706_v15 = vld [vmem:[#allocation10 + $0x74] ss:$8 sps:$4 sm:$0xff]  }
 0x5e2   :  { %v4082_v52 = vadd.f32 -1.0, %v4978_v38  ;;  %4991 = vtanh.f32 %v2307_v1  ;;  %v1616_v41 = vsel %vm1536_vm11, %v6178_v28, %v4081_v6  ;;  %v4715_v6 = vld [vmem:[#allocation10 + $0xa4] ss:$8 sps:$4 sm:$0xff]  }
 0x5e3   :  { %4993 = vtanh.f32 %v2309_v25  ;;  %v6253_v3 = vsel %vm1539_vm12, %v6182_v50, %v4084_v40  ;;  %v4713_v25 = vld [vmem:[#allocation10 + $0xa0] ss:$8 sps:$4 sm:$0xff]  }
 0x5e4   :  { %v1617_v29 = vsel %vm1537_vm13, %v6187_v35, %v4082_v52  ;;  %v1645_v16 = vpack.c.bf16 %v6253_v3, %v6250_v58  ;;  %2645 = vmatpush1.bf16.msra.mxu0 %v4698_v47 }
 0x5e5   :  { %v2312_v48 = vpop.f32.mrb[68].mxu1  ;;  %v1644_v22 = vpack.c.bf16 %v1617_v29, %v1616_v41  ;;  %2646 = vmatprep.subr.bf16.mxu0 %v4703_v57  ;;  %v4718_v41 = vld [vmem:[#allocation10 + $0xb4] ss:$8 sps:$4 sm:$0xff]  }
 0x5e6   :  { %v4980_v14 = vpop.eup %4979  ;;  %v2313_v39 = vadd.f32 %v2312_v48, %v6202_v33  ;;  %v2314_v46 = vpop.f32.mrb[69].mxu1 }
 0x5e7   :  { %v4982_v63 = vpop.eup %4981  ;;  %v4087_v50 = vadd.f32 -1.0, %v4980_v14  ;;  %v2315_v53 = vadd.f32 %v2314_v46, %v6208_v17  ;;  %v2316_v28 = vpop.f32.mrb[70].mxu1  ;;  %1804 = vmatmul.mubr.bf16.gmra.mrb[44].mxu0 %v1643_v54  ;;  %v4716_v46 = vld [vmem:[#allocation10 + $0xb0] ss:$8 sps:$4 sm:$0xff]  }
 0x5e8   :  { %v4984_v43 = vpop.eup %4983  ;;  %v4085_v35 = vadd.f32 -1.0, %v4982_v63  ;;  %4995 = vtanh.f32 %v2313_v39  ;;  %v2317_v59 = vadd.f32 %v2316_v28, %v6202_v33  ;;  %v2318_v2 = vpop.f32.mrb[71].mxu1  ;;  %2647 = vmatpush1.bf16.msra.mxu0 %v4701_v24  ;;  %1813 = vmatprep.mubr.bf16.mxu0 %v5484_v21  ;;  %v4721_v63 = vld [vmem:[#allocation10 + $0xc4] ss:$8 sps:$4 sm:$0xff]  }
 0x5e9   :  { %v4986_v0 = vpop.eup %4985  ;;  %v4088_v4 = vadd.f32 -1.0, %v4984_v43  ;;  %4997 = vtanh.f32 %v2315_v53  ;;  %v2319_v9 = vadd.f32 %v2318_v2, %v6208_v17  ;;  %2648 = vmatprep.subr.bf16.mxu0 %v4706_v15  ;;  %v6275_v5 = vsel %vm1542_vm14, %v6199_v20, %v4087_v50  ;;  %v4707_v20 = vld [vmem:[#allocation10 + $0x80] ss:$8 sps:$4 sm:$0xff]  }
 0x5ea   :  { %v6265_v30 = vpop.eup %4987  ;;  %v4086_v12 = vadd.f32 -1.0, %v4986_v0  ;;  %4999 = vtanh.f32 %v2317_v59  ;;  %v6283_v11 = vsel %vm1540_vm15, %v6205_v51, %v4085_v35  ;;  %v4719_v53 = vld [vmem:[#allocation10 + $0xc0] ss:$8 sps:$4 sm:$0xff]   ;;  %v4724_v59 = vld [vmem:[#allocation10 + $0xd4] ss:$8 sps:$4 sm:$0xff]  }
 0x5eb   :  { %v6269_v19 = vpop.eup %4989  ;;  %5001 = vtanh.f32 %v2319_v9  ;;  %v6278_v8 = vsel %vm1543_vm0, %v6213_v34, %v4088_v4 }
 0x5ec   :  { %v6280_v42 = vpop.eup %4991  ;;  %v6286_v27 = vsel %vm1541_vm1, %v6220_v62, %v4086_v12  ;;  %v1647_v44 = vpack.c.bf16 %v6278_v8, %v6275_v5  ;;  %2649 = vmatpush1.bf16.msra.mxu0 %v4704_v23  ;;  %v4712_v62 = vld [vmem:[#allocation10 + $0x94] ss:$8 sps:$4 sm:$0xff]  }
 0x5ed   :  { %v6290_v10 = vpop.eup %4993  ;;  %v2322_v54 = vpop.f32.mrb[72].mxu1  ;;  %v1646_v34 = vpack.c.bf16 %v6286_v27, %v6283_v11  ;;  %v2445_v45 = vpack.c.bf16 %v6280_v42, %v6265_v30  ;;  %2650 = vmatprep.subr.bf16.mxu0 %v4709_v60  ;;  %v4722_v60 = vld [vmem:[#allocation10 + $0xd0] ss:$8 sps:$4 sm:$0xff]  }
 0x5ee   :  { %v2323_v51 = vadd.f32 %v2322_v54, %v6202_v33  ;;  %v2324_v13 = vpop.f32.mrb[73].mxu1  ;;  %v2446_v37 = vpack.c.bf16 %v6290_v10, %v6269_v19 }
 0x5ef   :  { %v2325_v18 = vadd.f32 %v2324_v13, %v6208_v17  ;;  %v2326_v26 = vpop.f32.mrb[74].mxu1  ;;  %1814 = vmatmul.mubr.bf16.gmra.mrb[48].mxu0 %v1644_v22  ;;  %v4725_v13 = vld [vmem:[#allocation10 + $0xe0] ss:$8 sps:$4 sm:$0xff]  }
 0x5f0   :  { %5003 = vtanh.f32 %v2323_v51  ;;  %v2327_v31 = vadd.f32 %v2326_v26, %v6202_v33  ;;  %v2328_v56 = vpop.f32.mrb[75].mxu1  ;;  %2651 = vmatpush1.bf16.msra.mxu0 %v4707_v20  ;;  %1823 = vmatprep.mubr.bf16.mxu0 %v5484_v21  ;;  %v4727_v20 = vld [vmem:[#allocation10 + $0xe4] ss:$8 sps:$4 sm:$0xff]   ;;  %v4730_v26 = vld [vmem:[#allocation10 + $0xf4] ss:$8 sps:$4 sm:$0xff]  }
 0x5f1   :  { %5005 = vtanh.f32 %v2325_v18  ;;  %v2329_v32 = vadd.f32 %v2328_v56, %v6208_v17  ;;  %2652 = vmatprep.subr.bf16.mxu0 %v4712_v62 }
 0x5f2   :  { %v6303_v49 = vpop.eup %4995  ;;  %5007 = vtanh.f32 %v2327_v31 }
 0x5f3   :  { %v6305_v1 = vpop.eup %4997  ;;  %5009 = vtanh.f32 %v2329_v32 }
 0x5f4   :  { %v6307_v36 = vpop.eup %4999  ;;  %2653 = vmatpush1.bf16.msra.mxu0 %v4710_v61 }
 0x5f5   :  { %v6309_v38 = vpop.eup %5001  ;;  %v2332_v40 = vpop.f32.mrb[76].mxu1  ;;  %v2447_v47 = vpack.c.bf16 %v6307_v36, %v6303_v49  ;;  %2654 = vmatprep.subr.bf16.mxu0 %v4715_v6 }
 0x5f6   :  { %v2333_v52 = vadd.f32 %v2332_v40, %v6202_v33  ;;  %v2334_v57 = vpop.f32.mrb[77].mxu1  ;;  %v2448_v29 = vpack.c.bf16 %v6309_v38, %v6305_v1 }
 0x5f7   :  { %v2335_v48 = vadd.f32 %v2334_v57, %v6208_v17  ;;  %v2336_v24 = vpop.f32.mrb[78].mxu1  ;;  %1824 = vmatmul.mubr.bf16.gmra.mrb[52].mxu0 %v1645_v16 }
 0x5f8   :  { %5011 = vtanh.f32 %v2333_v52  ;;  %v2337_v22 = vadd.f32 %v2336_v24, %v6202_v33  ;;  %v2338_v14 = vpop.f32.mrb[79].mxu1  ;;  %2655 = vmatpush1.bf16.msra.mxu0 %v4713_v25  ;;  %1833 = vmatprep.mubr.bf16.mxu0 %v5484_v21  ;;  %v4728_v25 = vld [vmem:[#allocation10 + $0xf0] ss:$8 sps:$4 sm:$0xff]  }
 0x5f9   :  { %5013 = vtanh.f32 %v2335_v48  ;;  %v2339_v39 = vadd.f32 %v2338_v14, %v6208_v17  ;;  %2656 = vmatprep.subr.bf16.mxu0 %v4718_v41 }
 0x5fa   :  { %v6323_v15 = vpop.eup %5003  ;;  %5015 = vtanh.f32 %v2337_v22 }
 0x5fb   :  { %v6325_v50 = vpop.eup %5005  ;;  %5017 = vtanh.f32 %v2339_v39 }
 0x5fc   :  { %v6327_v58 = vpop.eup %5007  ;;  %2657 = vmatpush1.bf16.msra.mxu0 %v4716_v46 }
 0x5fd   :  { %v6329_v3 = vpop.eup %5009  ;;  %v2342_v16 = vpop.f32.mrb[80].mxu1  ;;  %v2449_v28 = vpack.c.bf16 %v6327_v58, %v6323_v15  ;;  %2658 = vmatprep.subr.bf16.mxu0 %v4721_v63  ;;  %v4733_v15 = vld [vmem:[#allocation10 + $0x104] ss:$8 sps:$4 sm:$0xff]   ;;  %v4731_v58 = vld [vmem:[#allocation10 + $0x100] ss:$8 sps:$4 sm:$0xff]  }
 0x5fe   :  { %v2343_v43 = vadd.f32 %v2342_v16, %v6202_v33  ;;  %v2344_v35 = vpop.f32.mrb[81].mxu1  ;;  %v2450_v2 = vpack.c.bf16 %v6329_v3, %v6325_v50  ;;  %3161 = vmatprep.subr.bf16.mxu1 %v4733_v15  ;;  %v4736_v3 = vld [vmem:[#allocation10 + $0x114] ss:$8 sps:$4 sm:$0xff]  }
 0x5ff   :  { %v2345_v0 = vadd.f32 %v2344_v35, %v6208_v17  ;;  %v2346_v4 = vpop.f32.mrb[82].mxu1  ;;  %1834 = vmatmul.mubr.bf16.gmra.mrb[56].mxu0 %v1646_v34  ;;  %3162 = vmatpush1.bf16.msra.mxu1 %v4731_v58 }
 0x600   :  { %5019 = vtanh.f32 %v2343_v43  ;;  %v2347_v9 = vadd.f32 %v2346_v4, %v6202_v33  ;;  %v2348_v23 = vpop.f32.mrb[83].mxu1  ;;  %2659 = vmatpush1.bf16.msra.mxu0 %v4719_v53  ;;  %1843 = vmatprep.mubr.bf16.mxu0 %v5484_v21 }
 0x601   :  { %5021 = vtanh.f32 %v2345_v0  ;;  %v2349_v12 = vadd.f32 %v2348_v23, %v6208_v17  ;;  %2660 = vmatprep.subr.bf16.mxu0 %v4724_v59  ;;  %3163 = vmatprep.subr.bf16.mxu1 %v4736_v3 }
 0x602   :  { %v6343_v54 = vpop.eup %5011  ;;  %5023 = vtanh.f32 %v2347_v9 }
 0x603   :  { %v6345_v51 = vpop.eup %5013  ;;  %5025 = vtanh.f32 %v2349_v12 }
 0x604   :  { %v6347_v11 = vpop.eup %5015  ;;  %2661 = vmatpush1.bf16.msra.mxu0 %v4722_v60 }
 0x605   :  { %v6349_v27 = vpop.eup %5017  ;;  %v2352_v34 = vpop.f32.mrb[84].mxu1  ;;  %v2451_v62 = vpack.c.bf16 %v6347_v11, %v6343_v54  ;;  %2662 = vmatprep.subr.bf16.mxu0 %v4727_v20  ;;  %v4742_v54 = vld [vmem:[#allocation10 + $0x134] ss:$8 sps:$4 sm:$0xff]   ;;  %v4740_v11 = vld [vmem:[#allocation10 + $0x130] ss:$8 sps:$4 sm:$0xff]  }
 0x606   :  { %v2353_v21 = vadd.f32 %v2352_v34, %v6202_v33  ;;  %v2354_v18 = vpop.f32.mrb[85].mxu1  ;;  %v2452_v31 = vpack.c.bf16 %v6349_v27, %v6345_v51  ;;  %v4737_v51 = vld [vmem:[#allocation10 + $0x120] ss:$8 sps:$4 sm:$0xff]   ;;  %v4745_v27 = vld [vmem:[#allocation10 + $0x144] ss:$8 sps:$4 sm:$0xff]  }
 0x607   :  { %v2355_v56 = vadd.f32 %v2354_v18, %v6208_v17  ;;  %v2356_v32 = vpop.f32.mrb[86].mxu1  ;;  %1844 = vmatmul.mubr.bf16.gmra.mrb[60].mxu0 %v1647_v44  ;;  %v4743_v34 = vld [vmem:[#allocation10 + $0x140] ss:$8 sps:$4 sm:$0xff]  }
 0x608   :  { %5027 = vtanh.f32 %v2353_v21  ;;  %v2357_v61 = vadd.f32 %v2356_v32, %v6202_v33  ;;  %v2358_v6 = vpop.f32.mrb[87].mxu1  ;;  %2663 = vmatpush1.bf16.msra.mxu0 %v4725_v13  ;;  %2666 = vmatprep.mubr.bf16.mxu0 %v2446_v37  ;;  %v4748_v13 = vld [vmem:[#allocation10 + $0x154] ss:$8 sps:$4 sm:$0xff]   ;;  %v4751_v21 = vld [vmem:[#allocation10 + $0x164] ss:$8 sps:$4 sm:$0xff]  }
 0x609   :  { %5029 = vtanh.f32 %v2355_v56  ;;  %v2359_v40 = vadd.f32 %v2358_v6, %v6208_v17  ;;  %2664 = vmatprep.subr.bf16.mxu0 %v4730_v26  ;;  %v4749_v18 = vld [vmem:[#allocation10 + $0x160] ss:$8 sps:$4 sm:$0xff]   ;;  %v4754_v26 = vld [vmem:[#allocation10 + $0x174] ss:$8 sps:$4 sm:$0xff]   ;;  %v4757_v56 = vld [vmem:[#allocation10 + $0x184] ss:$8 sps:$4 sm:$0xff]  }
 0x60a   :  { %v5020_v52 = vpop.eup %5019  ;;  %5031 = vtanh.f32 %v2357_v61  ;;  %v4755_v32 = vld [vmem:[#allocation10 + $0x180] ss:$8 sps:$4 sm:$0xff]   ;;  %v4760_v61 = vld [vmem:[#allocation10 + $0x194] ss:$8 sps:$4 sm:$0xff]   ;;  %v4758_v6 = vld [vmem:[#allocation10 + $0x190] ss:$8 sps:$4 sm:$0xff]  }
 0x60b   :  { %v5022_v57 = vpop.eup %5021  ;;  %5033 = vtanh.f32 %v2359_v40  ;;  %v4763_v40 = vld [vmem:[#allocation10 + $0x1a4] ss:$8 sps:$4 sm:$0xff]  }
 0x60c   :  { %v5024_v41 = vpop.eup %5023  ;;  %2665 = vmatpush1.bf16.msra.mxu0 %v4728_v25  ;;  %v4761_v25 = vld [vmem:[#allocation10 + $0x1a0] ss:$8 sps:$4 sm:$0xff]  }
 0x60d   :  { %v5026_v5 = vpop.eup %5025  ;;  %v2362_v8 = vpop.f32.mrb[88].mxu1  ;;  %v2453_v44 = vpack.c.bf16 %v5024_v41, %v5020_v52  ;;  %v4766_v52 = vld [vmem:[#allocation10 + $0x1b4] ss:$8 sps:$4 sm:$0xff]   ;;  %v4769_v41 = vld [vmem:[#allocation10 + $0x1c4] ss:$8 sps:$4 sm:$0xff]  }
 0x60e   :  { %v2363_v48 = vadd.f32 %v2362_v8, %v6202_v33  ;;  %v2364_v24 = vpop.f32.mrb[89].mxu1  ;;  %v2454_v22 = vpack.c.bf16 %v5026_v5, %v5022_v57  ;;  %v4764_v57 = vld [vmem:[#allocation10 + $0x1b0] ss:$8 sps:$4 sm:$0xff]   ;;  %v4767_v5 = vld [vmem:[#allocation10 + $0x1c0] ss:$8 sps:$4 sm:$0xff]  }
 0x60f   :  { %v2365_v14 = vadd.f32 %v2364_v24, %v6208_v17  ;;  %v2366_v39 = vpop.f32.mrb[90].mxu1  ;;  %2667 = vmatmul.mubr.bf16.vlgmr.msra.gmra.mrb[64].mxu0 %v2445_v45  ;;  %v4772_v8 = vld [vmem:[#allocation10 + $0x1d4] ss:$8 sps:$4 sm:$0xff]   ;;  %v4773_v24 = vld [vmem:[#allocation10 + $0x1e0] ss:$8 sps:$4 sm:$0xff]  }
 0x610   :  { %5035 = vtanh.f32 %v2363_v48  ;;  %v2367_v19 = vadd.f32 %v2366_v39, %v6202_v33  ;;  %v2368_v10 = vpop.f32.mrb[91].mxu1  ;;  %2676 = vmatprep.mubr.bf16.mxu0 %v2448_v29  ;;  %v4775_v48 = vld [vmem:[#allocation10 + $0x1e4] ss:$8 sps:$4 sm:$0xff]   ;;  %v4089_v39 = vld [vmem:[%s7289_s9 + $0x5] ss:$8 sm:$0x3] }
 0x611   :  { %5037 = vtanh.f32 %v2365_v14  ;;  %v2369_v37 = vadd.f32 %v2368_v10, %v6208_v17  ;;  %v4776_v14 = vld [vmem:[#allocation10 + $0x1f0] ss:$8 sps:$4 sm:$0xff]   ;;  %v6398_v10 = vrot.slane %v4089_v39, %v6196_v55 }
 0x612   :  { %v5028_v46 = vpop.eup %5027  ;;  %5039 = vtanh.f32 %v2367_v19  ;;  %v6395_v19 = vrot.slane %v4089_v39, %v6189_v7 }
 0x613   :  { %v5030_v63 = vpop.eup %5029  ;;  %5041 = vtanh.f32 %v2369_v37 }
 0x614   :  { %v5032_v16 = vpop.eup %5031 }
 0x615   :  { %v5034_v53 = vpop.eup %5033  ;;  %v2372_v43 = vpop.f32.mrb[92].mxu1  ;;  %v2455_v35 = vpack.c.bf16 %v5032_v16, %v5028_v46 }
 0x616   :  { %v2373_v59 = vadd.f32 %v2372_v43, %v6202_v33  ;;  %v2374_v30 = vpop.f32.mrb[93].mxu1  ;;  %v2456_v42 = vpack.c.bf16 %v5034_v53, %v5030_v63 }
 0x617   :  { %v2375_v45 = vadd.f32 %v2374_v30, %v6208_v17  ;;  %v2376_v0 = vpop.f32.mrb[94].mxu1  ;;  %2677 = vmatmul.mubr.bf16.gmra.mrb[68].mxu0 %v2447_v47 }
 0x618   :  { %5043 = vtanh.f32 %v2373_v59  ;;  %v2377_v4 = vadd.f32 %v2376_v0, %v6202_v33  ;;  %v2378_v1 = vpop.f32.mrb[95].mxu1  ;;  %2686 = vmatprep.mubr.bf16.mxu0 %v2450_v2  ;;  %v4739_v2 = vld [vmem:[#allocation10 + $0x124] ss:$8 sps:$4 sm:$0xff]  }
 0x619   :  { %5045 = vtanh.f32 %v2375_v45  ;;  %v2379_v38 = vadd.f32 %v2378_v1, %v6208_v17 }
 0x61a   :  { %v5036_v29 = vpop.eup %5035  ;;  %5047 = vtanh.f32 %v2377_v4 }
 0x61b   :  { %v5038_v9 = vpop.eup %5037  ;;  %5049 = vtanh.f32 %v2379_v38 }
 0x61c   :  { %v5040_v23 = vpop.eup %5039 }
 0x61d   :  { %v5042_v12 = vpop.eup %5041  ;;  %v2457_v60 = vpack.c.bf16 %v5040_v23, %v5036_v29 }
 0x61e   :  { %v2458_v33 = vpack.c.bf16 %v5042_v12, %v5038_v9 }
 0x61f   :  { %2687 = vmatmul.mubr.bf16.gmra.mrb[72].mxu0 %v2449_v28  ;;  %v4734_v28 = vld [vmem:[#allocation10 + $0x110] ss:$8 sps:$4 sm:$0xff]  }
 0x620   :  { %2696 = vmatprep.mubr.bf16.mxu0 %v2452_v31  ;;  %3164 = vmatpush1.bf16.msra.mxu1 %v4734_v28  ;;  %v4752_v31 = vld [vmem:[#allocation10 + $0x170] ss:$8 sps:$4 sm:$0xff]  }
 0x621   :  { %3165 = vmatprep.subr.bf16.mxu1 %v4739_v2 }
 0x622   :  { %v5044_v49 = vpop.eup %5043 }
 0x623   :  { %v5046_v36 = vpop.eup %5045 }
 0x624   :  { %v5048_v17 = vpop.eup %5047  ;;  %3166 = vmatpush1.bf16.msra.mxu1 %v4737_v51 }
 0x625   :  { %v5050_v47 = vpop.eup %5049  ;;  %v2459_v20 = vpack.c.bf16 %v5048_v17, %v5044_v49  ;;  %3167 = vmatprep.subr.bf16.mxu1 %v4742_v54 }
 0x626   :  { %v2460_v50 = vpack.c.bf16 %v5050_v47, %v5046_v36 }
 0x627   :  { %2697 = vmatmul.mubr.bf16.gmra.mrb[76].mxu0 %v2451_v62  ;;  %v4746_v62 = vld [vmem:[#allocation10 + $0x150] ss:$8 sps:$4 sm:$0xff]  }
 0x628   :  { %2706 = vmatprep.mubr.bf16.mxu0 %v2454_v22  ;;  %3168 = vmatpush1.bf16.msra.mxu1 %v4740_v11  ;;  %v4778_v22 = vld [vmem:[#allocation10 + $0x1f4] ss:$8 sps:$4 sm:$0xff]  }
 0x629   :  { %3169 = vmatprep.subr.bf16.mxu1 %v4745_v27 }
 0x62c   :  { %3170 = vmatpush1.bf16.msra.mxu1 %v4743_v34 }
 0x62d   :  { %3171 = vmatprep.subr.bf16.mxu1 %v4748_v13 }
 0x62f   :  { %2707 = vmatmul.mubr.bf16.gmra.mrb[80].mxu0 %v2453_v44  ;;  %v4770_v44 = vld [vmem:[#allocation10 + $0x1d0] ss:$8 sps:$4 sm:$0xff]  }
 0x630   :  { %2716 = vmatprep.mubr.bf16.mxu0 %v2456_v42  ;;  %3172 = vmatpush1.bf16.msra.mxu1 %v4746_v62 }
 0x631   :  { %3173 = vmatprep.subr.bf16.mxu1 %v4751_v21 }
 0x634   :  { %3174 = vmatpush1.bf16.msra.mxu1 %v4749_v18 }
 0x635   :  { %3175 = vmatprep.subr.bf16.mxu1 %v4754_v26 }
 0x637   :  { %2717 = vmatmul.mubr.bf16.gmra.mrb[84].mxu0 %v2455_v35 }
 0x638   :  { %2726 = vmatprep.mubr.bf16.mxu0 %v2458_v33  ;;  %3176 = vmatpush1.bf16.msra.mxu1 %v4752_v31 }
 0x639   :  { %3177 = vmatprep.subr.bf16.mxu1 %v4757_v56 }
 0x63c   :  { %3178 = vmatpush1.bf16.msra.mxu1 %v4755_v32 }
 0x63d   :  { %3179 = vmatprep.subr.bf16.mxu1 %v4760_v61 }
 0x63f   :  { %2727 = vmatmul.mubr.bf16.gmra.mrb[88].mxu0 %v2457_v60 }
 0x640   :  { %2736 = vmatprep.mubr.bf16.mxu0 %v2460_v50  ;;  %3180 = vmatpush1.bf16.msra.mxu1 %v4758_v6 }
 0x641   :  { %3181 = vmatprep.subr.bf16.mxu1 %v4763_v40 }
 0x644   :  { %3182 = vmatpush1.bf16.msra.mxu1 %v4761_v25 }
 0x645   :  { %3183 = vmatprep.subr.bf16.mxu1 %v4766_v52 }
 0x647   :  { %2737 = vmatmul.mubr.bf16.gmra.mrb[92].mxu0 %v2459_v20 }
 0x648   :  { %3184 = vmatpush1.bf16.msra.mxu1 %v4764_v57 }
 0x649   :  { %3185 = vmatprep.subr.bf16.mxu1 %v4769_v41 }
 0x64c   :  { %3186 = vmatpush1.bf16.msra.mxu1 %v4767_v5 }
 0x64d   :  { %3187 = vmatprep.subr.bf16.mxu1 %v4772_v8 }
 0x650   :  { %3188 = vmatpush1.bf16.msra.mxu1 %v4770_v44 }
 0x651   :  { %3189 = vmatprep.subr.bf16.mxu1 %v4775_v48 }
 0x654   :  { %3190 = vmatpush1.bf16.msra.mxu1 %v4773_v24  ;;  %v5275_v24 = vld [vmem:[#allocation2] sm:$0xff] }
 0x655   :  { %3191 = vmatprep.subr.bf16.mxu1 %v4778_v22 }
 0x658   :  { %3192 = vmatpush1.bf16.msra.mxu1 %v4776_v14 }
 0x6a1   :  { %v1775_v37 = vpop.f32.mrb[32].mxu0 }
 0x6a2   :  { %v1776_v46 = vadd.f32 %v1775_v37, %v6395_v19  ;;  %v1777_v63 = vpop.f32.mrb[33].mxu0 }
 0x6a3   :  { %v1778_v16 = vadd.f32 %v1777_v63, %v6398_v10  ;;  %v1779_v53 = vpop.f32.mrb[34].mxu0 }
 0x6a4   :  { %v1854_v43 = vmul.f32 0.5, %v1776_v46  ;;  %v1780_v35 = vadd.f32 %v1779_v53, %v6395_v19  ;;  %v1781_v59 = vpop.f32.mrb[35].mxu0  ;;  %v5276_v46 = vld [vmem:[#allocation2 + $0x8] sm:$0xff] }
 0x6a5   :  { %v1855_v30 = vmul.f32 0.5, %v1778_v16  ;;  %v1782_v42 = vadd.f32 %v1781_v59, %v6398_v10 }
 0x6a6   :  { %5051 = vtanh.f32 %v1854_v43  ;;  %v1856_v45 = vmul.f32 0.5, %v1780_v35 }
 0x6a7   :  { %5053 = vtanh.f32 %v1855_v30  ;;  %v1857_v0 = vmul.f32 0.5, %v1782_v42 }
 0x6a8   :  { %5055 = vtanh.f32 %v1856_v45 }
 0x6a9   :  { %5057 = vtanh.f32 %v1857_v0  ;;  %v1785_v4 = vpop.f32.mrb[36].mxu0 }
 0x6aa   :  { %v1786_v1 = vadd.f32 %v1785_v4, %v6395_v19  ;;  %v1787_v38 = vpop.f32.mrb[37].mxu0 }
 0x6ab   :  { %v1788_v29 = vadd.f32 %v1787_v38, %v6398_v10  ;;  %v1789_v9 = vpop.f32.mrb[38].mxu0 }
 0x6ac   :  { %v1858_v23 = vmul.f32 0.5, %v1786_v1  ;;  %v1790_v12 = vadd.f32 %v1789_v9, %v6395_v19  ;;  %v1791_v60 = vpop.f32.mrb[39].mxu0 }
 0x6ad   :  { %v1859_v33 = vmul.f32 0.5, %v1788_v29  ;;  %v1792_v49 = vadd.f32 %v1791_v60, %v6398_v10 }
 0x6ae   :  { %5059 = vtanh.f32 %v1858_v23  ;;  %v1860_v36 = vmul.f32 0.5, %v1790_v12 }
 0x6af   :  { %5061 = vtanh.f32 %v1859_v33  ;;  %v1861_v17 = vmul.f32 0.5, %v1792_v49 }
 0x6b0   :  { %v5052_v47 = vpop.eup %5051  ;;  %5063 = vtanh.f32 %v1860_v36 }
 0x6b1   :  { %v5054_v20 = vpop.eup %5053  ;;  %v1918_v50 = vadd.f32 1.0, %v5052_v47  ;;  %5065 = vtanh.f32 %v1861_v17 }
 0x6b2   :  { %v5056_v15 = vpop.eup %5055  ;;  %v1919_v58 = vadd.f32 1.0, %v5054_v20  ;;  %v1795_v3 = vpop.f32.mrb[40].mxu0 }
 0x6b3   :  { %v5058_v28 = vpop.eup %5057  ;;  %v1950_v2 = vmul.f32 0.5, %v1918_v50  ;;  %v1920_v51 = vadd.f32 1.0, %v5056_v15  ;;  %v1796_v54 = vadd.f32 %v1795_v3, %v6395_v19  ;;  %v1797_v11 = vpop.f32.mrb[41].mxu0 }
 0x6b4   :  { %v1951_v27 = vmul.f32 0.5, %v1919_v58  ;;  %v1921_v34 = vadd.f32 1.0, %v5058_v28  ;;  %v1798_v13 = vadd.f32 %v1797_v11, %v6398_v10  ;;  %v1799_v62 = vpop.f32.mrb[42].mxu0  ;;  %v5277_v58 = vld [vmem:[#allocation2 + $0x10] sm:$0xff]  ;;  %v5278_v11 = vld [vmem:[#allocation2 + $0x18] sm:$0xff] }
 0x6b5   :  { %v1982_v21 = vmax.f32 %v1950_v2, 1e-08  ;;  %v1952_v18 = vmul.f32 0.5, %v1920_v51  ;;  %v1862_v26 = vmul.f32 0.5, %v1796_v54  ;;  %v1800_v31 = vadd.f32 %v1799_v62, %v6395_v19  ;;  %v1801_v56 = vpop.f32.mrb[43].mxu0 }
 0x6b6   :  { %v1983_v32 = vmax.f32 %v1951_v27, 1e-08  ;;  %v1953_v61 = vmul.f32 0.5, %v1921_v34  ;;  %v1863_v6 = vmul.f32 0.5, %v1798_v13  ;;  %v1802_v40 = vadd.f32 %v1801_v56, %v6398_v10 }
 0x6b7   :  { %v2014_v25 = vmin.f32 %v1982_v21, 1.0  ;;  %5067 = vtanh.f32 %v1862_v26  ;;  %v1864_v52 = vmul.f32 0.5, %v1800_v31  ;;  %v1984_v5 = vmax.f32 %v1952_v18, 1e-08 }
 0x6b8   :  { %v5060_v57 = vpop.eup %5059  ;;  %v2015_v41 = vmin.f32 %v1983_v32, 1.0  ;;  %5069 = vtanh.f32 %v1863_v6  ;;  %v1865_v8 = vmul.f32 0.5, %v1802_v40  ;;  %v1985_v14 = vmax.f32 %v1953_v61, 1e-08 }
 0x6b9   :  { %v5062_v44 = vpop.eup %5061  ;;  %v1922_v48 = vadd.f32 1.0, %v5060_v57  ;;  %5071 = vtanh.f32 %v1864_v52  ;;  %v2046_v22 = vsub.f32 %v2014_v25, %v5275_v24  ;;  %v2016_v59 = vmin.f32 %v1984_v5, 1.0  ;;  %v5279_v24 = vld [vmem:[#allocation2 + $0x20] sm:$0xff] }
 0x6ba   :  { %v1923_v39 = vadd.f32 1.0, %v5062_v44  ;;  %5073 = vtanh.f32 %v1865_v8  ;;  %v1805_v37 = vpop.f32.mrb[44].mxu0  ;;  %v2047_v63 = vsub.f32 %v2015_v41, %v5276_v46  ;;  %v5064_v35 = vpop.eup %5063  ;;  %v2017_v23 = vmin.f32 %v1985_v14, 1.0 }
 0x6bb   :  { %v1954_v16 = vmul.f32 0.5, %v1922_v48  ;;  %v1806_v53 = vadd.f32 %v1805_v37, %v6395_v19  ;;  %v1807_v43 = vpop.f32.mrb[45].mxu0  ;;  %v2078_v45 = vmul.f32 %v2046_v22, %v2046_v22  ;;  %v5066_v0 = vpop.eup %5065  ;;  %v1924_v49 = vadd.f32 1.0, %v5064_v35  ;;  %v5280_v35 = vld [vmem:[#allocation2 + $0x28] sm:$0xff] }
 0x6bc   :  { %v1808_v30 = vadd.f32 %v1807_v43, %v6398_v10  ;;  %v1809_v42 = vpop.f32.mrb[46].mxu0  ;;  %v1955_v4 = vmul.f32 0.5, %v1923_v39  ;;  %v2079_v9 = vmul.f32 %v2047_v63, %v2047_v63  ;;  %v1925_v17 = vadd.f32 1.0, %v5066_v0 }
 0x6bd   :  { %v1866_v1 = vmul.f32 0.5, %v1806_v53  ;;  %v1810_v38 = vadd.f32 %v1809_v42, %v6395_v19  ;;  %v1811_v29 = vpop.f32.mrb[47].mxu0  ;;  %v1986_v12 = vmax.f32 %v1954_v16, 1e-08  ;;  %v2048_v3 = vsub.f32 %v2016_v59, %v5277_v58 }
 0x6be   :  { %v1867_v60 = vmul.f32 0.5, %v1808_v30  ;;  %v1812_v33 = vadd.f32 %v1811_v29, %v6398_v10  ;;  %v1987_v50 = vmax.f32 %v1955_v4, 1e-08  ;;  %v2110_v15 = vadd.f32 %v2079_v9, %v2078_v45 }
 0x6bf   :  { %5075 = vtanh.f32 %v1866_v1  ;;  %v1868_v36 = vmul.f32 0.5, %v1810_v38  ;;  %v2018_v2 = vmin.f32 %v1986_v12, 1.0  ;;  %v2049_v27 = vsub.f32 %v2017_v23, %v5278_v11 }
 0x6c0   :  { %5077 = vtanh.f32 %v1867_v60  ;;  %v1869_v47 = vmul.f32 0.5, %v1812_v33  ;;  %v1956_v13 = vmul.f32 0.5, %v1924_v49  ;;  %2111 = vadd.xlane.f32.xlu0 %v2110_v15  ;;  %v2080_v26 = vmul.f32 %v2048_v3, %v2048_v3 }
 0x6c1   :  { %v5068_v20 = vpop.eup %5067  ;;  %5079 = vtanh.f32 %v1868_v36  ;;  %v1957_v56 = vmul.f32 0.5, %v1925_v17  ;;  %v2081_v6 = vmul.f32 %v2049_v27, %v2049_v27  ;;  %v2019_v25 = vmin.f32 %v1987_v50, 1.0 }
 0x6c2   :  { %v5070_v28 = vpop.eup %5069  ;;  %v1926_v51 = vadd.f32 1.0, %v5068_v20  ;;  %5081 = vtanh.f32 %v1869_v47  ;;  %v1815_v54 = vpop.f32.mrb[48].mxu0  ;;  %v2050_v22 = vsub.f32 %v2018_v2, %v5279_v24  ;;  %v1988_v53 = vmax.f32 %v1956_v13, 1e-08 }
 0x6c3   :  { %v5072_v34 = vpop.eup %5071  ;;  %v1927_v62 = vadd.f32 1.0, %v5070_v28  ;;  %v1816_v21 = vadd.f32 %v1815_v54, %v6395_v19  ;;  %v1817_v18 = vpop.f32.mrb[49].mxu0  ;;  %v2113_v48 = vadd.f32 %v2081_v6, %v2080_v26  ;;  %v1989_v43 = vmax.f32 %v1957_v56, 1e-08 }
 0x6c4   :  { %v5074_v31 = vpop.eup %5073  ;;  %v1928_v32 = vadd.f32 1.0, %v5072_v34  ;;  %v1818_v61 = vadd.f32 %v1817_v18, %v6398_v10  ;;  %v1819_v40 = vpop.f32.mrb[50].mxu0  ;;  %v1958_v8 = vmul.f32 0.5, %v1926_v51  ;;  %v2051_v59 = vsub.f32 %v2019_v25, %v5280_v35 }
 0x6c5   :  { %v1929_v52 = vadd.f32 1.0, %v5074_v31  ;;  %v1870_v57 = vmul.f32 0.5, %v1816_v21  ;;  %v1820_v41 = vadd.f32 %v1819_v40, %v6395_v19  ;;  %v1821_v5 = vpop.f32.mrb[51].mxu0  ;;  %v1959_v14 = vmul.f32 0.5, %v1927_v62  ;;  %2114 = vadd.xlane.f32.xlu1 %v2113_v48 }
 0x6c6   :  { %v1871_v44 = vmul.f32 0.5, %v1818_v61  ;;  %v1960_v37 = vmul.f32 0.5, %v1928_v32  ;;  %v1822_v63 = vadd.f32 %v1821_v5, %v6398_v10  ;;  %v1990_v42 = vmax.f32 %v1958_v8, 1e-08  ;;  %v5281_v61 = vld [vmem:[#allocation2 + $0x30] sm:$0xff] }
 0x6c7   :  { %5083 = vtanh.f32 %v1870_v57  ;;  %v1872_v39 = vmul.f32 0.5, %v1820_v41  ;;  %v1961_v46 = vmul.f32 0.5, %v1929_v52  ;;  %v2082_v4 = vmul.f32 %v2050_v22, %v2050_v22  ;;  %v5282_v57 = vld [vmem:[#allocation2 + $0x38] sm:$0xff] }
 0x6c8   :  { %5085 = vtanh.f32 %v1871_v44  ;;  %v1873_v0 = vmul.f32 0.5, %v1822_v63  ;;  %v1991_v29 = vmax.f32 %v1959_v14, 1e-08  ;;  %v2083_v23 = vmul.f32 %v2051_v59, %v2051_v59  ;;  %v5285_v59 = vld [vmem:[#allocation2 + $0x50] sm:$0xff] }
 0x6c9   :  { %v5076_v16 = vpop.eup %5075  ;;  %5087 = vtanh.f32 %v1872_v39  ;;  %v1992_v49 = vmax.f32 %v1960_v37, 1e-08  ;;  %v1993_v36 = vmax.f32 %v1961_v46, 1e-08  ;;  %v2020_v20 = vmin.f32 %v1988_v53, 1.0  ;;  %v5283_v46 = vld [vmem:[#allocation2 + $0x40] sm:$0xff] }
 0x6ca   :  { %v5078_v30 = vpop.eup %5077  ;;  %v1930_v45 = vadd.f32 1.0, %v5076_v16  ;;  %v1825_v1 = vpop.f32.mrb[52].mxu0  ;;  %5089 = vtanh.f32 %v1873_v0  ;;  %v2116_v58 = vadd.f32 %v2083_v23, %v2082_v4  ;;  %v2021_v28 = vmin.f32 %v1989_v43, 1.0  ;;  %v5284_v53 = vld [vmem:[#allocation2 + $0x48] sm:$0xff] }
 0x6cb   :  { %v5080_v38 = vpop.eup %5079  ;;  %v1931_v9 = vadd.f32 1.0, %v5078_v30  ;;  %v1826_v12 = vadd.f32 %v1825_v1, %v6395_v19  ;;  %v1827_v60 = vpop.f32.mrb[53].mxu0  ;;  %v2022_v11 = vmin.f32 %v1990_v42, 1.0  ;;  %v2023_v13 = vmin.f32 %v1991_v29, 1.0 }
 0x6cc   :  { %v5082_v33 = vpop.eup %5081  ;;  %v1828_v17 = vadd.f32 %v1827_v60, %v6398_v10  ;;  %v1829_v47 = vpop.f32.mrb[54].mxu0  ;;  %v1962_v50 = vmul.f32 0.5, %v1930_v45  ;;  %v1932_v15 = vadd.f32 1.0, %v5080_v38  ;;  %2117 = vadd.xlane.f32.xlu0 %v2116_v58  ;;  %v2024_v62 = vmin.f32 %v1992_v49, 1.0 }
 0x6cd   :  { %v1831_v3 = vpop.f32.mrb[55].mxu0  ;;  %v1963_v2 = vmul.f32 0.5, %v1931_v9  ;;  %v1874_v51 = vmul.f32 0.5, %v1826_v12  ;;  %v1830_v54 = vadd.f32 %v1829_v47, %v6395_v19  ;;  %v1933_v27 = vadd.f32 1.0, %v5082_v33  ;;  %v5286_v33 = vld [vmem:[#allocation2 + $0x58] sm:$0xff] }
 0x6ce   :  { %v1875_v34 = vmul.f32 0.5, %v1828_v17  ;;  %v2025_v21 = vmin.f32 %v1993_v36, 1.0  ;;  %v1832_v18 = vadd.f32 %v1831_v3, %v6398_v10  ;;  %v1994_v31 = vmax.f32 %v1962_v50, 1e-08 }
 0x6cf   :  { %v6424_v56 = vmul.f32 0.5, %v1932_v15  ;;  %v1876_v32 = vmul.f32 0.5, %v1830_v54  ;;  %v2052_v6 = vsub.f32 %v2020_v20, %v5281_v61  ;;  %v1995_v25 = vmax.f32 %v1963_v2, 1e-08 }
 0x6d0   :  { %5091 = vtanh.f32 %v1874_v51  ;;  %v2053_v41 = vsub.f32 %v2021_v28, %v5282_v57  ;;  %v1965_v44 = vmul.f32 0.5, %v1933_v27  ;;  %v1877_v39 = vmul.f32 0.5, %v1832_v18  ;;  %v6431_v15 = vld [vmem:[%s7289_s9 + $0x7] ss:$8 sm:$0x3] }
 0x6d1   :  { %v5084_v26 = vpop.eup %5083  ;;  %5093 = vtanh.f32 %v1875_v34  ;;  %v2084_v24 = vmul.f32 %v2052_v6, %v2052_v6  ;;  %v2054_v63 = vsub.f32 %v2022_v11, %v5283_v46  ;;  %v2055_v43 = vsub.f32 %v2023_v13, %v5284_v53 }
 0x6d2   :  { %v5086_v40 = vpop.eup %5085  ;;  %v1934_v52 = vadd.f32 1.0, %v5084_v26  ;;  %v1835_v5 = vpop.f32.mrb[56].mxu0  ;;  %v2085_v37 = vmul.f32 %v2053_v41, %v2053_v41  ;;  %5095 = vtanh.f32 %v1876_v32  ;;  %v2056_v30 = vsub.f32 %v2024_v62, %v5285_v59  ;;  %v5287_v26 = vld [vmem:[#allocation2 + $0x60] sm:$0xff]  ;;  %v5290_v59 = vld [vmem:[#allocation2 + $0x78] sm:$0xff] }
 0x6d3   :  { %v5088_v8 = vpop.eup %5087  ;;  %v1935_v48 = vadd.f32 1.0, %v5086_v40  ;;  %v1837_v22 = vpop.f32.mrb[57].mxu0  ;;  %v1836_v35 = vadd.f32 %v1835_v5, %v6395_v19  ;;  %v2086_v38 = vmul.f32 %v2054_v63, %v2054_v63  ;;  %v2026_v29 = vmin.f32 %v1994_v31, 1.0 }
 0x6d4   :  { %v1936_v14 = vadd.f32 1.0, %v5088_v8  ;;  %v1839_v16 = vpop.f32.mrb[58].mxu0  ;;  %v5090_v45 = vpop.eup %5089  ;;  %v1966_v0 = vmul.f32 0.5, %v1934_v52  ;;  %v2119_v1 = vadd.f32 %v2085_v37, %v2084_v24  ;;  %v2087_v12 = vmul.f32 %v2055_v43, %v2055_v43  ;;  %v5289_v43 = vld [vmem:[#allocation2 + $0x70] sm:$0xff] }
 0x6d5   :  { %v1841_v42 = vpop.f32.mrb[59].mxu0  ;;  %v1967_v4 = vmul.f32 0.5, %v1935_v48  ;;  %v1937_v23 = vadd.f32 1.0, %v5090_v45  ;;  %5097 = vtanh.f32 %v1877_v39  ;;  %v1878_v60 = vmul.f32 0.5, %v1836_v35 }
 0x6d6   :  { %v1968_v9 = vmul.f32 0.5, %v1936_v14  ;;  %2120 = vadd.xlane.f32.xlu0 %v2119_v1  ;;  %v2057_v49 = vsub.f32 %v2025_v21, %v5286_v33  ;;  %v2088_v36 = vmul.f32 %v2056_v30, %v2056_v30  ;;  %v2027_v17 = vmin.f32 %v1995_v25, 1.0 }
 0x6d7   :  { %v1996_v47 = vmax.f32 %v6424_v56, 1e-08  ;;  %v1997_v20 = vmax.f32 %v1965_v44, 1e-08  ;;  %v2122_v50 = vadd.f32 %v2087_v12, %v2086_v38  ;;  %v1998_v58 = vmax.f32 %v1966_v0, 1e-08 }
 0x6d8   :  { %v1999_v3 = vmax.f32 %v1967_v4, 1e-08  ;;  %v2089_v28 = vmul.f32 %v2057_v49, %v2057_v49  ;;  %v1838_v2 = vadd.f32 %v1837_v22, %v6398_v10  ;;  %v2000_v54 = vmax.f32 %v1968_v9, 1e-08  ;;  %v5288_v44 = vld [vmem:[#allocation2 + $0x68] sm:$0xff] }
 0x6d9   :  { %v1969_v11 = vmul.f32 0.5, %v1937_v23  ;;  %2123 = vadd.xlane.f32.xlu1 %v2122_v50  ;;  %v1840_v27 = vadd.f32 %v1839_v16, %v6395_v19  ;;  %v1842_v34 = vadd.f32 %v1841_v42, %v6398_v10  ;;  %5099 = vtanh.f32 %v1878_v60 }
 0x6da   :  { %v1845_v51 = vpop.f32.mrb[60].mxu0  ;;  %v5092_v62 = vpop.eup %5091  ;;  %v2125_v21 = vadd.f32 %v2089_v28, %v2088_v36  ;;  %v1879_v18 = vmul.f32 0.5, %v1838_v2  ;;  %v2058_v31 = vsub.f32 %v2026_v29, %v5287_v26  ;;  %v2028_v40 = vmin.f32 %v1996_v47, 1.0  ;;  %v5292_v28 = vld [vmem:[#allocation2 + $0x88] sm:$0xff] }
 0x6db   :  { %v1847_v13 = vpop.f32.mrb[61].mxu0  ;;  %v5094_v32 = vpop.eup %5093  ;;  %v1880_v61 = vmul.f32 0.5, %v1840_v27  ;;  %v2029_v25 = vmin.f32 %v1997_v20, 1.0  ;;  %v2030_v52 = vmin.f32 %v1998_v58, 1.0  ;;  %v6438_v57 = vrot.slane %v6431_v15, %v6189_v7  ;;  %v5291_v58 = vld [vmem:[#allocation2 + $0x80] sm:$0xff] }
 0x6dc   :  { %v1849_v56 = vpop.f32.mrb[62].mxu0  ;;  %2126 = vadd.xlane.f32.xlu0 %v2125_v21  ;;  %v5096_v41 = vpop.eup %5095  ;;  %v2031_v5 = vmin.f32 %v1999_v3, 1.0  ;;  %5101 = vtanh.f32 %v1879_v18  ;;  %v1881_v8 = vmul.f32 0.5, %v1842_v34  ;;  %v2059_v48 = vsub.f32 %v2027_v17, %v5288_v44 }
 0x6dd   :  { %v1851_v6 = vpop.f32.mrb[63].mxu0  ;;  %v2032_v24 = vmin.f32 %v2000_v54, 1.0  ;;  %v2001_v22 = vmax.f32 %v1969_v11, 1e-08  ;;  %v1938_v14 = vadd.f32 1.0, %v5092_v62  ;;  %v2090_v39 = vmul.f32 %v2058_v31, %v2058_v31  ;;  %v5293_v11 = vld [vmem:[#allocation2 + $0x90] sm:$0xff] }
 0x6de   :  { %v1939_v37 = vadd.f32 1.0, %v5094_v32  ;;  %5103 = vtanh.f32 %v1880_v61  ;;  %v2091_v46 = vmul.f32 %v2059_v48, %v2059_v48  ;;  %v1846_v63 = vadd.f32 %v1845_v51, %v6395_v19 }
 0x6df   :  { %v5098_v16 = vpop.eup %5097  ;;  %v1940_v53 = vadd.f32 1.0, %v5096_v41  ;;  %v2060_v35 = vsub.f32 %v2028_v40, %v5289_v43  ;;  %v2061_v30 = vsub.f32 %v2029_v25, %v5290_v59  ;;  %v1848_v42 = vadd.f32 %v1847_v13, %v6398_v10 }
 0x6e0   :  { %5105 = vtanh.f32 %v1881_v8  ;;  %v2128_v0 = vadd.f32 %v2091_v46, %v2090_v39  ;;  %v1882_v4 = vmul.f32 0.5, %v1846_v63  ;;  %v1850_v1 = vadd.f32 %v1849_v56, %v6395_v19 }
 0x6e1   :  { %v2033_v29 = vmin.f32 %v2001_v22, 1.0  ;;  %v1970_v9 = vmul.f32 0.5, %v1938_v14  ;;  %v2092_v23 = vmul.f32 %v2060_v35, %v2060_v35  ;;  %v2093_v12 = vmul.f32 %v2061_v30, %v2061_v30 }
 0x6e2   :  { %v2668_v45 = vpop.f32.mrb[64].mxu0  ;;  %v1971_v33 = vmul.f32 0.5, %v1939_v37  ;;  %v1941_v49 = vadd.f32 1.0, %v5098_v16  ;;  %2129 = vadd.xlane.f32.xlu1 %v2128_v0  ;;  %5107 = vtanh.f32 %v1882_v4  ;;  %v1883_v36 = vmul.f32 0.5, %v1848_v42 }
 0x6e3   :  { %v2670_v38 = vpop.f32.mrb[65].mxu0  ;;  %v5100_v47 = vpop.eup %5099  ;;  %v2131_v20 = vadd.f32 %v2093_v12, %v2092_v23  ;;  %v1852_v50 = vadd.f32 %v1851_v6, %v6398_v10  ;;  %v2062_v3 = vsub.f32 %v2030_v52, %v5291_v58  ;;  %v2063_v19 = vsub.f32 %v2031_v5, %v5292_v28  ;;  %v5294_v6 = vld [vmem:[#allocation2 + $0x98] sm:$0xff]  ;;  %v5295_v23 = vld [vmem:[#allocation2 + $0xa0] sm:$0xff] }
 0x6e4   :  { %v2672_v60 = vpop.f32.mrb[66].mxu0  ;;  %v1972_v2 = vmul.f32 0.5, %v1940_v53  ;;  %v1884_v51 = vmul.f32 0.5, %v1850_v1  ;;  %v6445_v54 = vadd.f32 %v2668_v45, %v6438_v57  ;;  %v2064_v27 = vsub.f32 %v2032_v24, %v5293_v11 }
 0x6e5   :  { %v2674_v17 = vpop.f32.mrb[67].mxu0  ;;  %v2002_v34 = vmax.f32 %v1970_v9, 1e-08  ;;  %2132 = vadd.xlane.f32.xlu0 %v2131_v20  ;;  %v2094_v13 = vmul.f32 %v2062_v3, %v2062_v3  ;;  %v2095_v62 = vmul.f32 %v2063_v19, %v2063_v19  ;;  %v6449_v21 = vrot.slane %v6431_v15, %v6196_v55 }
 0x6e6   :  { %v5102_v10 = vpop.eup %5101  ;;  %v2003_v18 = vmax.f32 %v1971_v33, 1e-08  ;;  %v1973_v26 = vmul.f32 0.5, %v1941_v49  ;;  %v1942_v31 = vadd.f32 1.0, %v5100_v47  ;;  %v2779_v56 = vmin.f32 %v6445_v54, 0.0 }
 0x6e7   :  { %5109 = vtanh.f32 %v1883_v36  ;;  %v1885_v32 = vmul.f32 0.5, %v1852_v50  ;;  %v2134_v61 = vadd.f32 %v2095_v62, %v2094_v13  ;;  %v2065_v40 = vsub.f32 %v2033_v29, %v5294_v6  ;;  %v5296_v36 = vld [vmem:[#allocation2 + $0xa8] sm:$0xff]  ;;  %v5297_v62 = vld [vmem:[#allocation2 + $0xb0] sm:$0xff]  ;;  %v5298_v6 = vld [vmem:[#allocation2 + $0xb8] sm:$0xff] }
 0x6e8   :  { %v5104_v52 = vpop.eup %5103  ;;  %v2004_v41 = vmax.f32 %v1972_v2, 1e-08  ;;  %5111 = vtanh.f32 %v1884_v51  ;;  %v2811_v5 = vmul.f32 1.442695, %v2779_v56  ;;  %v2096_v8 = vmul.f32 %v2064_v27, %v2064_v27 }
 0x6e9   :  { %v1943_v15 = vadd.f32 1.0, %v5102_v10  ;;  %2135 = vadd.xlane.f32.xlu1 %v2134_v61  ;;  %v2097_v48 = vmul.f32 %v2065_v40, %v2065_v40  ;;  %v6455_v24 = vadd.f32 %v2670_v38, %v6449_v21  ;;  %v6458_v22 = vadd.f32 %v2672_v60, %v6438_v57 }
 0x6ea   :  { %v2678_v25 = vpop.f32.mrb[68].mxu0  ;;  %v5106_v39 = vpop.eup %5105  ;;  %v2034_v37 = vmin.f32 %v2002_v34, 1.0  ;;  %v2035_v46 = vmin.f32 %v2003_v18, 1.0  ;;  %v1974_v63 = vmul.f32 0.5, %v1942_v31  ;;  %v6463_v16 = vadd.f32 %v2674_v17, %v6449_v21 }
 0x6eb   :  { %v6452_v44 = vpop.f32.mrb[69].mxu0  ;;  %v1944_v43 = vadd.f32 1.0, %v5104_v52  ;;  %5113 = vtanh.f32 %v1885_v32  ;;  %v2137_v35 = vadd.f32 %v2097_v48, %v2096_v8  ;;  %v2780_v59 = vmin.f32 %v6455_v24, 0.0 }
 0x6ec   :  { %v6460_v14 = vpop.f32.mrb[70].mxu0  ;;  %v5108_v30 = vpop.eup %5107  ;;  %v2005_v42 = vmax.f32 %v1973_v26, 1e-08  ;;  %5115 = vpow2.f32 %v2811_v5  ;;  %v2781_v45 = vmin.f32 %v6458_v22, 0.0  ;;  %v2036_v0 = vmin.f32 %v2004_v41, 1.0 }
 0x6ed   :  { %v6465_v53 = vpop.f32.mrb[71].mxu0  ;;  %v1975_v4 = vmul.f32 0.5, %v1943_v15  ;;  %v1945_v1 = vadd.f32 1.0, %v5106_v39  ;;  %2138 = vadd.xlane.f32.xlu0 %v2137_v35  ;;  %v2006_v38 = vmax.f32 %v1974_v63, 1e-08  ;;  %v2782_v9 = vmin.f32 %v6463_v16, 0.0 }
 0x6ee   :  { %v2815_v29 = vmul.f32 1.442695, %v2781_v45  ;;  %v2066_v12 = vsub.f32 %v2034_v37, %v5295_v23  ;;  %v1976_v60 = vmul.f32 0.5, %v1944_v43  ;;  %v1946_v33 = vadd.f32 1.0, %v5108_v30  ;;  %v5299_v23 = vld [vmem:[#allocation2 + $0xc0] sm:$0xff] }
 0x6ef   :  { %v2813_v49 = vmul.f32 1.442695, %v2780_v59  ;;  %v2067_v17 = vsub.f32 %v2035_v46, %v5296_v36  ;;  %v2037_v20 = vmin.f32 %v2005_v42, 1.0  ;;  %v2817_v50 = vmul.f32 1.442695, %v2782_v9 }
 0x6f0   :  { %5117 = vpow2.f32 %v2815_v29  ;;  %v2098_v58 = vmul.f32 %v2066_v12, %v2066_v12  ;;  %v2007_v19 = vmax.f32 %v1975_v4, 1e-08  ;;  %v6474_v2 = vmul.f32 0.5, %v1945_v1 }
 0x6f1   :  { %v5110_v28 = vpop.eup %5109  ;;  %v2099_v51 = vmul.f32 %v2067_v17, %v2067_v17  ;;  %v2038_v34 = vmin.f32 %v2006_v38, 1.0  ;;  %v6479_v13 = vadd.f32 %v2678_v25, %v6438_v57  ;;  %v2068_v10 = vsub.f32 %v2036_v0, %v5297_v62 }
 0x6f2   :  { %v6470_v47 = vpop.f32.mrb[72].mxu0  ;;  %v5112_v27 = vpop.eup %5111  ;;  %v2008_v26 = vmax.f32 %v1976_v60, 1e-08  ;;  %v6483_v31 = vmul.f32 0.5, %v1946_v33  ;;  %5119 = vpow2.f32 %v2813_v49  ;;  %v1947_v32 = vadd.f32 1.0, %v5110_v28  ;;  %v5300_v60 = vld [vmem:[#allocation2 + $0xc8] sm:$0xff] }
 0x6f3   :  { %v6472_v3 = vpop.f32.mrb[73].mxu0  ;;  %v2140_v56 = vadd.f32 %v2099_v51, %v2098_v58  ;;  %vm2747_vm2 = vcmp.gt.f32.partialorder %v6445_v54, 0.0  ;;  %5121 = vpow2.f32 %v2817_v50  ;;  %v2783_v61 = vmin.f32 %v6479_v13, 0.0 }
 0x6f4   :  { %v6476_v11 = vpop.f32.mrb[74].mxu0  ;;  %v2069_v40 = vsub.f32 %v2037_v20, %v5298_v6  ;;  %v2039_v25 = vmin.f32 %v2007_v19, 1.0  ;;  %v2009_v41 = vmax.f32 %v6474_v2, 1e-08  ;;  %v1948_v5 = vadd.f32 1.0, %v5112_v27 }
 0x6f5   :  { %v6481_v18 = vpop.f32.mrb[75].mxu0  ;;  %v5114_v52 = vpop.eup %5113  ;;  %2141 = vadd.xlane.f32.xlu1 %v2140_v56  ;;  %v2100_v8 = vmul.f32 %v2068_v10, %v2068_v10  ;;  %vm2749_vm3 = vcmp.gt.f32.partialorder %v6458_v22, 0.0  ;;  %v2819_v48 = vmul.f32 1.442695, %v2783_v61  ;;  %v6491_v37 = vadd.f32 %v6452_v44, %v6449_v21 }
 0x6f6   :  { %v5116_v15 = vpop.eup %5115  ;;  %v2101_v39 = vmul.f32 %v2069_v40, %v2069_v40  ;;  %v6493_v46 = vmin.f32 %v2008_v26, 1.0  ;;  %v2010_v63 = vmax.f32 %v6483_v31, 1e-08  ;;  %v6498_v43 = vadd.f32 %v6460_v14, %v6438_v57 }
 0x6f7   :  { %v6502_v35 = vadd.f32 %v6465_v53, %v6449_v21  ;;  %v1979_v30 = vmul.f32 0.5, %v1947_v32  ;;  %v1949_v42 = vadd.f32 1.0, %v5114_v52  ;;  %v2784_v0 = vmin.f32 %v6491_v37, 0.0 }
 0x6f8   :  { %v2143_v45 = vadd.f32 %v2101_v39, %v2100_v8  ;;  %v6505_v4 = vmul.f32 0.5, %v1948_v5  ;;  %v4156_v1 = vadd.f32 -1.0, %v5116_v15  ;;  %v2785_v38 = vmin.f32 %v6498_v43, 0.0 }
 0x6f9   :  { %v2786_v29 = vmin.f32 %v6502_v35, 0.0  ;;  %5123 = vpow2.f32 %v2819_v48  ;;  %v2821_v53 = vmul.f32 1.442695, %v2784_v0  ;;  %v2070_v12 = vsub.f32 %v2038_v34, %v5299_v23 }
 0x6fa   :  { %v2698_v59 = vpop.f32.mrb[76].mxu0  ;;  %v5118_v9 = vpop.eup %5117  ;;  %2144 = vadd.xlane.f32.xlu0 %v2143_v45  ;;  %v2071_v33 = vsub.f32 %v2039_v25, %v5300_v60  ;;  %v2823_v17 = vmul.f32 1.442695, %v2785_v38  ;;  %v6511_v50 = vadd.f32 %v6470_v47, %v6438_v57  ;;  %vm2748_vm4 = vcmp.gt.f32.partialorder %v6455_v24, 0.0 }
 0x6fb   :  { %v2700_v44 = vpop.f32.mrb[77].mxu0  ;;  %v4158_v36 = vadd.f32 -1.0, %v5118_v9  ;;  %v2825_v20 = vmul.f32 1.442695, %v2786_v29  ;;  %vm2750_vm5 = vcmp.gt.f32.partialorder %v6463_v16, 0.0  ;;  %5125 = vpow2.f32 %v2821_v53 }
 0x6fc   :  { %v2702_v14 = vpop.f32.mrb[78].mxu0  ;;  %v2102_v58 = vmul.f32 %v2070_v12, %v2070_v12  ;;  %v2103_v28 = vmul.f32 %v2071_v33, %v2071_v33  ;;  %v6517_v19 = vadd.f32 %v6472_v3, %v6449_v21  ;;  %v5120_v51 = vpop.eup %5119  ;;  %v2011_v27 = vmax.f32 %v1979_v30, 1e-08 }
 0x6fd   :  { %v2704_v49 = vpop.f32.mrb[79].mxu0  ;;  %v6522_v34 = vsel %vm2747_vm2, %v6445_v54, %v4156_v1  ;;  %v6527_v47 = vsel %vm2749_vm3, %v6458_v22, %v4158_v36  ;;  %5127 = vpow2.f32 %v2823_v17  ;;  %v5122_v62 = vpop.eup %5121  ;;  %v2787_v26 = vmin.f32 %v6511_v50, 0.0 }
 0x6fe   :  { %v2972_v10 = vpack.c.bf16 %v6527_v47, %v6522_v34  ;;  %5129 = vpow2.f32 %v2825_v20  ;;  %v2146_v3 = vadd.f32 %v2103_v28, %v2102_v58  ;;  %v1981_v31 = vmul.f32 0.5, %v1949_v42 }
 0x6ff   :  { %v2788_v56 = vmin.f32 %v6517_v19, 0.0  ;;  %v6535_v54 = vadd.f32 %v6476_v11, %v6438_v57  ;;  %v6539_v22 = vadd.f32 %v6481_v18, %v6449_v21  ;;  %v4157_v61 = vadd.f32 -1.0, %v5120_v51 }
 0x700   :  { %2147 = vadd.xlane.f32.xlu1 %v2146_v3  ;;  %v2827_v6 = vmul.f32 1.442695, %v2787_v26  ;;  %v6542_v40 = vadd.f32 %v2698_v59, %v6438_v57  ;;  %v6545_v52 = vadd.f32 %v2700_v44, %v6449_v21  ;;  %v4159_v5 = vadd.f32 -1.0, %v5122_v62 }
 0x701   :  { %v2829_v8 = vmul.f32 1.442695, %v2788_v56  ;;  %v2789_v11 = vmin.f32 %v6535_v54, 0.0  ;;  %v6549_v15 = vadd.f32 %v2702_v14, %v6438_v57  ;;  %v6553_v48 = vmin.f32 %v2009_v41, 1.0 }
 0x702   :  { %v2708_v32 = vpop.f32.mrb[80].mxu0  ;;  %v6555_v39 = vmin.f32 %v2010_v63, 1.0  ;;  %v2012_v59 = vmax.f32 %v6505_v4, 1e-08  ;;  %v2790_v30 = vmin.f32 %v6539_v22, 0.0  ;;  %v6559_v45 = vmin.f32 %v2011_v27, 1.0 }
 0x703   :  { %v2710_v25 = vpop.f32.mrb[81].mxu0  ;;  %v2013_v0 = vmax.f32 %v1981_v31, 1e-08  ;;  %5131 = vpow2.f32 %v2829_v8  ;;  %v2831_v44 = vmul.f32 1.442695, %v2789_v11  ;;  %v5124_v1 = vpop.eup %5123  ;;  %v2791_v29 = vmin.f32 %v6542_v40, 0.0 }
 0x704   :  { %v2712_v18 = vpop.f32.mrb[82].mxu0  ;;  %5133 = vpow2.f32 %v2827_v6  ;;  %v2833_v38 = vmul.f32 1.442695, %v2790_v30  ;;  %v2792_v2 = vmin.f32 %v6545_v52, 0.0  ;;  %vm2751_vm6 = vcmp.gt.f32.partialorder %v6479_v13, 0.0 }
 0x705   :  { %v2714_v42 = vpop.f32.mrb[83].mxu0  ;;  %5135 = vpow2.f32 %v2831_v44  ;;  %v2793_v41 = vmin.f32 %v6549_v15, 0.0  ;;  %v2908_v63 = vsel %vm2748_vm4, %v6455_v24, %v4157_v61  ;;  %v2910_v4 = vsel %vm2750_vm5, %v6463_v16, %v4159_v5  ;;  %v5126_v14 = vpop.eup %5125 }
 0x706   :  { %5137 = vpow2.f32 %v2833_v38  ;;  %v2837_v9 = vmul.f32 1.442695, %v2792_v2  ;;  %v2973_v53 = vpack.c.bf16 %v2910_v4, %v2908_v63  ;;  %v6572_v23 = vadd.f32 %v2704_v49, %v6449_v21 }
 0x707   :  { %v5128_v12 = vpop.eup %5127  ;;  %v6574_v60 = vmin.f32 %v2012_v59, 1.0  ;;  %v6576_v33 = vmin.f32 %v2013_v0, 1.0  ;;  %vm2752_vm7 = vcmp.gt.f32.partialorder %v6491_v37, 0.0  ;;  %v6580_v24 = vadd.f32 %v2708_v32, %v6438_v57  ;;  %v4781_v59 = vld [vmem:[#allocation12 + $0x48] sm:$0xff]  }
 0x708   :  { %v5130_v17 = vpop.eup %5129  ;;  %v4160_v16 = vadd.f32 -1.0, %v5124_v1  ;;  %v4161_v20 = vadd.f32 -1.0, %v5126_v14  ;;  %vm2754_vm8 = vcmp.gt.f32.partialorder %v6502_v35, 0.0  ;;  %3193 = vmatprep.mubr.bf16.mxu1 %v2973_v53  ;;  %v2794_v49 = vmin.f32 %v6572_v23, 0.0  ;;  %v4782_v53 = vld [vmem:[#allocation12 + $0x8] sm:$0xff]  }
 0x709   :  { %v4163_v28 = vadd.f32 -1.0, %v5130_v17  ;;  %v2835_v51 = vmul.f32 1.442695, %v2791_v29  ;;  %5139 = vpow2.f32 %v2837_v9  ;;  %3194 = vmatmul.mubr.bf16.vlgmr.msra.gmra.mrb[96].mxu1 %v2972_v10  ;;  %v2795_v27 = vmin.f32 %v6580_v24, 0.0  ;;  %v4783_v17 = vld [vmem:[#allocation12 + $0x50] sm:$0xff]  }
 0x70a   :  { %v2718_v36 = vpop.f32.mrb[84].mxu0  ;;  %v2839_v47 = vmul.f32 1.442695, %v2793_v41  ;;  %v2841_v62 = vmul.f32 1.442695, %v2794_v49  ;;  %v6586_v3 = vadd.f32 %v2710_v25, %v6449_v21  ;;  %v6589_v26 = vadd.f32 %v2712_v18, %v6438_v57  ;;  %v4779_v18 = vld [vmem:[#allocation12 + $0x40] sm:$0xff]  }
 0x70b   :  { %v2720_v58 = vpop.f32.mrb[85].mxu0  ;;  %vm2753_vm9 = vcmp.gt.f32.partialorder %v6498_v43, 0.0  ;;  %v4162_v56 = vadd.f32 -1.0, %v5128_v12  ;;  %v2914_v32 = vsel %vm2754_vm8, %v6502_v35, %v4163_v28  ;;  %v6596_v10 = vadd.f32 %v2714_v42, %v6449_v21  ;;  %v4780_v35 = vld [vmem:[#allocation12] sm:$0xff]   ;;  %4391 = vmatprep.subr.bf16.mxu0 %v4779_v18 }
 0x70c   :  { %v2722_v34 = vpop.f32.mrb[86].mxu0  ;;  %vm2756_vm10 = vcmp.gt.f32.partialorder %v6517_v19, 0.0  ;;  %5141 = vpow2.f32 %v2841_v62  ;;  %v2796_v61 = vmin.f32 %v6586_v3, 0.0  ;;  %v2912_v6 = vsel %vm2752_vm7, %v6491_v37, %v4161_v20  ;;  %4392 = vmatpush3.bf16.msra.mxu0 %v4780_v35 }
 0x70d   :  { %v2724_v31 = vpop.f32.mrb[87].mxu0  ;;  %v5132_v25 = vpop.eup %5131  ;;  %5143 = vpow2.f32 %v2835_v51  ;;  %v2843_v5 = vmul.f32 1.442695, %v2795_v27  ;;  %v2797_v8 = vmin.f32 %v6589_v26, 0.0  ;;  %v2975_v11 = vpack.c.bf16 %v2914_v32, %v2912_v6  ;;  %4393 = vmatprep.subr.bf16.mxu0 %v4781_v59 }
 0x70e   :  { %v5134_v30 = vpop.eup %5133  ;;  %vm2755_vm11 = vcmp.gt.f32.partialorder %v6511_v50, 0.0  ;;  %5145 = vpow2.f32 %v2839_v47  ;;  %v2845_v42 = vmul.f32 1.442695, %v2796_v61  ;;  %v2798_v0 = vmin.f32 %v6596_v10, 0.0  ;;  %v4784_v61 = vld [vmem:[#allocation12 + $0x10] sm:$0xff]  }
 0x70f   :  { %v2911_v37 = vsel %vm2751_vm6, %v6479_v13, %v4160_v16  ;;  %v5136_v44 = vpop.eup %5135  ;;  %v2847_v1 = vmul.f32 1.442695, %v2797_v8  ;;  %3203 = vmatprep.mubr.bf16.mxu1 %v2975_v11  ;;  %v2913_v38 = vsel %vm2753_vm9, %v6498_v43, %v4162_v56  ;;  %v6613_v29 = vadd.f32 %v2718_v36, %v6438_v57 }
 0x710   :  { %v6616_v2 = vadd.f32 %v2720_v58, %v6449_v21  ;;  %v5138_v63 = vpop.eup %5137  ;;  %v4165_v4 = vadd.f32 -1.0, %v5132_v25  ;;  %5147 = vpow2.f32 %v2845_v42  ;;  %v2849_v14 = vmul.f32 1.442695, %v2798_v0  ;;  %4394 = vmatpush3.bf16.msra.mxu0 %v4782_v53  ;;  %v4785_v25 = vld [vmem:[#allocation12 + $0x58] sm:$0xff]  }
 0x711   :  { %v2974_v13 = vpack.c.bf16 %v2913_v38, %v2911_v37  ;;  %vm2757_vm12 = vcmp.gt.f32.partialorder %v6535_v54, 0.0  ;;  %v4167_v12 = vadd.f32 -1.0, %v5138_v63  ;;  %5149 = vpow2.f32 %v2843_v5  ;;  %4395 = vmatprep.subr.bf16.mxu0 %v4783_v17  ;;  %v4786_v38 = vld [vmem:[#allocation12 + $0x18] sm:$0xff]   ;;  %v4787_v63 = vld [vmem:[#allocation12 + $0x60] sm:$0xff]  }
 0x712   :  { %v2728_v41 = vpop.f32.mrb[88].mxu0  ;;  %v2799_v43 = vmin.f32 %v6613_v29, 0.0  ;;  %v4164_v16 = vadd.f32 -1.0, %v5134_v30  ;;  %vm2758_vm13 = vcmp.gt.f32.partialorder %v6539_v22, 0.0  ;;  %5151 = vpow2.f32 %v2849_v14 }
 0x713   :  { %v2730_v9 = vpop.f32.mrb[89].mxu0  ;;  %3204 = vmatmul.mubr.bf16.gmra.mrb[100].mxu1 %v2974_v13  ;;  %v2800_v20 = vmin.f32 %v6616_v2, 0.0  ;;  %v5140_v58 = vpop.eup %5139  ;;  %v4166_v28 = vadd.f32 -1.0, %v5136_v44  ;;  %5153 = vpow2.f32 %v2847_v1  ;;  %v6625_v27 = vadd.f32 %v2722_v34, %v6438_v57 }
 0x714   :  { %v2732_v36 = vpop.f32.mrb[90].mxu0  ;;  %v2851_v51 = vmul.f32 1.442695, %v2799_v43  ;;  %v2916_v62 = vsel %vm2756_vm10, %v6517_v19, %v4165_v4  ;;  %v2918_v56 = vsel %vm2758_vm13, %v6539_v22, %v4167_v12  ;;  %v6632_v32 = vadd.f32 %v2724_v31, %v6449_v21  ;;  %4396 = vmatpush3.bf16.msra.mxu0 %v4784_v61 }
 0x715   :  { %v6622_v49 = vpop.f32.mrb[91].mxu0  ;;  %v2853_v47 = vmul.f32 1.442695, %v2800_v20  ;;  %vm2759_vm14 = vcmp.gt.f32.partialorder %v6542_v40, 0.0  ;;  %vm2760_vm15 = vcmp.gt.f32.partialorder %v6545_v52, 0.0  ;;  %v2801_v34 = vmin.f32 %v6625_v27, 0.0  ;;  %4397 = vmatprep.subr.bf16.mxu0 %v4785_v25 }
 0x716   :  { %5155 = vpow2.f32 %v2851_v51  ;;  %v2977_v6 = vpack.c.bf16 %v2918_v56, %v2916_v62  ;;  %v5142_v5 = vpop.eup %5141  ;;  %v4169_v8 = vadd.f32 -1.0, %v5140_v58  ;;  %vm2761_vm0 = vcmp.gt.f32.partialorder %v6549_v15, 0.0  ;;  %v4788_v51 = vld [vmem:[#allocation12 + $0x20] sm:$0xff]  }
 0x717   :  { %5157 = vpow2.f32 %v2853_v47  ;;  %v2802_v19 = vmin.f32 %v6632_v32, 0.0  ;;  %v5144_v22 = vpop.eup %5143  ;;  %v2855_v31 = vmul.f32 1.442695, %v2801_v34  ;;  %v2915_v11 = vsel %vm2755_vm11, %v6511_v50, %v4164_v16 }
 0x718   :  { %3213 = vmatprep.mubr.bf16.mxu1 %v2977_v6  ;;  %v2917_v18 = vsel %vm2757_vm12, %v6535_v54, %v4166_v28  ;;  %v6646_v35 = vadd.f32 %v2728_v41, %v6438_v57  ;;  %v5146_v30 = vpop.eup %5145  ;;  %v4171_v42 = vadd.f32 -1.0, %v5142_v5  ;;  %v6649_v44 = vadd.f32 %v2730_v9, %v6449_v21  ;;  %4398 = vmatpush3.bf16.msra.mxu0 %v4786_v38 }
 0x719   :  { %v2857_v0 = vmul.f32 1.442695, %v2802_v19  ;;  %v2976_v37 = vpack.c.bf16 %v2917_v18, %v2915_v11  ;;  %vm2762_vm1 = vcmp.gt.f32.partialorder %v6572_v23, 0.0  ;;  %5159 = vpow2.f32 %v2855_v31  ;;  %4399 = vmatprep.subr.bf16.mxu0 %v4787_v63 }
 0x71a   :  { %v2738_v59 = vpop.f32.mrb[92].mxu0  ;;  %v2803_v50 = vmin.f32 %v6646_v35, 0.0  ;;  %v6654_v54 = vadd.f32 %v2732_v36, %v6438_v57  ;;  %v5148_v4 = vpop.eup %5147  ;;  %v4168_v14 = vadd.f32 -1.0, %v5144_v22  ;;  %vm2764_vm2 = vcmp.gt.f32.partialorder %v6586_v3, 0.0 }
 0x71b   :  { %v2740_v1 = vpop.f32.mrb[93].mxu0  ;;  %5161 = vpow2.f32 %v2857_v0  ;;  %3214 = vmatmul.mubr.bf16.gmra.mrb[104].mxu1 %v2976_v37  ;;  %v2804_v13 = vmin.f32 %v6649_v44, 0.0  ;;  %v5150_v53 = vpop.eup %5149  ;;  %v4170_v12 = vadd.f32 -1.0, %v5146_v30  ;;  %vm2766_vm3 = vcmp.gt.f32.partialorder %v6596_v10, 0.0 }
 0x71c   :  { %v2742_v41 = vpop.f32.mrb[94].mxu0  ;;  %v2859_v43 = vmul.f32 1.442695, %v2803_v50  ;;  %v2805_v36 = vmin.f32 %v6654_v54, 0.0  ;;  %v5152_v17 = vpop.eup %5151  ;;  %v2920_v20 = vsel %vm2760_vm15, %v6545_v52, %v4169_v8  ;;  %v2922_v58 = vsel %vm2762_vm1, %v6572_v23, %v4171_v42  ;;  %4400 = vmatpush3.bf16.msra.mxu0 %v4788_v51 }
 0x71d   :  { %v2744_v9 = vpop.f32.mrb[95].mxu0  ;;  %v2861_v16 = vmul.f32 1.442695, %v2804_v13  ;;  %v6668_v28 = vadd.f32 %v6622_v49, %v6449_v21  ;;  %v5154_v47 = vpop.eup %5153  ;;  %vm2763_vm4 = vcmp.gt.f32.partialorder %v6580_v24, 0.0  ;;  %v4173_v62 = vadd.f32 -1.0, %v5148_v4 }
 0x71e   :  { %vm2765_vm5 = vcmp.gt.f32.partialorder %v6589_v26, 0.0  ;;  %vm2768_vm6 = vcmp.gt.f32.partialorder %v6616_v2, 0.0  ;;  %5163 = vpow2.f32 %v2859_v43  ;;  %v2863_v52 = vmul.f32 1.442695, %v2805_v36 }
 0x71f   :  { %v2979_v56 = vpack.c.bf16 %v2922_v58, %v2920_v20  ;;  %v4175_v61 = vadd.f32 -1.0, %v5152_v17  ;;  %5165 = vpow2.f32 %v2861_v16  ;;  %v2806_v23 = vmin.f32 %v6668_v28, 0.0 }
 0x720   :  { %v2919_v49 = vsel %vm2759_vm14, %v6542_v40, %v4168_v14  ;;  %v5156_v34 = vpop.eup %5155  ;;  %vm2767_vm7 = vcmp.gt.f32.partialorder %v6613_v29, 0.0  ;;  %vm2769_vm8 = vcmp.gt.f32.partialorder %v6625_v27, 0.0  ;;  %5167 = vpow2.f32 %v2863_v52  ;;  %v5302_v52 = vld [vmem:[#allocation2 + $0xd8] sm:$0xff] }
 0x721   :  { %3223 = vmatprep.mubr.bf16.mxu1 %v2979_v56  ;;  %v2921_v6 = vsel %vm2761_vm0, %v6549_v15, %v4170_v12  ;;  %v6683_v25 = vadd.f32 %v2738_v59, %v6438_v57  ;;  %v6686_v5 = vadd.f32 %v2740_v1, %v6449_v21  ;;  %v5158_v8 = vpop.eup %5157  ;;  %vm2770_vm9 = vcmp.gt.f32.partialorder %v6632_v32, 0.0  ;;  %v5303_v56 = vld [vmem:[#allocation2 + $0xf0] sm:$0xff] }
 0x722   :  { %v2865_v40 = vmul.f32 1.442695, %v2806_v23  ;;  %v2978_v19 = vpack.c.bf16 %v2921_v6, %v2919_v49  ;;  %v6690_v22 = vadd.f32 %v2742_v41, %v6438_v57  ;;  %v4172_v31 = vadd.f32 -1.0, %v5150_v53  ;;  %v5304_v23 = vld [vmem:[#allocation2 + $0xf8] sm:$0xff] }
 0x723   :  { %v4174_v11 = vadd.f32 -1.0, %v5154_v47  ;;  %v4176_v18 = vadd.f32 -1.0, %v5156_v34  ;;  %v2807_v15 = vmin.f32 %v6683_v25, 0.0  ;;  %v4177_v30 = vadd.f32 -1.0, %v5158_v8  ;;  %v5160_v0 = vpop.eup %5159  ;;  %v5301_v47 = vld [vmem:[#allocation2 + $0xd0] sm:$0xff]  ;;  %v5305_v34 = vld [vmem:[#allocation2 + $0xe0] sm:$0xff] }
 0x724   :  { %5169 = vpow2.f32 %v2865_v40  ;;  %3224 = vmatmul.mubr.bf16.gmra.mrb[108].mxu1 %v2978_v19  ;;  %v2808_v59 = vmin.f32 %v6686_v5, 0.0  ;;  %v2809_v42 = vmin.f32 %v6690_v22, 0.0  ;;  %v2924_v57 = vsel %vm2764_vm2, %v6586_v3, %v4173_v62  ;;  %v5306_v19 = vld [vmem:[#allocation2 + $0xe8] sm:$0xff] }
 0x725   :  { %v2867_v37 = vmul.f32 1.442695, %v2807_v15  ;;  %v2926_v1 = vsel %vm2766_vm3, %v6596_v10, %v4175_v61  ;;  %v6702_v38 = vadd.f32 %v2744_v9, %v6449_v21  ;;  %v5162_v50 = vpop.eup %5161  ;;  %v4178_v41 = vadd.f32 -1.0, %v5160_v0 }
 0x726   :  { %v2869_v63 = vmul.f32 1.442695, %v2808_v59  ;;  %v2871_v4 = vmul.f32 1.442695, %v2809_v42  ;;  %v2981_v14 = vpack.c.bf16 %v2926_v1, %v2924_v57  ;;  %v4179_v13 = vadd.f32 -1.0, %v5162_v50 }
 0x727   :  { %vm2771_vm10 = vcmp.gt.f32.partialorder %v6646_v35, 0.0  ;;  %5171 = vpow2.f32 %v2867_v37  ;;  %v2810_v53 = vmin.f32 %v6702_v38, 0.0  ;;  %v2923_v3 = vsel %vm2763_vm4, %v6580_v24, %v4172_v31 }
 0x728   :  { %5173 = vpow2.f32 %v2869_v63  ;;  %3233 = vmatprep.mubr.bf16.mxu1 %v2981_v14  ;;  %v2925_v21 = vsel %vm2765_vm5, %v6589_v26, %v4174_v11  ;;  %v2928_v10 = vsel %vm2768_vm6, %v6616_v2, %v4177_v30  ;;  %v5164_v9 = vpop.eup %5163  ;;  %v2930_v36 = vsel %vm2770_vm9, %v6632_v32, %v4179_v13 }
 0x729   :  { %5175 = vpow2.f32 %v2871_v4  ;;  %v2873_v12 = vmul.f32 1.442695, %v2810_v53  ;;  %v2980_v43 = vpack.c.bf16 %v2925_v21, %v2923_v3  ;;  %v5166_v17 = vpop.eup %5165  ;;  %v4180_v16 = vadd.f32 -1.0, %v5164_v9  ;;  %v4789_v21 = vld [vmem:[#allocation12 + $0x68] sm:$0xff]   ;;  %v4792_v9 = vld [vmem:[#allocation12 + $0x30] sm:$0xff]  }
 0x72a   :  { %v2983_v20 = vpack.c.bf16 %v2930_v36, %v2928_v10  ;;  %v2927_v24 = vsel %vm2767_vm7, %v6613_v29, %v4176_v18  ;;  %v2929_v26 = vsel %vm2769_vm8, %v6625_v27, %v4178_v41  ;;  %v5168_v2 = vpop.eup %5167  ;;  %vm2772_vm11 = vcmp.gt.f32.partialorder %v6649_v44, 0.0  ;;  %v4790_v10 = vld [vmem:[#allocation12 + $0x28] sm:$0xff]   ;;  %4401 = vmatprep.subr.bf16.mxu0 %v4789_v21 }
 0x72b   :  { %vm2773_vm12 = vcmp.gt.f32.partialorder %v6654_v54, 0.0  ;;  %5177 = vpow2.f32 %v2873_v12  ;;  %v2982_v58 = vpack.c.bf16 %v2929_v26, %v2927_v24  ;;  %v4181_v51 = vadd.f32 -1.0, %v5166_v17  ;;  %4402 = vmatpush3.bf16.msra.mxu0 %v4790_v10  ;;  %v4794_v12 = vld [vmem:[#allocation12 + $0x38] sm:$0xff]  }
 0x72c   :  { %v4182_v32 = vadd.f32 -1.0, %v5168_v2  ;;  %3234 = vmatmul.mubr.bf16.gmra.mrb[112].mxu1 %v2980_v43  ;;  %v2072_v62 = vsub.f32 %v6493_v46, %v5301_v47  ;;  %v2073_v29 = vsub.f32 %v6553_v48, %v5302_v52  ;;  %v2931_v27 = vsel %vm2771_vm10, %v6646_v35, %v4180_v16 }
 0x72d   :  { %3243 = vmatprep.mubr.bf16.mxu1 %v2983_v20  ;;  %v2076_v61 = vsub.f32 %v6574_v60, %v5303_v56  ;;  %v2077_v49 = vsub.f32 %v6576_v33, %v5304_v23  ;;  %v2074_v6 = vsub.f32 %v6555_v39, %v5305_v34  ;;  %v2075_v31 = vsub.f32 %v6559_v45, %v5306_v19 }
 0x72e   :  { %v5170_v8 = vpop.eup %5169  ;;  %v2933_v46 = vsel %vm2773_vm12, %v6654_v54, %v4182_v32  ;;  %v2104_v48 = vmul.f32 %v2072_v62, %v2072_v62  ;;  %v2105_v40 = vmul.f32 %v2073_v29, %v2073_v29  ;;  %vm2774_vm13 = vcmp.gt.f32.partialorder %v6668_v28, 0.0 }
 0x72f   :  { %v4183_v35 = vadd.f32 -1.0, %v5170_v8  ;;  %v2984_v11 = vpack.c.bf16 %v2933_v46, %v2931_v27  ;;  %v2108_v18 = vmul.f32 %v2076_v61, %v2076_v61  ;;  %v2109_v60 = vmul.f32 %v2077_v49, %v2077_v49 }
 0x730   :  { %v6739_v33 = vadd.f32 %v2105_v40, %v2104_v48  ;;  %v2106_v15 = vmul.f32 %v2074_v6, %v2074_v6  ;;  %v2107_v39 = vmul.f32 %v2075_v31, %v2075_v31  ;;  %v2932_v54 = vsel %vm2772_vm11, %v6649_v44, %v4181_v51 }
 0x731   :  { %v5172_v30 = vpop.eup %5171  ;;  %v2934_v59 = vsel %vm2774_vm13, %v6668_v28, %v4183_v35  ;;  %v6745_v42 = vadd.f32 %v2109_v60, %v2108_v18  ;;  %vm2775_vm14 = vcmp.gt.f32.partialorder %v6683_v25, 0.0  ;;  %vm2777_vm15 = vcmp.gt.f32.partialorder %v6690_v22, 0.0 }
 0x732   :  { %v5174_v45 = vpop.eup %5173  ;;  %v4184_v0 = vadd.f32 -1.0, %v5172_v30  ;;  %v2985_v37 = vpack.c.bf16 %v2934_v59, %v2932_v54  ;;  %v6747_v57 = vadd.f32 %v2107_v39, %v2106_v15  ;;  %vm2776_vm0 = vcmp.gt.f32.partialorder %v6686_v5, 0.0 }
 0x733   :  { %v5176_v1 = vpop.eup %5175  ;;  %v4185_v50 = vadd.f32 -1.0, %v5174_v45  ;;  %vm2778_vm1 = vcmp.gt.f32.partialorder %v6702_v38, 0.0 }
 0x734   :  { %v4186_v41 = vadd.f32 -1.0, %v5176_v1  ;;  %3244 = vmatmul.mubr.bf16.gmra.mrb[116].mxu1 %v2982_v58  ;;  %v2935_v28 = vsel %vm2775_vm14, %v6683_v25, %v4184_v0  ;;  %v4791_v25 = vld [vmem:[#allocation12 + $0x70] sm:$0xff]  }
 0x735   :  { %v5178_v63 = vpop.eup %5177  ;;  %3253 = vmatprep.mubr.bf16.mxu1 %v2985_v37  ;;  %v2936_v13 = vsel %vm2776_vm0, %v6686_v5, %v4185_v50  ;;  %4403 = vmatprep.subr.bf16.mxu0 %v4791_v25  ;;  %v4188_v5 = vld [vmem:[%s7289_s9 + $0x10] ss:$8 sm:$0x3] }
 0x736   :  { %v4187_v44 = vadd.f32 -1.0, %v5178_v63  ;;  %v2937_v4 = vsel %vm2777_vm15, %v6690_v22, %v4186_v41  ;;  %4404 = vmatpush3.bf16.msra.mxu0 %v4792_v9  ;;  %v4793_v22 = vld [vmem:[#allocation12 + $0x78] sm:$0xff]   ;;  %v6764_v43 = vrot.slane %v4188_v5, %v6196_v55 }
 0x737   :  { %v2986_v14 = vpack.c.bf16 %v2937_v4, %v2935_v28  ;;  %4405 = vmatprep.subr.bf16.mxu0 %v4793_v22 }
 0x738   :  { %v2938_v53 = vsel %vm2778_vm1, %v6702_v38, %v4187_v44  ;;  %v6761_v38 = vrot.slane %v4188_v5, %v6189_v7 }
 0x739   :  { %v2987_v3 = vpack.c.bf16 %v2938_v53, %v2936_v13 }
 0x73a   :  { %4406 = vmatpush3.bf16.msra.mxu0 %v4794_v12 }
 0x73c   :  { %3254 = vmatmul.mubr.bf16.gmra.mrb[120].mxu1 %v2984_v11 }
 0x73d   :  { %3263 = vmatprep.mubr.bf16.mxu1 %v2987_v3 }
 0x744   :  { %3264 = vmatmul.mubr.bf16.gmra.mrb[124].mxu1 %v2986_v14 }
 0x7dc   :  { %v3195_v36 = vpop.f32.mrb[96].mxu1 }
 0x7dd   :  { %v3196_v17 = vadd.f32 %v3195_v36, %v6761_v38  ;;  %v3197_v16 = vpop.f32.mrb[97].mxu1 }
 0x7de   :  { %v6768_v20 = vadd.f32 %v3197_v16, %v6764_v43  ;;  %v3199_v24 = vpop.f32.mrb[98].mxu1 }
 0x7df   :  { %v3306_v26 = vmin.f32 %v3196_v17, 0.0  ;;  %v3200_v2 = vadd.f32 %v3199_v24, %v6761_v38  ;;  %v3201_v58 = vpop.f32.mrb[99].mxu1  ;;  %vm3274_vm2 = vcmp.gt.f32.partialorder %v3196_v17, 0.0 }
 0x7e0   :  { %v3307_v51 = vmin.f32 %v6768_v20, 0.0  ;;  %v6773_v7 = vadd.f32 %v3201_v58, %v6764_v43  ;;  %vm3275_vm3 = vcmp.gt.f32.partialorder %v6768_v20, 0.0 }
 0x7e1   :  { %v3338_v32 = vmul.f32 1.442695, %v3306_v26  ;;  %v3308_v55 = vmin.f32 %v3200_v2, 0.0  ;;  %vm3276_vm4 = vcmp.gt.f32.partialorder %v3200_v2, 0.0 }
 0x7e2   :  { %v3340_v47 = vmul.f32 1.442695, %v3307_v51  ;;  %v3309_v62 = vmin.f32 %v6773_v7, 0.0  ;;  %vm3277_vm5 = vcmp.gt.f32.partialorder %v6773_v7, 0.0 }
 0x7e3   :  { %5179 = vpow2.f32 %v3338_v32  ;;  %v3342_v52 = vmul.f32 1.442695, %v3308_v55 }
 0x7e4   :  { %5181 = vpow2.f32 %v3340_v47  ;;  %v3344_v29 = vmul.f32 1.442695, %v3309_v62 }
 0x7e5   :  { %5183 = vpow2.f32 %v3342_v52 }
 0x7e6   :  { %v3205_v27 = vpop.f32.mrb[100].mxu1  ;;  %5185 = vpow2.f32 %v3344_v29 }
 0x7e7   :  { %v6777_v56 = vadd.f32 %v3205_v27, %v6761_v38  ;;  %v3207_v61 = vpop.f32.mrb[101].mxu1 }
 0x7e8   :  { %v6780_v23 = vadd.f32 %v3207_v61, %v6764_v43  ;;  %v3209_v49 = vpop.f32.mrb[102].mxu1 }
 0x7e9   :  { %v3310_v34 = vmin.f32 %v6777_v56, 0.0  ;;  %v6784_v6 = vadd.f32 %v3209_v49, %v6761_v38  ;;  %v3211_v8 = vpop.f32.mrb[103].mxu1  ;;  %vm3278_vm6 = vcmp.gt.f32.partialorder %v6777_v56, 0.0 }
 0x7ea   :  { %v3311_v46 = vmin.f32 %v6780_v23, 0.0  ;;  %v6788_v48 = vadd.f32 %v3211_v8, %v6764_v43  ;;  %vm3279_vm7 = vcmp.gt.f32.partialorder %v6780_v23, 0.0 }
 0x7eb   :  { %v3346_v40 = vmul.f32 1.442695, %v3310_v34  ;;  %v3312_v19 = vmin.f32 %v6784_v6, 0.0  ;;  %vm3280_vm8 = vcmp.gt.f32.partialorder %v6784_v6, 0.0 }
 0x7ec   :  { %v3348_v31 = vmul.f32 1.442695, %v3311_v46  ;;  %v3313_v35 = vmin.f32 %v6788_v48, 0.0  ;;  %vm3281_vm9 = vcmp.gt.f32.partialorder %v6788_v48, 0.0 }
 0x7ed   :  { %5187 = vpow2.f32 %v3346_v40  ;;  %v3350_v11 = vmul.f32 1.442695, %v3312_v19  ;;  %v5180_v18 = vpop.eup %5179 }
 0x7ee   :  { %5189 = vpow2.f32 %v3348_v31  ;;  %v3352_v60 = vmul.f32 1.442695, %v3313_v35  ;;  %v3215_v15 = vpop.f32.mrb[104].mxu1  ;;  %v5182_v39 = vpop.eup %5181  ;;  %v4221_v30 = vadd.f32 -1.0, %v5180_v18 }
 0x7ef   :  { %5191 = vpow2.f32 %v3350_v11  ;;  %v6793_v54 = vadd.f32 %v3215_v15, %v6761_v38  ;;  %v3217_v59 = vpop.f32.mrb[105].mxu1  ;;  %v5184_v45 = vpop.eup %5183  ;;  %v4222_v50 = vadd.f32 -1.0, %v5182_v39 }
 0x7f0   :  { %5193 = vpow2.f32 %v3352_v60  ;;  %v6796_v0 = vadd.f32 %v3217_v59, %v6764_v43  ;;  %v3219_v37 = vpop.f32.mrb[106].mxu1  ;;  %v5186_v1 = vpop.eup %5185  ;;  %v4223_v41 = vadd.f32 -1.0, %v5184_v45  ;;  %v3434_v13 = vsel %vm3274_vm2, %v3196_v17, %v4221_v30 }
 0x7f1   :  { %v3314_v63 = vmin.f32 %v6793_v54, 0.0  ;;  %v3221_v44 = vpop.f32.mrb[107].mxu1  ;;  %v4224_v28 = vadd.f32 -1.0, %v5186_v1  ;;  %v6802_v14 = vadd.f32 %v3219_v37, %v6761_v38  ;;  %v3435_v12 = vsel %vm3275_vm3, %v6768_v20, %v4222_v50 }
 0x7f2   :  { %v3315_v4 = vmin.f32 %v6796_v0, 0.0  ;;  %v3436_v53 = vsel %vm3276_vm4, %v3200_v2, %v4223_v41  ;;  %v6805_v21 = vadd.f32 %v3221_v44, %v6764_v43  ;;  %vm3282_vm10 = vcmp.gt.f32.partialorder %v6793_v54, 0.0 }
 0x7f3   :  { %v3354_v3 = vmul.f32 1.442695, %v3314_v63  ;;  %v3498_v10 = vpack.c.bf16 %v3436_v53, %v3434_v13  ;;  %v3316_v9 = vmin.f32 %v6802_v14, 0.0  ;;  %v3437_v5 = vsel %vm3277_vm5, %v6773_v7, %v4224_v28 }
 0x7f4   :  { %v3356_v25 = vmul.f32 1.442695, %v3315_v4  ;;  %v3317_v22 = vmin.f32 %v6805_v21, 0.0  ;;  %v3499_v16 = vpack.c.bf16 %v3437_v5, %v3435_v12  ;;  %vm3283_vm11 = vcmp.gt.f32.partialorder %v6796_v0, 0.0 }
 0x7f5   :  { %5195 = vpow2.f32 %v3354_v3  ;;  %v3358_v36 = vmul.f32 1.442695, %v3316_v9  ;;  %vm3284_vm12 = vcmp.gt.f32.partialorder %v6802_v14, 0.0  ;;  %vm3285_vm13 = vcmp.gt.f32.partialorder %v6805_v21, 0.0 }
 0x7f6   :  { %5197 = vpow2.f32 %v3356_v25  ;;  %v3360_v26 = vmul.f32 1.442695, %v3317_v22  ;;  %3643 = vmatprep.mubr.bf16.mxu0 %v3499_v16 }
 0x7f7   :  { %v3225_v17 = vpop.f32.mrb[108].mxu1  ;;  %v5188_v24 = vpop.eup %5187  ;;  %5199 = vpow2.f32 %v3358_v36  ;;  %3644 = vmatmul.mubr.bf16.vlgmr.msra.gmra.mrb[96].mxu0 %v3498_v10 }
 0x7f8   :  { %v6815_v2 = vadd.f32 %v3225_v17, %v6761_v38  ;;  %v3227_v58 = vpop.f32.mrb[109].mxu1  ;;  %v5190_v51 = vpop.eup %5189  ;;  %v4225_v55 = vadd.f32 -1.0, %v5188_v24  ;;  %5201 = vpow2.f32 %v3360_v26 }
 0x7f9   :  { %v6819_v32 = vadd.f32 %v3227_v58, %v6764_v43  ;;  %v3229_v20 = vpop.f32.mrb[110].mxu1  ;;  %v5192_v7 = vpop.eup %5191  ;;  %v4226_v47 = vadd.f32 -1.0, %v5190_v51 }
 0x7fa   :  { %v3318_v62 = vmin.f32 %v6815_v2, 0.0  ;;  %v3231_v52 = vpop.f32.mrb[111].mxu1  ;;  %v5194_v29 = vpop.eup %5193  ;;  %v4227_v27 = vadd.f32 -1.0, %v5192_v7  ;;  %v6825_v49 = vadd.f32 %v3229_v20, %v6761_v38  ;;  %v3438_v18 = vsel %vm3278_vm6, %v6777_v56, %v4225_v55 }
 0x7fb   :  { %v3319_v61 = vmin.f32 %v6819_v32, 0.0  ;;  %v4228_v34 = vadd.f32 -1.0, %v5194_v29  ;;  %v6829_v46 = vadd.f32 %v3231_v52, %v6764_v43  ;;  %v3439_v31 = vsel %vm3279_vm7, %v6780_v23, %v4226_v47 }
 0x7fc   :  { %v3362_v8 = vmul.f32 1.442695, %v3318_v62  ;;  %v3320_v19 = vmin.f32 %v6825_v49, 0.0  ;;  %v3440_v30 = vsel %vm3280_vm8, %v6784_v6, %v4227_v27  ;;  %vm3286_vm14 = vcmp.gt.f32.partialorder %v6815_v2, 0.0 }
 0x7fd   :  { %v3364_v40 = vmul.f32 1.442695, %v3319_v61  ;;  %v3321_v35 = vmin.f32 %v6829_v46, 0.0  ;;  %v3441_v11 = vsel %vm3281_vm9, %v6788_v48, %v4228_v34  ;;  %v3500_v1 = vpack.c.bf16 %v3440_v30, %v3438_v18 }
 0x7fe   :  { %5203 = vpow2.f32 %v3362_v8  ;;  %v3366_v60 = vmul.f32 1.442695, %v3320_v19  ;;  %v3501_v39 = vpack.c.bf16 %v3441_v11, %v3439_v31  ;;  %vm3287_vm15 = vcmp.gt.f32.partialorder %v6819_v32, 0.0 }
 0x7ff   :  { %5205 = vpow2.f32 %v3364_v40  ;;  %v3235_v15 = vpop.f32.mrb[112].mxu1  ;;  %v5196_v59 = vpop.eup %5195  ;;  %v3368_v45 = vmul.f32 1.442695, %v3321_v35  ;;  %vm3288_vm0 = vcmp.gt.f32.partialorder %v6825_v49, 0.0  ;;  %vm3289_vm1 = vcmp.gt.f32.partialorder %v6829_v46, 0.0 }
 0x800   :  { %v6843_v23 = vadd.f32 %v3235_v15, %v6761_v38  ;;  %v3237_v37 = vpop.f32.mrb[113].mxu1  ;;  %v5198_v48 = vpop.eup %5197  ;;  %5207 = vpow2.f32 %v3366_v60  ;;  %3651 = vmatprep.mubr.bf16.mxu0 %v3501_v39  ;;  %v4229_v41 = vadd.f32 -1.0, %v5196_v59 }
 0x801   :  { %v6847_v56 = vadd.f32 %v3237_v37, %v6764_v43  ;;  %v3239_v50 = vpop.f32.mrb[114].mxu1  ;;  %v4230_v63 = vadd.f32 -1.0, %v5198_v48  ;;  %5209 = vpow2.f32 %v3368_v45  ;;  %3652 = vmatmul.mubr.bf16.gmra.mrb[100].mxu0 %v3500_v1  ;;  %v5200_v28 = vpop.eup %5199 }
 0x802   :  { %v3322_v6 = vmin.f32 %v6843_v23, 0.0  ;;  %v3241_v44 = vpop.f32.mrb[115].mxu1  ;;  %v6853_v13 = vadd.f32 %v3239_v50, %v6761_v38  ;;  %v5202_v3 = vpop.eup %5201  ;;  %v4231_v10 = vadd.f32 -1.0, %v5200_v28  ;;  %v3442_v17 = vsel %vm3282_vm10, %v6793_v54, %v4229_v41 }
 0x803   :  { %v3323_v4 = vmin.f32 %v6847_v56, 0.0  ;;  %v6856_v53 = vadd.f32 %v3241_v44, %v6764_v43  ;;  %v4232_v9 = vadd.f32 -1.0, %v5202_v3  ;;  %v3443_v5 = vsel %vm3283_vm11, %v6796_v0, %v4230_v63 }
 0x804   :  { %v3370_v25 = vmul.f32 1.442695, %v3322_v6  ;;  %v3324_v12 = vmin.f32 %v6853_v13, 0.0  ;;  %v3444_v16 = vsel %vm3284_vm12, %v6802_v14, %v4231_v10  ;;  %vm3290_vm2 = vcmp.gt.f32.partialorder %v6843_v23, 0.0 }
 0x805   :  { %v3372_v22 = vmul.f32 1.442695, %v3323_v4  ;;  %v3325_v36 = vmin.f32 %v6856_v53, 0.0  ;;  %v3445_v58 = vsel %vm3285_vm13, %v6805_v21, %v4232_v9  ;;  %v3502_v51 = vpack.c.bf16 %v3444_v16, %v3442_v17 }
 0x806   :  { %5211 = vpow2.f32 %v3370_v25  ;;  %v3374_v24 = vmul.f32 1.442695, %v3324_v12  ;;  %v3503_v47 = vpack.c.bf16 %v3445_v58, %v3443_v5  ;;  %vm3291_vm3 = vcmp.gt.f32.partialorder %v6847_v56, 0.0 }
 0x807   :  { %5213 = vpow2.f32 %v3372_v22  ;;  %v3245_v26 = vpop.f32.mrb[116].mxu1  ;;  %v3376_v7 = vmul.f32 1.442695, %v3325_v36  ;;  %vm3292_vm4 = vcmp.gt.f32.partialorder %v6853_v13, 0.0  ;;  %vm3293_vm5 = vcmp.gt.f32.partialorder %v6856_v53, 0.0 }
 0x808   :  { %v5204_v20 = vpop.eup %5203  ;;  %v6869_v55 = vadd.f32 %v3245_v26, %v6761_v38  ;;  %v3247_v0 = vpop.f32.mrb[117].mxu1  ;;  %5215 = vpow2.f32 %v3374_v24  ;;  %3659 = vmatprep.mubr.bf16.mxu0 %v3503_v47 }
 0x809   :  { %v5206_v62 = vpop.eup %5205  ;;  %v6873_v54 = vadd.f32 %v3247_v0, %v6764_v43  ;;  %v3249_v14 = vpop.f32.mrb[118].mxu1  ;;  %v4233_v52 = vadd.f32 -1.0, %v5204_v20  ;;  %5217 = vpow2.f32 %v3376_v7  ;;  %3660 = vmatmul.mubr.bf16.gmra.mrb[104].mxu0 %v3502_v51 }
 0x80a   :  { %v4234_v29 = vadd.f32 -1.0, %v5206_v62  ;;  %v3326_v21 = vmin.f32 %v6869_v55, 0.0  ;;  %v3251_v27 = vpop.f32.mrb[119].mxu1  ;;  %v5208_v61 = vpop.eup %5207  ;;  %v6879_v8 = vadd.f32 %v3249_v14, %v6761_v38  ;;  %vm3294_vm6 = vcmp.gt.f32.partialorder %v6869_v55, 0.0 }
 0x80b   :  { %v3327_v34 = vmin.f32 %v6873_v54, 0.0  ;;  %v6882_v40 = vadd.f32 %v3251_v27, %v6764_v43  ;;  %v5210_v19 = vpop.eup %5209  ;;  %v4235_v31 = vadd.f32 -1.0, %v5208_v61  ;;  %v3446_v30 = vsel %vm3286_vm14, %v6815_v2, %v4233_v52 }
 0x80c   :  { %v3378_v35 = vmul.f32 1.442695, %v3326_v21  ;;  %v4236_v11 = vadd.f32 -1.0, %v5210_v19  ;;  %v3328_v60 = vmin.f32 %v6879_v8, 0.0  ;;  %v3447_v15 = vsel %vm3287_vm15, %v6819_v32, %v4234_v29 }
 0x80d   :  { %v3380_v18 = vmul.f32 1.442695, %v3327_v34  ;;  %v3329_v39 = vmin.f32 %v6882_v40, 0.0  ;;  %v3448_v59 = vsel %vm3288_vm0, %v6825_v49, %v4235_v31  ;;  %vm3295_vm7 = vcmp.gt.f32.partialorder %v6873_v54, 0.0 }
 0x80e   :  { %5219 = vpow2.f32 %v3378_v35  ;;  %v3382_v45 = vmul.f32 1.442695, %v3328_v60  ;;  %v3449_v1 = vsel %vm3289_vm1, %v6829_v46, %v4236_v11  ;;  %v3504_v48 = vpack.c.bf16 %v3448_v59, %v3446_v30 }
 0x80f   :  { %5221 = vpow2.f32 %v3380_v18  ;;  %v3255_v37 = vpop.f32.mrb[120].mxu1  ;;  %v3384_v41 = vmul.f32 1.442695, %v3329_v39  ;;  %v3505_v6 = vpack.c.bf16 %v3449_v1, %v3447_v15  ;;  %vm3296_vm8 = vcmp.gt.f32.partialorder %v6879_v8, 0.0 }
 0x810   :  { %v5212_v50 = vpop.eup %5211  ;;  %v6895_v63 = vadd.f32 %v3255_v37, %v6761_v38  ;;  %v3257_v32 = vpop.f32.mrb[121].mxu1  ;;  %5223 = vpow2.f32 %v3382_v45  ;;  %vm3297_vm9 = vcmp.gt.f32.partialorder %v6882_v40, 0.0 }
 0x811   :  { %v5214_v44 = vpop.eup %5213  ;;  %v6899_v2 = vadd.f32 %v3257_v32, %v6764_v43  ;;  %v3259_v49 = vpop.f32.mrb[122].mxu1  ;;  %v4237_v28 = vadd.f32 -1.0, %v5212_v50  ;;  %5225 = vpow2.f32 %v3384_v41  ;;  %3667 = vmatprep.mubr.bf16.mxu0 %v3505_v6 }
 0x812   :  { %v4238_v4 = vadd.f32 -1.0, %v5214_v44  ;;  %v3330_v46 = vmin.f32 %v6895_v63, 0.0  ;;  %v3261_v3 = vpop.f32.mrb[123].mxu1  ;;  %v5216_v10 = vpop.eup %5215  ;;  %v6905_v9 = vadd.f32 %v3259_v49, %v6761_v38  ;;  %3668 = vmatmul.mubr.bf16.gmra.mrb[108].mxu0 %v3504_v48  ;;  %vm3298_vm10 = vcmp.gt.f32.partialorder %v6895_v63, 0.0 }
 0x813   :  { %v3331_v25 = vmin.f32 %v6899_v2, 0.0  ;;  %v6908_v22 = vadd.f32 %v3261_v3, %v6764_v43  ;;  %v5218_v12 = vpop.eup %5217  ;;  %v4239_v5 = vadd.f32 -1.0, %v5216_v10  ;;  %v3450_v51 = vsel %vm3290_vm2, %v6843_v23, %v4237_v28 }
 0x814   :  { %v3386_v36 = vmul.f32 1.442695, %v3330_v46  ;;  %v4240_v17 = vadd.f32 -1.0, %v5218_v12  ;;  %v3332_v24 = vmin.f32 %v6905_v9, 0.0  ;;  %v3451_v26 = vsel %vm3291_vm3, %v6847_v56, %v4238_v4 }
 0x815   :  { %v3388_v16 = vmul.f32 1.442695, %v3331_v25  ;;  %v3333_v58 = vmin.f32 %v6908_v22, 0.0  ;;  %v3452_v20 = vsel %vm3292_vm4, %v6853_v13, %v4239_v5  ;;  %vm3300_vm11 = vcmp.gt.f32.partialorder %v6905_v9, 0.0 }
 0x816   :  { %5227 = vpow2.f32 %v3386_v36  ;;  %v3390_v7 = vmul.f32 1.442695, %v3332_v24  ;;  %v3453_v47 = vsel %vm3293_vm5, %v6856_v53, %v4240_v17  ;;  %v3506_v62 = vpack.c.bf16 %v3452_v20, %v3450_v51 }
 0x817   :  { %5229 = vpow2.f32 %v3388_v16  ;;  %v3265_v0 = vpop.f32.mrb[124].mxu1  ;;  %v3392_v52 = vmul.f32 1.442695, %v3333_v58  ;;  %v3507_v21 = vpack.c.bf16 %v3453_v47, %v3451_v26  ;;  %vm3299_vm12 = vcmp.gt.f32.partialorder %v6899_v2, 0.0 }
 0x818   :  { %v5220_v14 = vpop.eup %5219  ;;  %v6921_v29 = vadd.f32 %v3265_v0, %v6761_v38  ;;  %v3267_v56 = vpop.f32.mrb[125].mxu1  ;;  %5231 = vpow2.f32 %v3390_v7  ;;  %vm3301_vm13 = vcmp.gt.f32.partialorder %v6908_v22, 0.0  ;;  %vm3932_vm2 = vcmask 7168  }
 0x819   :  { %v5222_v27 = vpop.eup %5221  ;;  %v6925_v23 = vadd.f32 %v3267_v56, %v6764_v43  ;;  %v3269_v13 = vpop.f32.mrb[126].mxu1  ;;  %v4241_v61 = vadd.f32 -1.0, %v5220_v14  ;;  %5233 = vpow2.f32 %v3392_v52  ;;  %3675 = vmatprep.mubr.bf16.mxu0 %v3507_v21  ;;  %vm3949_vm3 = vcmask 15360  }
 0x81a   :  { %v4242_v34 = vadd.f32 -1.0, %v5222_v27  ;;  %v3334_v53 = vmin.f32 %v6921_v29, 0.0  ;;  %v3271_v19 = vpop.f32.mrb[127].mxu1  ;;  %v5224_v31 = vpop.eup %5223  ;;  %v3270_v11 = vadd.f32 %v3269_v13, %v6761_v38  ;;  %3676 = vmatmul.mubr.bf16.gmra.mrb[112].mxu0 %v3506_v62  ;;  %vm3302_vm14 = vcmp.gt.f32.partialorder %v6921_v29, 0.0  ;;  %v6955_v62 = vld [vmem:[%s7289_s9 + $0x11] ss:$0 sm:$0xff] }
 0x81b   :  { %v3335_v35 = vmin.f32 %v6925_v23, 0.0  ;;  %v3272_v18 = vadd.f32 %v3271_v19, %v6764_v43  ;;  %v5226_v60 = vpop.eup %5225  ;;  %v4243_v15 = vadd.f32 -1.0, %v5224_v31  ;;  %v3454_v38 = vsel %vm3294_vm6, %v6869_v55, %v4241_v61  ;;  %s5486_s9 = smov 127  }
 0x81c   :  { %v3394_v39 = vmul.f32 1.442695, %v3334_v53  ;;  %v4244_v30 = vadd.f32 -1.0, %v5226_v60  ;;  %v3336_v45 = vmin.f32 %v3270_v11, 0.0  ;;  %v3455_v37 = vsel %vm3295_vm7, %v6873_v54, %v4242_v34 }
 0x81d   :  { %v3396_v59 = vmul.f32 1.442695, %v3335_v35  ;;  %v3337_v1 = vmin.f32 %v3272_v18, 0.0  ;;  %v3456_v43 = vsel %vm3296_vm8, %v6879_v8, %v4243_v15  ;;  %vm3304_vm15 = vcmp.gt.f32.partialorder %v3270_v11, 0.0 }
 0x81e   :  { %5235 = vpow2.f32 %v3394_v39  ;;  %v3398_v48 = vmul.f32 1.442695, %v3336_v45  ;;  %v3457_v50 = vsel %vm3297_vm9, %v6882_v40, %v4244_v30  ;;  %v3508_v41 = vpack.c.bf16 %v3456_v43, %v3454_v38 }
 0x81f   :  { %5237 = vpow2.f32 %v3396_v59  ;;  %v3400_v6 = vmul.f32 1.442695, %v3337_v1  ;;  %v3509_v44 = vpack.c.bf16 %v3457_v50, %v3455_v37  ;;  %vm3303_vm0 = vcmp.gt.f32.partialorder %v6925_v23, 0.0 }
 0x820   :  { %v5228_v32 = vpop.eup %5227  ;;  %5239 = vpow2.f32 %v3398_v48  ;;  %vm3305_vm1 = vcmp.gt.f32.partialorder %v3272_v18, 0.0  ;;  %vm3966_vm4 = vcmask 23552  }
 0x821   :  { %v5230_v49 = vpop.eup %5229  ;;  %v4245_v28 = vadd.f32 -1.0, %v5228_v32  ;;  %5241 = vpow2.f32 %v3400_v6  ;;  %3683 = vmatprep.mubr.bf16.mxu0 %v3509_v44 }
 0x822   :  { %v5232_v54 = vpop.eup %5231  ;;  %v4246_v4 = vadd.f32 -1.0, %v5230_v49  ;;  %3684 = vmatmul.mubr.bf16.gmra.mrb[116].mxu0 %v3508_v41 }
 0x823   :  { %v5234_v46 = vpop.eup %5233  ;;  %v4247_v55 = vadd.f32 -1.0, %v5232_v54  ;;  %v3458_v40 = vsel %vm3298_vm10, %v6895_v63, %v4245_v28 }
 0x824   :  { %v4248_v8 = vadd.f32 -1.0, %v5234_v46  ;;  %v3459_v10 = vsel %vm3299_vm12, %v6899_v2, %v4246_v4 }
 0x825   :  { %v3460_v3 = vsel %vm3300_vm11, %v6905_v9, %v4247_v55 }
 0x826   :  { %v3461_v25 = vsel %vm3301_vm13, %v6908_v22, %v4248_v8  ;;  %v3510_v12 = vpack.c.bf16 %v3460_v3, %v3458_v40 }
 0x827   :  { %v3511_v36 = vpack.c.bf16 %v3461_v25, %v3459_v10 }
 0x828   :  { %v5236_v5 = vpop.eup %5235 }
 0x829   :  { %v5238_v17 = vpop.eup %5237  ;;  %v4249_v16 = vadd.f32 -1.0, %v5236_v5  ;;  %3691 = vmatprep.mubr.bf16.mxu0 %v3511_v36 }
 0x82a   :  { %v5240_v24 = vpop.eup %5239  ;;  %v4250_v26 = vadd.f32 -1.0, %v5238_v17  ;;  %3692 = vmatmul.mubr.bf16.gmra.mrb[120].mxu0 %v3510_v12 }
 0x82b   :  { %v5242_v58 = vpop.eup %5241  ;;  %v4251_v51 = vadd.f32 -1.0, %v5240_v24  ;;  %v3462_v2 = vsel %vm3302_vm14, %v6921_v29, %v4249_v16 }
 0x82c   :  { %v4252_v63 = vadd.f32 -1.0, %v5242_v58  ;;  %v3463_v22 = vsel %vm3303_vm0, %v6925_v23, %v4250_v26 }
 0x82d   :  { %v3464_v9 = vsel %vm3304_vm15, %v3270_v11, %v4251_v51 }
 0x82e   :  { %v3465_v20 = vsel %vm3305_vm1, %v3272_v18, %v4252_v63  ;;  %v3512_v7 = vpack.c.bf16 %v3464_v9, %v3462_v2 }
 0x82f   :  { %v3513_v0 = vpack.c.bf16 %v3465_v20, %v3463_v22 }
 0x831   :  { %3699 = vmatprep.mubr.bf16.mxu0 %v3513_v0 }
 0x832   :  { %3700 = vmatmul.mubr.bf16.gmra.mrb[124].mxu0 %v3512_v7 }
 0x8ca   :  { %v4407_v47 = vpop.f32.mrb[96].mxu0 }
 0x8cb   :  { %v4408_v14 = vpop.f32.mrb[97].mxu0 }
 0x8cc   :  { %v4409_v52 = vadd.f32 %v4408_v14, %v4407_v47  ;;  %v4410_v56 = vpop.f32.mrb[98].mxu0 }
 0x8cd   :  { %v4411_v21 = vpop.f32.mrb[99].mxu0 }
 0x8ce   :  { %v6958_v29 = vadd.f32 %v4409_v52, %v6955_v62  ;;  %v4412_v27 = vadd.f32 %v4411_v21, %v4410_v56  ;;  %v7037_v21 = vpop.xlane.xlu0 %2111 }
 0x8d0   :  { %v6961_v23 = vadd.f32 %v4412_v27, %v6955_v62  ;;  %3724 = vrot.lane.b32.xlu0 %v6958_v29, %s5485_s26 }
 0x8d2   :  { %3726 = vrot.lane.b32.xlu1 %v6961_v23, %s5485_s26  ;;  %v7039_v27 = vpop.xlane.xlu0 %2117 }
 0x8d4   :  { %v4413_v13 = vpop.f32.mrb[100].mxu0 }
 0x8d5   :  { %v4414_v61 = vpop.f32.mrb[101].mxu0 }
 0x8d6   :  { %v4415_v34 = vadd.f32 %v4414_v61, %v4413_v13  ;;  %v4416_v53 = vpop.f32.mrb[102].mxu0  ;;  %v7042_v13 = vpop.xlane.xlu1 %2114 }
 0x8d7   :  { %v4417_v19 = vpop.f32.mrb[103].mxu0  ;;  %v7045_v61 = vpop.xlane.xlu0 %2120 }
 0x8d8   :  { %v6968_v31 = vadd.f32 %v4415_v34, %v6955_v62  ;;  %v4418_v35 = vadd.f32 %v4417_v19, %v4416_v53 }
 0x8da   :  { %v6971_v11 = vadd.f32 %v4418_v35, %v6955_v62  ;;  %3728 = vrot.lane.b32.xlu0 %v6968_v31, %s5485_s26 }
 0x8db   :  { %v7050_v34 = vpop.xlane.xlu0 %2126 }
 0x8dc   :  { %3730 = vrot.lane.b32.xlu1 %v6971_v11, %s5485_s26  ;;  %v4419_v18 = vpop.f32.mrb[104].mxu0 }
 0x8dd   :  { %v4420_v60 = vpop.f32.mrb[105].mxu0 }
 0x8de   :  { %v4421_v15 = vadd.f32 %v4420_v60, %v4419_v18  ;;  %v4422_v39 = vpop.f32.mrb[106].mxu0 }
 0x8df   :  { %v4423_v30 = vpop.f32.mrb[107].mxu0  ;;  %v7054_v19 = vpop.xlane.xlu0 %2132 }
 0x8e0   :  { %v6978_v59 = vadd.f32 %v4421_v15, %v6955_v62  ;;  %v4424_v45 = vadd.f32 %v4423_v30, %v4422_v39 }
 0x8e2   :  { %v6981_v37 = vadd.f32 %v4424_v45, %v6955_v62  ;;  %3732 = vrot.lane.b32.xlu0 %v6978_v59, %s5485_s26 }
 0x8e3   :  { %v7058_v18 = vpop.xlane.xlu0 %2138 }
 0x8e4   :  { %3734 = vrot.lane.b32.xlu1 %v6981_v37, %s5485_s26 }
 0x8e5   :  { %v4425_v1 = vpop.f32.mrb[108].mxu0 }
 0x8e6   :  { %v4426_v38 = vpop.f32.mrb[109].mxu0 }
 0x8e7   :  { %v4427_v43 = vadd.f32 %v4426_v38, %v4425_v1  ;;  %v4428_v48 = vpop.f32.mrb[110].mxu0  ;;  %v7062_v60 = vpop.xlane.xlu0 %2144 }
 0x8e8   :  { %v4429_v50 = vpop.f32.mrb[111].mxu0 }
 0x8e9   :  { %v6988_v41 = vadd.f32 %v4427_v43, %v6955_v62  ;;  %v4430_v32 = vadd.f32 %v4429_v50, %v4428_v48 }
 0x8eb   :  { %v6991_v6 = vadd.f32 %v4430_v32, %v6955_v62  ;;  %3736 = vrot.lane.b32.xlu0 %v6988_v41, %s5485_s26 }
 0x8ed   :  { %v4431_v44 = vpop.f32.mrb[112].mxu0  ;;  %3738 = vrot.lane.b32.xlu1 %v6991_v6, %s5485_s26 }
 0x8ee   :  { %v4432_v49 = vpop.f32.mrb[113].mxu0 }
 0x8ef   :  { %v4433_v28 = vadd.f32 %v4432_v49, %v4431_v44  ;;  %v4434_v54 = vpop.f32.mrb[114].mxu0 }
 0x8f0   :  { %v4435_v4 = vpop.f32.mrb[115].mxu0 }
 0x8f1   :  { %v6998_v46 = vadd.f32 %v4433_v28, %v6955_v62  ;;  %v4436_v55 = vadd.f32 %v4435_v4, %v4434_v54 }
 0x8f3   :  { %v7001_v8 = vadd.f32 %v4436_v55, %v6955_v62  ;;  %3740 = vrot.lane.b32.xlu0 %v6998_v46, %s5485_s26 }
 0x8f5   :  { %v4437_v40 = vpop.f32.mrb[116].mxu0  ;;  %3742 = vrot.lane.b32.xlu1 %v7001_v8, %s5485_s26 }
 0x8f6   :  { %v4438_v3 = vpop.f32.mrb[117].mxu0 }
 0x8f7   :  { %v4439_v10 = vadd.f32 %v4438_v3, %v4437_v40  ;;  %v4440_v25 = vpop.f32.mrb[118].mxu0 }
 0x8f8   :  { %v4441_v12 = vpop.f32.mrb[119].mxu0 }
 0x8f9   :  { %v7008_v5 = vadd.f32 %v4439_v10, %v6955_v62  ;;  %v4442_v36 = vadd.f32 %v4441_v12, %v4440_v25 }
 0x8fb   :  { %v7011_v17 = vadd.f32 %v4442_v36, %v6955_v62  ;;  %3744 = vrot.lane.b32.xlu0 %v7008_v5, %s5485_s26 }
 0x8fd   :  { %v4443_v16 = vpop.f32.mrb[120].mxu0  ;;  %3746 = vrot.lane.b32.xlu1 %v7011_v17, %s5485_s26 }
 0x8fe   :  { %v4444_v24 = vpop.f32.mrb[121].mxu0 }
 0x8ff   :  { %v4445_v26 = vadd.f32 %v4444_v24, %v4443_v16  ;;  %v4446_v58 = vpop.f32.mrb[122].mxu0 }
 0x900   :  { %v4447_v51 = vpop.f32.mrb[123].mxu0 }
 0x901   :  { %v7018_v63 = vadd.f32 %v4445_v26, %v6955_v62  ;;  %v4448_v2 = vadd.f32 %v4447_v51, %v4446_v58 }
 0x903   :  { %v7021_v9 = vadd.f32 %v4448_v2, %v6955_v62  ;;  %3748 = vrot.lane.b32.xlu0 %v7018_v63, %s5485_s26 }
 0x905   :  { %v4449_v22 = vpop.f32.mrb[124].mxu0  ;;  %3750 = vrot.lane.b32.xlu1 %v7021_v9, %s5485_s26 }
 0x906   :  { %v4450_v20 = vpop.f32.mrb[125].mxu0 }
 0x907   :  { %v4451_v7 = vadd.f32 %v4450_v20, %v4449_v22  ;;  %v4452_v0 = vpop.f32.mrb[126].mxu0 }
 0x908   :  { %v4453_v47 = vpop.f32.mrb[127].mxu0 }
 0x909   :  { %v7028_v14 = vadd.f32 %v4451_v7, %v6955_v62  ;;  %v4454_v52 = vadd.f32 %v4453_v47, %v4452_v0 }
 0x90b   :  { %v7031_v56 = vadd.f32 %v4454_v52, %v6955_v62  ;;  %3752 = vrot.lane.b32.xlu0 %v7028_v14, %s5485_s26  ;;  %v7048_v62 = vpop.xlane.xlu1 %2123 }
 0x90d   :  { %3754 = vrot.lane.b32.xlu1 %v7031_v56, %s5485_s26 }
 0x90f   :  { %v7052_v53 = vpop.xlane.xlu1 %2129 }
 0x913   :  { %v7056_v35 = vpop.xlane.xlu1 %2135 }
 0x92a   :  { %2150 = vadd.xlane.f32.xlu0 %v6739_v33  ;;  %v7060_v33 = vpop.xlane.xlu1 %2141 }
 0x92e   :  { %2156 = vadd.xlane.f32.xlu0 %v6745_v42  ;;  %v7064_v42 = vpop.xlane.xlu1 %2147 }
 0x931   :  { %2153 = vadd.xlane.f32.xlu1 %v6747_v57 }
 0x942   :  { %v3725_v15 = vpop.permute.xlu0 %3724 }
 0x943   :  { %v3772_v57 = vsub.f32 %v6958_v29, %v3725_v15 }
 0x944   :  { %v3727_v39 = vpop.permute.xlu1 %3726 }
 0x945   :  { %v3788_v30 = vmul.f32 0.5, %v3772_v57  ;;  %v3773_v45 = vsub.f32 %v6961_v23, %v3727_v39 }
 0x947   :  { %5243 = vtanh.f32 %v3788_v30  ;;  %v3789_v1 = vmul.f32 0.5, %v3773_v45 }
 0x949   :  { %5245 = vtanh.f32 %v3789_v1 }
 0x94c   :  { %v3729_v38 = vpop.permute.xlu0 %3728 }
 0x94d   :  { %v3774_v43 = vsub.f32 %v6968_v31, %v3729_v38 }
 0x94e   :  { %v3731_v48 = vpop.permute.xlu1 %3730 }
 0x94f   :  { %v3790_v50 = vmul.f32 0.5, %v3774_v43  ;;  %v3775_v32 = vsub.f32 %v6971_v11, %v3731_v48 }
 0x951   :  { %5247 = vtanh.f32 %v3790_v50  ;;  %v3791_v44 = vmul.f32 0.5, %v3775_v32  ;;  %v5244_v49 = vpop.eup %5243 }
 0x952   :  { %v3820_v28 = vadd.f32 1.0, %v5244_v49 }
 0x953   :  { %5249 = vtanh.f32 %v3791_v44  ;;  %v5246_v29 = vpop.eup %5245 }
 0x954   :  { %v3733_v54 = vpop.permute.xlu0 %3732  ;;  %v7070_v4 = vmul.f32 0.5, %v3820_v28  ;;  %v3821_v23 = vadd.f32 1.0, %v5246_v29 }
 0x955   :  { %v3776_v55 = vsub.f32 %v6978_v59, %v3733_v54 }
 0x956   :  { %v3735_v40 = vpop.permute.xlu1 %3734  ;;  %v7073_v3 = vmul.f32 0.5, %v3821_v23  ;;  %v3852_v11 = vsub.f32 1.0, %v7070_v4 }
 0x957   :  { %v3792_v31 = vmul.f32 0.5, %v3776_v55  ;;  %v3777_v10 = vsub.f32 %v6981_v37, %v3735_v40 }
 0x958   :  { %3884 = vrot.lane.b32.xlu1 %v3852_v11, %s5486_s9  ;;  %v3853_v12 = vsub.f32 1.0, %v7073_v3 }
 0x959   :  { %5251 = vtanh.f32 %v3792_v31  ;;  %v3793_v25 = vmul.f32 0.5, %v3777_v10 }
 0x95a   :  { %3886 = vrot.lane.b32.xlu0 %v3853_v12, %s5486_s9 }
 0x95b   :  { %v5248_v36 = vpop.eup %5247  ;;  %5253 = vtanh.f32 %v3793_v25 }
 0x95c   :  { %v3822_v16 = vadd.f32 1.0, %v5248_v36 }
 0x95d   :  { %v5250_v59 = vpop.eup %5249  ;;  %v3737_v24 = vpop.permute.xlu0 %3736 }
 0x95e   :  { %v7080_v26 = vmul.f32 0.5, %v3822_v16  ;;  %v3823_v58 = vadd.f32 1.0, %v5250_v59  ;;  %v3778_v37 = vsub.f32 %v6988_v41, %v3737_v24 }
 0x95f   :  { %v3739_v51 = vpop.permute.xlu1 %3738 }
 0x960   :  { %v7083_v2 = vmul.f32 0.5, %v3823_v58  ;;  %v3794_v22 = vmul.f32 0.5, %v3778_v37  ;;  %v3779_v20 = vsub.f32 %v6991_v6, %v3739_v51  ;;  %v3854_v7 = vsub.f32 1.0, %v7080_v26 }
 0x962   :  { %5255 = vtanh.f32 %v3794_v22  ;;  %v3795_v0 = vmul.f32 0.5, %v3779_v20  ;;  %3888 = vrot.lane.b32.xlu1 %v3854_v7, %s5486_s9  ;;  %v3855_v52 = vsub.f32 1.0, %v7083_v2 }
 0x963   :  { %v5252_v47 = vpop.eup %5251 }
 0x964   :  { %5257 = vtanh.f32 %v3795_v0  ;;  %v3824_v15 = vadd.f32 1.0, %v5252_v47 }
 0x965   :  { %v3741_v57 = vpop.permute.xlu0 %3740  ;;  %v5254_v39 = vpop.eup %5253 }
 0x966   :  { %v3780_v41 = vsub.f32 %v6998_v46, %v3741_v57  ;;  %3890 = vrot.lane.b32.xlu1 %v3855_v52, %s5486_s9  ;;  %v7091_v30 = vmul.f32 0.5, %v3824_v15  ;;  %v3825_v6 = vadd.f32 1.0, %v5254_v39 }
 0x967   :  { %v3743_v45 = vpop.permute.xlu1 %3742 }
 0x968   :  { %v3796_v1 = vmul.f32 0.5, %v3780_v41  ;;  %v3781_v38 = vsub.f32 %v7001_v8, %v3743_v45  ;;  %v7094_v43 = vmul.f32 0.5, %v3825_v6  ;;  %v3856_v48 = vsub.f32 1.0, %v7091_v30 }
 0x96a   :  { %5259 = vtanh.f32 %v3796_v1  ;;  %v3797_v50 = vmul.f32 0.5, %v3781_v38  ;;  %3892 = vrot.lane.b32.xlu0 %v3856_v48, %s5486_s9  ;;  %v3857_v32 = vsub.f32 1.0, %v7094_v43 }
 0x96c   :  { %v5256_v46 = vpop.eup %5255  ;;  %5261 = vtanh.f32 %v3797_v50  ;;  %3894 = vrot.lane.b32.xlu1 %v3857_v32, %s5486_s9 }
 0x96d   :  { %v3826_v44 = vadd.f32 1.0, %v5256_v46  ;;  %v3745_v49 = vpop.permute.xlu0 %3744 }
 0x96e   :  { %v5258_v28 = vpop.eup %5257  ;;  %v3782_v29 = vsub.f32 %v7008_v5, %v3745_v49 }
 0x96f   :  { %v7101_v8 = vmul.f32 0.5, %v3826_v44  ;;  %v3827_v54 = vadd.f32 1.0, %v5258_v28  ;;  %v3747_v23 = vpop.permute.xlu1 %3746 }
 0x970   :  { %v3798_v55 = vmul.f32 0.5, %v3782_v29  ;;  %v3783_v40 = vsub.f32 %v7011_v17, %v3747_v23 }
 0x971   :  { %v7104_v31 = vmul.f32 0.5, %v3827_v54  ;;  %v3858_v10 = vsub.f32 1.0, %v7101_v8 }
 0x972   :  { %5263 = vtanh.f32 %v3798_v55  ;;  %v3799_v11 = vmul.f32 0.5, %v3783_v40 }
 0x973   :  { %3896 = vrot.lane.b32.xlu0 %v3858_v10, %s5486_s9  ;;  %v3859_v25 = vsub.f32 1.0, %v7104_v31 }
 0x974   :  { %v5260_v12 = vpop.eup %5259  ;;  %5265 = vtanh.f32 %v3799_v11 }
 0x975   :  { %v3828_v5 = vadd.f32 1.0, %v5260_v12  ;;  %v3749_v36 = vpop.permute.xlu0 %3748  ;;  %3898 = vrot.lane.b32.xlu1 %v3859_v25, %s5486_s9 }
 0x976   :  { %v5262_v16 = vpop.eup %5261  ;;  %v3784_v59 = vsub.f32 %v7018_v63, %v3749_v36 }
 0x977   :  { %v7111_v17 = vmul.f32 0.5, %v3828_v5  ;;  %v3829_v24 = vadd.f32 1.0, %v5262_v16  ;;  %v3751_v58 = vpop.permute.xlu1 %3750 }
 0x978   :  { %v3800_v37 = vmul.f32 0.5, %v3784_v59  ;;  %v3785_v51 = vsub.f32 %v7021_v9, %v3751_v58 }
 0x979   :  { %v7114_v22 = vmul.f32 0.5, %v3829_v24  ;;  %v3860_v20 = vsub.f32 1.0, %v7111_v17 }
 0x97a   :  { %5267 = vtanh.f32 %v3800_v37  ;;  %v3801_v7 = vmul.f32 0.5, %v3785_v51 }
 0x97b   :  { %3900 = vrot.lane.b32.xlu0 %v3860_v20, %s5486_s9  ;;  %v3861_v0 = vsub.f32 1.0, %v7114_v22 }
 0x97c   :  { %v5264_v47 = vpop.eup %5263  ;;  %5269 = vtanh.f32 %v3801_v7 }
 0x97d   :  { %v3830_v63 = vadd.f32 1.0, %v5264_v47  ;;  %v3753_v52 = vpop.permute.xlu0 %3752  ;;  %3902 = vrot.lane.b32.xlu1 %v3861_v0, %s5486_s9 }
 0x97e   :  { %v5266_v15 = vpop.eup %5265  ;;  %v3786_v57 = vsub.f32 %v7028_v14, %v3753_v52 }
 0x97f   :  { %v7121_v9 = vmul.f32 0.5, %v3830_v63  ;;  %v3831_v39 = vadd.f32 1.0, %v5266_v15  ;;  %v3755_v41 = vpop.permute.xlu1 %3754 }
 0x980   :  { %v3802_v6 = vmul.f32 0.5, %v3786_v57  ;;  %v3787_v45 = vsub.f32 %v7031_v56, %v3755_v41 }
 0x981   :  { %v7124_v1 = vmul.f32 0.5, %v3831_v39  ;;  %v3862_v38 = vsub.f32 1.0, %v7121_v9 }
 0x982   :  { %5271 = vtanh.f32 %v3802_v6  ;;  %v3803_v48 = vmul.f32 0.5, %v3787_v45 }
 0x983   :  { %3904 = vrot.lane.b32.xlu0 %v3862_v38, %s5486_s9  ;;  %v3863_v50 = vsub.f32 1.0, %v7124_v1 }
 0x984   :  { %v5268_v32 = vpop.eup %5267  ;;  %5273 = vtanh.f32 %v3803_v48 }
 0x985   :  { %v3832_v14 = vadd.f32 1.0, %v5268_v32  ;;  %3906 = vrot.lane.b32.xlu1 %v3863_v50, %s5486_s9 }
 0x986   :  { %v5270_v46 = vpop.eup %5269 }
 0x987   :  { %v7130_v44 = vmul.f32 0.5, %v3832_v14  ;;  %v3833_v49 = vadd.f32 1.0, %v5270_v46 }
 0x989   :  { %v7132_v56 = vmul.f32 0.5, %v3833_v49  ;;  %v3864_v28 = vsub.f32 1.0, %v7130_v44 }
 0x98b   :  { %3908 = vrot.lane.b32.xlu0 %v3864_v28, %s5486_s9  ;;  %v3865_v29 = vsub.f32 1.0, %v7132_v56 }
 0x98c   :  { %v5272_v54 = vpop.eup %5271 }
 0x98d   :  { %v3834_v23 = vadd.f32 1.0, %v5272_v54  ;;  %3910 = vrot.lane.b32.xlu1 %v3865_v29, %s5486_s9 }
 0x98e   :  { %v5274_v55 = vpop.eup %5273 }
 0x98f   :  { %v7138_v40 = vmul.f32 0.5, %v3834_v23  ;;  %v3835_v10 = vadd.f32 1.0, %v5274_v55 }
 0x991   :  { %v7140_v11 = vmul.f32 0.5, %v3835_v10  ;;  %v3866_v25 = vsub.f32 1.0, %v7138_v40 }
 0x993   :  { %3912 = vrot.lane.b32.xlu0 %v3866_v25, %s5486_s9  ;;  %v3867_v12 = vsub.f32 1.0, %v7140_v11 }
 0x995   :  { %3914 = vrot.lane.b32.xlu1 %v3867_v12, %s5486_s9 }
 0x9b7   :  { %v7146_v5 = vpop.xlane.xlu0 %2150 }
 0x9bb   :  { %v7150_v16 = vpop.xlane.xlu0 %2156 }
 0x9be   :  { %v7148_v36 = vpop.xlane.xlu1 %2153 }
 0x9ca   :  { %v3885_v59 = vpop.permute.xlu1 %3884 }
 0x9cb   :  { %v3933_v24 = vsel %vm3932_vm2, %v3885_v59, %v7070_v4 }
 0x9cc   :  { %v3950_v58 = vsel %vm3949_vm3, %v3933_v24, %v7037_v21  ;;  %v3887_v37 = vpop.permute.xlu0 %3886 }
 0x9cd   :  { %v3967_v51 = vsel %vm3966_vm4, %v3950_v58, 0.0  ;;  %v3934_v20 = vsel %vm3932_vm2, %v3887_v37, %v7073_v3 }
 0x9ce   :  { %3983 = vst [vmem:[%s7290_s10] sm:$0xff] %v3967_v51  ;;  %v3951_v7 = vsel %vm3949_vm3, %v3934_v20, %v7042_v13 }
 0x9cf   :  { %v3968_v0 = vsel %vm3966_vm4, %v3951_v7, 0.0 }
 0x9d0   :  { %3984 = vst [vmem:[%s7290_s10 + $0x8] sm:$0xff] %v3968_v0 }
 0x9d4   :  { %v3889_v21 = vpop.permute.xlu1 %3888 }
 0x9d5   :  { %v3935_v4 = vsel %vm3932_vm2, %v3889_v21, %v7080_v26 }
 0x9d6   :  { %v3952_v3 = vsel %vm3949_vm3, %v3935_v4, %v7039_v27 }
 0x9d7   :  { %v3969_v47 = vsel %vm3966_vm4, %v3952_v3, 0.0 }
 0x9d8   :  { %3985 = vst [vmem:[%s7290_s10 + $0x10] sm:$0xff] %v3969_v47  ;;  %v3891_v13 = vpop.permute.xlu1 %3890 }
 0x9d9   :  { %v3936_v63 = vsel %vm3932_vm2, %v3891_v13, %v7083_v2 }
 0x9da   :  { %v3953_v52 = vsel %vm3949_vm3, %v3936_v63, %v7045_v61 }
 0x9db   :  { %v3970_v15 = vsel %vm3966_vm4, %v3953_v52, 0.0 }
 0x9dc   :  { %3986 = vst [vmem:[%s7290_s10 + $0x18] sm:$0xff] %v3970_v15  ;;  %v3893_v27 = vpop.permute.xlu0 %3892 }
 0x9dd   :  { %v3937_v26 = vsel %vm3932_vm2, %v3893_v27, %v7091_v30 }
 0x9de   :  { %v3954_v57 = vsel %vm3949_vm3, %v3937_v26, %v7048_v62  ;;  %v3895_v39 = vpop.permute.xlu1 %3894 }
 0x9df   :  { %v3971_v41 = vsel %vm3966_vm4, %v3954_v57, 0.0  ;;  %v3938_v2 = vsel %vm3932_vm2, %v3895_v39, %v7094_v43 }
 0x9e0   :  { %3987 = vst [vmem:[%s7290_s10 + $0x20] sm:$0xff] %v3971_v41  ;;  %v3955_v61 = vsel %vm3949_vm3, %v3938_v2, %v7050_v34 }
 0x9e1   :  { %v3972_v6 = vsel %vm3966_vm4, %v3955_v61, 0.0 }
 0x9e2   :  { %3988 = vst [vmem:[%s7290_s10 + $0x28] sm:$0xff] %v3972_v6 }
 0x9e5   :  { %v3897_v62 = vpop.permute.xlu0 %3896 }
 0x9e6   :  { %v3939_v30 = vsel %vm3932_vm2, %v3897_v62, %v7101_v8 }
 0x9e7   :  { %v3956_v43 = vsel %vm3949_vm3, %v3939_v30, %v7052_v53  ;;  %v3899_v45 = vpop.permute.xlu1 %3898 }
 0x9e8   :  { %v3973_v38 = vsel %vm3966_vm4, %v3956_v43, 0.0  ;;  %v3940_v48 = vsel %vm3932_vm2, %v3899_v45, %v7104_v31 }
 0x9e9   :  { %3989 = vst [vmem:[%s7290_s10 + $0x30] sm:$0xff] %v3973_v38  ;;  %v3957_v34 = vsel %vm3949_vm3, %v3940_v48, %v7054_v19 }
 0x9ea   :  { %v3974_v50 = vsel %vm3966_vm4, %v3957_v34, 0.0 }
 0x9eb   :  { %3990 = vst [vmem:[%s7290_s10 + $0x38] sm:$0xff] %v3974_v50 }
 0x9ed   :  { %v3901_v53 = vpop.permute.xlu0 %3900 }
 0x9ee   :  { %v3941_v8 = vsel %vm3932_vm2, %v3901_v53, %v7111_v17 }
 0x9ef   :  { %v3958_v31 = vsel %vm3949_vm3, %v3941_v8, %v7056_v35  ;;  %v3903_v32 = vpop.permute.xlu1 %3902 }
 0x9f0   :  { %v3975_v14 = vsel %vm3966_vm4, %v3958_v31, 0.0  ;;  %v3942_v46 = vsel %vm3932_vm2, %v3903_v32, %v7114_v22 }
 0x9f1   :  { %3991 = vst [vmem:[%s7290_s10 + $0x40] sm:$0xff] %v3975_v14  ;;  %v3959_v19 = vsel %vm3949_vm3, %v3942_v46, %v7058_v18 }
 0x9f2   :  { %v3976_v49 = vsel %vm3966_vm4, %v3959_v19, 0.0 }
 0x9f3   :  { %3992 = vst [vmem:[%s7290_s10 + $0x48] sm:$0xff] %v3976_v49 }
 0x9f5   :  { %v3905_v35 = vpop.permute.xlu0 %3904 }
 0x9f6   :  { %v3943_v17 = vsel %vm3932_vm2, %v3905_v35, %v7121_v9 }
 0x9f7   :  { %v3960_v22 = vsel %vm3949_vm3, %v3943_v17, %v7060_v33  ;;  %v3907_v28 = vpop.permute.xlu1 %3906 }
 0x9f8   :  { %v3977_v29 = vsel %vm3966_vm4, %v3960_v22, 0.0  ;;  %v3944_v54 = vsel %vm3932_vm2, %v3907_v28, %v7124_v1 }
 0x9f9   :  { %3993 = vst [vmem:[%s7290_s10 + $0x50] sm:$0xff] %v3977_v29  ;;  %v3961_v18 = vsel %vm3949_vm3, %v3944_v54, %v7062_v60 }
 0x9fa   :  { %v3978_v23 = vsel %vm3966_vm4, %v3961_v18, 0.0 }
 0x9fb   :  { %3994 = vst [vmem:[%s7290_s10 + $0x58] sm:$0xff] %v3978_v23 }
 0x9fd   :  { %v3909_v33 = vpop.permute.xlu0 %3908 }
 0x9fe   :  { %v3945_v9 = vsel %vm3932_vm2, %v3909_v33, %v7130_v44 }
 0x9ff   :  { %v3962_v1 = vsel %vm3949_vm3, %v3945_v9, %v7064_v42  ;;  %v3911_v55 = vpop.permute.xlu1 %3910 }
 0xa00   :  { %v3979_v10 = vsel %vm3966_vm4, %v3962_v1, 0.0  ;;  %v3946_v25 = vsel %vm3932_vm2, %v3911_v55, %v7132_v56 }
 0xa01   :  { %3995 = vst [vmem:[%s7290_s10 + $0x60] sm:$0xff] %v3979_v10  ;;  %v3963_v60 = vsel %vm3949_vm3, %v3946_v25, %v7146_v5 }
 0xa02   :  { %v3980_v12 = vsel %vm3966_vm4, %v3963_v60, 0.0 }
 0xa03   :  { %3996 = vst [vmem:[%s7290_s10 + $0x68] sm:$0xff] %v3980_v12 }
 0xa05   :  { %v3913_v42 = vpop.permute.xlu0 %3912 }
 0xa06   :  { %v3947_v44 = vsel %vm3932_vm2, %v3913_v42, %v7138_v40 }
 0xa07   :  { %v3964_v56 = vsel %vm3949_vm3, %v3947_v44, %v7148_v36  ;;  %v3915_v59 = vpop.permute.xlu1 %3914 }
 0xa08   :  { %v3981_v24 = vsel %vm3966_vm4, %v3964_v56, 0.0  ;;  %v3948_v58 = vsel %vm3932_vm2, %v3915_v59, %v7140_v11 }
 0xa09   :  { %3997 = vst [vmem:[%s7290_s10 + $0x70] sm:$0xff] %v3981_v24  ;;  %v3965_v5 = vsel %vm3949_vm3, %v3948_v58, %v7150_v16 }
 0xa0a   :  { %v3982_v37 = vsel %vm3966_vm4, %v3965_v5, 0.0 }
 0xa0b   :  { %3998 = vst [vmem:[%s7290_s10 + $0x78] sm:$0xff] %v3982_v37 }
 0xa0c   :  { %4003 = vsyncpa [#allocation3], 1 }
 0xa0d   :  { %4004 = vsyncpa [#allocation5], 1 }
 0xa0e   :  { %4005 = vsyncpa [#allocation8], 1 }
 0xa0f   :  { %4006 = vsyncpa [#allocation11], 1 }

</bundles_post_ra>
